<compile_context>
chip_gen: v5e
topology: v5e:2x2
jax: 0.10.0
libtpu: 0.0.40
codegen_flags: <defaults>
</compile_context>

<pallas_src>
import math

import jax
import jax.numpy as jnp
from jax.experimental import pallas as pl
from jax.experimental.pallas import tpu as pltpu

# --- small, module-consistent shapes (d_ff == d_model, d_k == 128) -----------
B = 2          # batch               (module: 2)
S = 32         # sequence length     (small)
D = 256        # d_model             (small stand-in for 2048)
H = 2          # num_heads           (keeps d_k identical to the module)
DK = D // H    # d_k = 128           (module: 2048/16 = 128)
F = 256        # d_ff == d_model     (as in the module)
EPS = 1e-5     # nn.LayerNorm default eps
SCALE = 1.0 / math.sqrt(DK)


# ================================ fused kernel ================================

def _decoder_layer_kernel(x_ref, mask_ref, wqkv_ref, bqkv_ref, wo_ref, bo_ref,
                          w1_ref, b1_ref, w2_ref, b2_ref,
                          g1_ref, be1_ref, g2_ref, be2_ref,
                          o_ref, qkv_scr, attn_scr):
    x = x_ref[...]                                          # (B*S, D)

    # ---- fused QKV projection: one (B*S, D) @ (D, 3D) matmul ----------------
    qkv_scr[...] = (jnp.dot(x, wqkv_ref[...],
                            preferred_element_type=jnp.float32) + bqkv_ref[...])

    # ---- multi-head attention: heads are static, lane-dense 128-wide slices -
    masked = mask_ref[...] == 0.0        # matches torch masked_fill(mask == 0)
    for b in range(B):                   # statically unrolled (B*H = 4 tiny tiles)
        rows = pl.ds(b * S, S)
        for h in range(H):
            q = qkv_scr[rows, pl.ds(h * DK, DK)]            # (S, DK)
            k = qkv_scr[rows, pl.ds(D + h * DK, DK)]        # (S, DK)
            v = qkv_scr[rows, pl.ds(2 * D + h * DK, DK)]    # (S, DK)
            # q @ k.T without materializing a transpose of k.
            s = jax.lax.dot_general(q, k, (((1,), (1,)), ((), ())),
                                    preferred_element_type=jnp.float32) * SCALE
            s = jnp.where(masked, -1.0e9, s)
            m = jnp.max(s, axis=-1, keepdims=True)
            p = jnp.exp(s - m)
            l = jnp.sum(p, axis=-1, keepdims=True)
            p = p * pl.reciprocal(l, approx=True)           # softmax(dim=-1)
            attn_scr[rows, pl.ds(h * DK, DK)] = jnp.dot(
                p, v, preferred_element_type=jnp.float32)

    # ---- W_O projection + residual + LayerNorm (norm1) ----------------------
    # (dropout == identity in eval mode)
    y = (jnp.dot(attn_scr[...], wo_ref[...],
                 preferred_element_type=jnp.float32) + bo_ref[...])
    z = x + y
    mean = jnp.mean(z, axis=-1, keepdims=True)
    var = jnp.mean((z - mean) * (z - mean), axis=-1, keepdims=True)
    x1 = (z - mean) * jax.lax.rsqrt(var + EPS) * g1_ref[...] + be1_ref[...]

    # ---- FFN (fc1 -> ReLU -> fc2) + residual + LayerNorm (norm2) ------------
    hdn = jnp.dot(x1, w1_ref[...], preferred_element_type=jnp.float32) + b1_ref[...]
    hdn = jnp.maximum(hdn, 0.0)
    y2 = jnp.dot(hdn, w2_ref[...], preferred_element_type=jnp.float32) + b2_ref[...]
    z2 = x1 + y2
    mean2 = jnp.mean(z2, axis=-1, keepdims=True)
    var2 = jnp.mean((z2 - mean2) * (z2 - mean2), axis=-1, keepdims=True)
    o_ref[...] = (z2 - mean2) * jax.lax.rsqrt(var2 + EPS) * g2_ref[...] + be2_ref[...]


# ================================== wrapper ===================================

@jax.jit
def decoder_layer_pallas(x, mask, params):
    """x: (B, S, D) float32; mask: (S, S) (0 = masked, nonzero = keep)."""
    p = params
    x2d = x.reshape(B * S, D)            # cheap row-major reshape, no transpose
    out2d = pl.pallas_call(
        _decoder_layer_kernel,
        out_shape=jax.ShapeDtypeStruct((B * S, D), jnp.float32),
        scratch_shapes=[
            pltpu.VMEM((B * S, 3 * D), jnp.float32),   # fused Q|K|V slab
            pltpu.VMEM((B * S, D), jnp.float32),       # combined attention out
        ],
    )(x2d, mask,
      p["wqkv"], p["bqkv"], p["wo"], p["bo"],
      p["w1"], p["b1"], p["w2"], p["b2"],
      p["g1"], p["be1"], p["g2"], p["be2"])
    return out2d.reshape(B, S, D)


# ============================ pure-JAX reference ==============================

def decoder_layer_ref(x, mask, p):
    def linear(t, w, b):
        return t @ w + b

    def layernorm(t, g, b):
        mean = jnp.mean(t, axis=-1, keepdims=True)
        var = jnp.mean((t - mean) ** 2, axis=-1, keepdims=True)
        return (t - mean) / jnp.sqrt(var + EPS) * g + b

    q = linear(x, p["wq"], p["bq"]).reshape(B, S, H, DK).transpose(0, 2, 1, 3)
    k = linear(x, p["wk"], p["bk"]).reshape(B, S, H, DK).transpose(0, 2, 1, 3)
    v = linear(x, p["wv"], p["bv"]).reshape(B, S, H, DK).transpose(0, 2, 1, 3)

    s = jnp.einsum("bhqd,bhkd->bhqk", q, k) / math.sqrt(DK)
    s = jnp.where(mask[None, None] == 0, -1.0e9, s)
    a = jax.nn.softmax(s, axis=-1)
    o = jnp.einsum("bhqk,bhkd->bhqd", a, v)
    o = o.transpose(0, 2, 1, 3).reshape(B, S, D)
    o = linear(o, p["wo"], p["bo"])

    x = layernorm(x + o, p["g1"], p["be1"])
    ff = linear(jnp.maximum(linear(x, p["w1"], p["b1"]), 0.0), p["w2"], p["b2"])
    x = layernorm(x + ff, p["g2"], p["be2"])
    return x


# =================================== main =====================================

if __name__ == "__main__":
    key = jax.random.PRNGKey(0)
    keys = jax.random.split(key, 12)

    def init_w(k, shape, scale=0.02):
        return (scale * jax.random.normal(k, shape)).astype(jnp.float32)

    # Weights stored as (in, out); equivalent to PyTorch W.T with W (out, in).
    params = {
        "wq": init_w(keys[0], (D, D)), "bq": init_w(keys[1], (1, D)),
        "wk": init_w(keys[2], (D, D)), "bk": init_w(keys[3], (1, D)),
        "wv": init_w(keys[4], (D, D)), "bv": init_w(keys[5], (1, D)),
        "wo": init_w(keys[6], (D, D)), "bo": init_w(keys[7], (1, D)),
        "w1": init_w(keys[8], (D, F)), "b1": init_w(keys[9], (1, F)),
        "w2": init_w(keys[10], (F, D)), "b2": init_w(keys[11], (1, D)),
        # LayerNorm default init: weight = 1, bias = 0
        "g1": jnp.ones((1, D), jnp.float32), "be1": jnp.zeros((1, D), jnp.float32),
        "g2": jnp.ones((1, D), jnp.float32), "be2": jnp.zeros((1, D), jnp.float32),
    }
    # Fused QKV weight / bias for the kernel.
    params["wqkv"] = jnp.concatenate(
        [params["wq"], params["wk"], params["wv"]], axis=1)     # (D, 3D)
    params["bqkv"] = jnp.concatenate(
        [params["bq"], params["bk"], params["bv"]], axis=1)     # (1, 3D)

    x = jax.random.normal(jax.random.PRNGKey(42), (B, S, D), dtype=jnp.float32)
    target_mask = jnp.tril(jnp.ones((S, S), dtype=jnp.float32))  # causal mask

    out = decoder_layer_pallas(x, target_mask, params)
    out = jax.block_until_ready(out)

    ref = decoder_layer_ref(x, target_mask, params)
    assert out.shape == (B, S, D)
    assert jnp.allclose(out, ref, atol=1e-3, rtol=1e-3), (
        "mismatch vs reference, max abs err = %e"
        % float(jnp.max(jnp.abs(out - ref))))

    print("KERNEL_OK")
</pallas_src>

<mosaic_0001>
module attributes {stable_mosaic.version = 11 : i64} {
  func.func @_decoder_layer_kernel(%arg0: memref<64x256xf32, #tpu.memory_space<vmem>>, %arg1: memref<32x32xf32, #tpu.memory_space<vmem>>, %arg2: memref<256x768xf32, #tpu.memory_space<vmem>>, %arg3: memref<1x768xf32, #tpu.memory_space<vmem>>, %arg4: memref<256x256xf32, #tpu.memory_space<vmem>>, %arg5: memref<1x256xf32, #tpu.memory_space<vmem>>, %arg6: memref<256x256xf32, #tpu.memory_space<vmem>>, %arg7: memref<1x256xf32, #tpu.memory_space<vmem>>, %arg8: memref<256x256xf32, #tpu.memory_space<vmem>>, %arg9: memref<1x256xf32, #tpu.memory_space<vmem>>, %arg10: memref<1x256xf32, #tpu.memory_space<vmem>>, %arg11: memref<1x256xf32, #tpu.memory_space<vmem>>, %arg12: memref<1x256xf32, #tpu.memory_space<vmem>>, %arg13: memref<1x256xf32, #tpu.memory_space<vmem>>, %arg14: memref<64x256xf32, #tpu.memory_space<vmem>>, %arg15: memref<64x768xf32, #tpu.memory_space<vmem>>, %arg16: memref<64x256xf32, #tpu.memory_space<vmem>>) attributes {dimension_semantics = [], scalar_prefetch = 0 : i64, scratch_operands = 2 : i64, tpu.core_type = #tpu.core_type<tc>} {
    %c0 = arith.constant 0 : index
    %c0_0 = arith.constant 0 : index
    %0 = vector.load %arg0[%c0, %c0_0] : memref<64x256xf32, #tpu.memory_space<vmem>>, vector<64x256xf32>
    %c0_1 = arith.constant 0 : index
    %c0_2 = arith.constant 0 : index
    %1 = vector.load %arg2[%c0_1, %c0_2] : memref<256x768xf32, #tpu.memory_space<vmem>>, vector<256x768xf32>
    %cst = arith.constant dense<0.000000e+00> : vector<64x768xf32>
    %2 = tpu.matmul %0, %1, %cst {dimension_numbers = #tpu.dot_dimension_numbers<[1], [0], [0], [1], [0, 0, 1, 1], [], []>} : vector<64x256xf32>, vector<256x768xf32>, vector<64x768xf32> -> vector<64x768xf32>
    %c0_3 = arith.constant 0 : index
    %c0_4 = arith.constant 0 : index
    %3 = vector.load %arg3[%c0_3, %c0_4] : memref<1x768xf32, #tpu.memory_space<vmem>>, vector<1x768xf32>
    %4 = vector.broadcast %3 : vector<1x768xf32> to vector<64x768xf32>
    %5 = arith.addf %2, %4 : vector<64x768xf32>
    %c0_5 = arith.constant 0 : index
    %c0_6 = arith.constant 0 : index
    %6 = vector.load %arg15[%c0_5, %c0_6] : memref<64x768xf32, #tpu.memory_space<vmem>>, vector<64x768xf32>
    tpu.vector_store %arg15[%c0_5, %c0_6], %5 {strides = array<i32>} : memref<64x768xf32, #tpu.memory_space<vmem>>, vector<64x768xf32>,
    %c0_7 = arith.constant 0 : index
    %c0_8 = arith.constant 0 : index
    %7 = vector.load %arg1[%c0_7, %c0_8] : memref<32x32xf32, #tpu.memory_space<vmem>>, vector<32x32xf32>
    %cst_9 = arith.constant 0.000000e+00 : f32
    %8 = vector.broadcast %cst_9 : f32 to vector<32x32xf32>
    %9 = arith.cmpf oeq, %7, %8 : vector<32x32xf32>
    %c0_10 = arith.constant 0 : index
    %c0_11 = arith.constant 0 : index
    %10 = vector.load %arg15[%c0_10, %c0_11] : memref<64x768xf32, #tpu.memory_space<vmem>>, vector<32x128xf32>
    %c0_12 = arith.constant 0 : index
    %c256 = arith.constant 256 : index
    %11 = vector.load %arg15[%c0_12, %c256] : memref<64x768xf32, #tpu.memory_space<vmem>>, vector<32x128xf32>
    %c0_13 = arith.constant 0 : index
    %c512 = arith.constant 512 : index
    %12 = vector.load %arg15[%c0_13, %c512] : memref<64x768xf32, #tpu.memory_space<vmem>>, vector<32x128xf32>
    %cst_14 = arith.constant dense<0.000000e+00> : vector<32x32xf32>
    %13 = tpu.matmul %10, %11, %cst_14 {dimension_numbers = #tpu.dot_dimension_numbers<[1], [1], [0], [0], [0, 0, 1, 0], [], []>} : vector<32x128xf32>, vector<32x128xf32>, vector<32x32xf32> -> vector<32x32xf32>
    %cst_15 = arith.constant 0.0883883461 : f32
    %14 = vector.broadcast %cst_15 : f32 to vector<32x32xf32>
    %15 = arith.mulf %13, %14 : vector<32x32xf32>
    %cst_16 = arith.constant -1.000000e+09 : f32
    %16 = vector.broadcast %cst_16 : f32 to vector<32x32xf32>
    %17 = arith.select %9, %16, %15 : vector<32x32xi1>, vector<32x32xf32>
    %cst_17 = arith.constant dense<0xFF800000> : vector<32xf32>
    %18 = vector.multi_reduction <maximumf>, %17, %cst_17 [1] : vector<32x32xf32> to vector<32xf32>
    %19 = vector.shape_cast %18 : vector<32xf32> to vector<32x1xf32>
    %20 = vector.broadcast %19 : vector<32x1xf32> to vector<32x32xf32>
    %21 = arith.subf %17, %20 : vector<32x32xf32>
    %22 = math.exp %21 : vector<32x32xf32>
    %cst_18 = arith.constant dense<0.000000e+00> : vector<32xf32>
    %23 = vector.multi_reduction <add>, %22, %cst_18 [1] : vector<32x32xf32> to vector<32xf32>
    %24 = vector.shape_cast %23 : vector<32xf32> to vector<32x1xf32>
    %25 = tpu.reciprocal %24 {approx = true} : vector<32x1xf32> -> vector<32x1xf32>
    %26 = vector.broadcast %25 : vector<32x1xf32> to vector<32x32xf32>
    %27 = arith.mulf %22, %26 : vector<32x32xf32>
    %cst_19 = arith.constant dense<0.000000e+00> : vector<32x128xf32>
    %28 = tpu.matmul %27, %12, %cst_19 {dimension_numbers = #tpu.dot_dimension_numbers<[1], [0], [0], [1], [0, 0, 1, 1], [], []>} : vector<32x32xf32>, vector<32x128xf32>, vector<32x128xf32> -> vector<32x128xf32>
    %c0_20 = arith.constant 0 : index
    %c0_21 = arith.constant 0 : index
    %29 = vector.load %arg16[%c0_20, %c0_21] : memref<64x256xf32, #tpu.memory_space<vmem>>, vector<32x128xf32>
    tpu.vector_store %arg16[%c0_20, %c0_21], %28 {strides = array<i32>} : memref<64x256xf32, #tpu.memory_space<vmem>>, vector<32x128xf32>,
    %c0_22 = arith.constant 0 : index
    %c128 = arith.constant 128 : index
    %30 = vector.load %arg15[%c0_22, %c128] : memref<64x768xf32, #tpu.memory_space<vmem>>, vector<32x128xf32>
    %c0_23 = arith.constant 0 : index
    %c384 = arith.constant 384 : index
    %31 = vector.load %arg15[%c0_23, %c384] : memref<64x768xf32, #tpu.memory_space<vmem>>, vector<32x128xf32>
    %c0_24 = arith.constant 0 : index
    %c640 = arith.constant 640 : index
    %32 = vector.load %arg15[%c0_24, %c640] : memref<64x768xf32, #tpu.memory_space<vmem>>, vector<32x128xf32>
    %cst_25 = arith.constant dense<0.000000e+00> : vector<32x32xf32>
    %33 = tpu.matmul %30, %31, %cst_25 {dimension_numbers = #tpu.dot_dimension_numbers<[1], [1], [0], [0], [0, 0, 1, 0], [], []>} : vector<32x128xf32>, vector<32x128xf32>, vector<32x32xf32> -> vector<32x32xf32>
    %cst_26 = arith.constant 0.0883883461 : f32
    %34 = vector.broadcast %cst_26 : f32 to vector<32x32xf32>
    %35 = arith.mulf %33, %34 : vector<32x32xf32>
    %cst_27 = arith.constant -1.000000e+09 : f32
    %36 = vector.broadcast %cst_27 : f32 to vector<32x32xf32>
    %37 = arith.select %9, %36, %35 : vector<32x32xi1>, vector<32x32xf32>
    %cst_28 = arith.constant dense<0xFF800000> : vector<32xf32>
    %38 = vector.multi_reduction <maximumf>, %37, %cst_28 [1] : vector<32x32xf32> to vector<32xf32>
    %39 = vector.shape_cast %38 : vector<32xf32> to vector<32x1xf32>
    %40 = vector.broadcast %39 : vector<32x1xf32> to vector<32x32xf32>
    %41 = arith.subf %37, %40 : vector<32x32xf32>
    %42 = math.exp %41 : vector<32x32xf32>
    %cst_29 = arith.constant dense<0.000000e+00> : vector<32xf32>
    %43 = vector.multi_reduction <add>, %42, %cst_29 [1] : vector<32x32xf32> to vector<32xf32>
    %44 = vector.shape_cast %43 : vector<32xf32> to vector<32x1xf32>
    %45 = tpu.reciprocal %44 {approx = true} : vector<32x1xf32> -> vector<32x1xf32>
    %46 = vector.broadcast %45 : vector<32x1xf32> to vector<32x32xf32>
    %47 = arith.mulf %42, %46 : vector<32x32xf32>
    %cst_30 = arith.constant dense<0.000000e+00> : vector<32x128xf32>
    %48 = tpu.matmul %47, %32, %cst_30 {dimension_numbers = #tpu.dot_dimension_numbers<[1], [0], [0], [1], [0, 0, 1, 1], [], []>} : vector<32x32xf32>, vector<32x128xf32>, vector<32x128xf32> -> vector<32x128xf32>
    %c0_31 = arith.constant 0 : index
    %c128_32 = arith.constant 128 : index
    %49 = vector.load %arg16[%c0_31, %c128_32] : memref<64x256xf32, #tpu.memory_space<vmem>>, vector<32x128xf32>
    tpu.vector_store %arg16[%c0_31, %c128_32], %48 {strides = array<i32>} : memref<64x256xf32, #tpu.memory_space<vmem>>, vector<32x128xf32>,
    %c32 = arith.constant 32 : index
    %c0_33 = arith.constant 0 : index
    %50 = vector.load %arg15[%c32, %c0_33] : memref<64x768xf32, #tpu.memory_space<vmem>>, vector<32x128xf32>
    %c32_34 = arith.constant 32 : index
    %c256_35 = arith.constant 256 : index
    %51 = vector.load %arg15[%c32_34, %c256_35] : memref<64x768xf32, #tpu.memory_space<vmem>>, vector<32x128xf32>
    %c32_36 = arith.constant 32 : index
    %c512_37 = arith.constant 512 : index
    %52 = vector.load %arg15[%c32_36, %c512_37] : memref<64x768xf32, #tpu.memory_space<vmem>>, vector<32x128xf32>
    %cst_38 = arith.constant dense<0.000000e+00> : vector<32x32xf32>
    %53 = tpu.matmul %50, %51, %cst_38 {dimension_numbers = #tpu.dot_dimension_numbers<[1], [1], [0], [0], [0, 0, 1, 0], [], []>} : vector<32x128xf32>, vector<32x128xf32>, vector<32x32xf32> -> vector<32x32xf32>
    %cst_39 = arith.constant 0.0883883461 : f32
    %54 = vector.broadcast %cst_39 : f32 to vector<32x32xf32>
    %55 = arith.mulf %53, %54 : vector<32x32xf32>
    %cst_40 = arith.constant -1.000000e+09 : f32
    %56 = vector.broadcast %cst_40 : f32 to vector<32x32xf32>
    %57 = arith.select %9, %56, %55 : vector<32x32xi1>, vector<32x32xf32>
    %cst_41 = arith.constant dense<0xFF800000> : vector<32xf32>
    %58 = vector.multi_reduction <maximumf>, %57, %cst_41 [1] : vector<32x32xf32> to vector<32xf32>
    %59 = vector.shape_cast %58 : vector<32xf32> to vector<32x1xf32>
    %60 = vector.broadcast %59 : vector<32x1xf32> to vector<32x32xf32>
    %61 = arith.subf %57, %60 : vector<32x32xf32>
    %62 = math.exp %61 : vector<32x32xf32>
    %cst_42 = arith.constant dense<0.000000e+00> : vector<32xf32>
    %63 = vector.multi_reduction <add>, %62, %cst_42 [1] : vector<32x32xf32> to vector<32xf32>
    %64 = vector.shape_cast %63 : vector<32xf32> to vector<32x1xf32>
    %65 = tpu.reciprocal %64 {approx = true} : vector<32x1xf32> -> vector<32x1xf32>
    %66 = vector.broadcast %65 : vector<32x1xf32> to vector<32x32xf32>
    %67 = arith.mulf %62, %66 : vector<32x32xf32>
    %cst_43 = arith.constant dense<0.000000e+00> : vector<32x128xf32>
    %68 = tpu.matmul %67, %52, %cst_43 {dimension_numbers = #tpu.dot_dimension_numbers<[1], [0], [0], [1], [0, 0, 1, 1], [], []>} : vector<32x32xf32>, vector<32x128xf32>, vector<32x128xf32> -> vector<32x128xf32>
    %c32_44 = arith.constant 32 : index
    %c0_45 = arith.constant 0 : index
    %69 = vector.load %arg16[%c32_44, %c0_45] : memref<64x256xf32, #tpu.memory_space<vmem>>, vector<32x128xf32>
    tpu.vector_store %arg16[%c32_44, %c0_45], %68 {strides = array<i32>} : memref<64x256xf32, #tpu.memory_space<vmem>>, vector<32x128xf32>,
    %c32_46 = arith.constant 32 : index
    %c128_47 = arith.constant 128 : index
    %70 = vector.load %arg15[%c32_46, %c128_47] : memref<64x768xf32, #tpu.memory_space<vmem>>, vector<32x128xf32>
    %c32_48 = arith.constant 32 : index
    %c384_49 = arith.constant 384 : index
    %71 = vector.load %arg15[%c32_48, %c384_49] : memref<64x768xf32, #tpu.memory_space<vmem>>, vector<32x128xf32>
    %c32_50 = arith.constant 32 : index
    %c640_51 = arith.constant 640 : index
    %72 = vector.load %arg15[%c32_50, %c640_51] : memref<64x768xf32, #tpu.memory_space<vmem>>, vector<32x128xf32>
    %cst_52 = arith.constant dense<0.000000e+00> : vector<32x32xf32>
    %73 = tpu.matmul %70, %71, %cst_52 {dimension_numbers = #tpu.dot_dimension_numbers<[1], [1], [0], [0], [0, 0, 1, 0], [], []>} : vector<32x128xf32>, vector<32x128xf32>, vector<32x32xf32> -> vector<32x32xf32>
    %cst_53 = arith.constant 0.0883883461 : f32
    %74 = vector.broadcast %cst_53 : f32 to vector<32x32xf32>
    %75 = arith.mulf %73, %74 : vector<32x32xf32>
    %cst_54 = arith.constant -1.000000e+09 : f32
    %76 = vector.broadcast %cst_54 : f32 to vector<32x32xf32>
    %77 = arith.select %9, %76, %75 : vector<32x32xi1>, vector<32x32xf32>
    %cst_55 = arith.constant dense<0xFF800000> : vector<32xf32>
    %78 = vector.multi_reduction <maximumf>, %77, %cst_55 [1] : vector<32x32xf32> to vector<32xf32>
    %79 = vector.shape_cast %78 : vector<32xf32> to vector<32x1xf32>
    %80 = vector.broadcast %79 : vector<32x1xf32> to vector<32x32xf32>
    %81 = arith.subf %77, %80 : vector<32x32xf32>
    %82 = math.exp %81 : vector<32x32xf32>
    %cst_56 = arith.constant dense<0.000000e+00> : vector<32xf32>
    %83 = vector.multi_reduction <add>, %82, %cst_56 [1] : vector<32x32xf32> to vector<32xf32>
    %84 = vector.shape_cast %83 : vector<32xf32> to vector<32x1xf32>
    %85 = tpu.reciprocal %84 {approx = true} : vector<32x1xf32> -> vector<32x1xf32>
    %86 = vector.broadcast %85 : vector<32x1xf32> to vector<32x32xf32>
    %87 = arith.mulf %82, %86 : vector<32x32xf32>
    %cst_57 = arith.constant dense<0.000000e+00> : vector<32x128xf32>
    %88 = tpu.matmul %87, %72, %cst_57 {dimension_numbers = #tpu.dot_dimension_numbers<[1], [0], [0], [1], [0, 0, 1, 1], [], []>} : vector<32x32xf32>, vector<32x128xf32>, vector<32x128xf32> -> vector<32x128xf32>
    %c32_58 = arith.constant 32 : index
    %c128_59 = arith.constant 128 : index
    %89 = vector.load %arg16[%c32_58, %c128_59] : memref<64x256xf32, #tpu.memory_space<vmem>>, vector<32x128xf32>
    tpu.vector_store %arg16[%c32_58, %c128_59], %88 {strides = array<i32>} : memref<64x256xf32, #tpu.memory_space<vmem>>, vector<32x128xf32>,
    %c0_60 = arith.constant 0 : index
    %c0_61 = arith.constant 0 : index
    %90 = vector.load %arg16[%c0_60, %c0_61] : memref<64x256xf32, #tpu.memory_space<vmem>>, vector<64x256xf32>
    %c0_62 = arith.constant 0 : index
    %c0_63 = arith.constant 0 : index
    %91 = vector.load %arg4[%c0_62, %c0_63] : memref<256x256xf32, #tpu.memory_space<vmem>>, vector<256x256xf32>
    %cst_64 = arith.constant dense<0.000000e+00> : vector<64x256xf32>
    %92 = tpu.matmul %90, %91, %cst_64 {dimension_numbers = #tpu.dot_dimension_numbers<[1], [0], [0], [1], [0, 0, 1, 1], [], []>} : vector<64x256xf32>, vector<256x256xf32>, vector<64x256xf32> -> vector<64x256xf32>
    %c0_65 = arith.constant 0 : index
    %c0_66 = arith.constant 0 : index
    %93 = vector.load %arg5[%c0_65, %c0_66] : memref<1x256xf32, #tpu.memory_space<vmem>>, vector<1x256xf32>
    %94 = vector.broadcast %93 : vector<1x256xf32> to vector<64x256xf32>
    %95 = arith.addf %92, %94 : vector<64x256xf32>
    %96 = arith.addf %0, %95 : vector<64x256xf32>
    %cst_67 = arith.constant dense<0.000000e+00> : vector<64xf32>
    %97 = vector.multi_reduction <add>, %96, %cst_67 [1] : vector<64x256xf32> to vector<64xf32>
    %98 = vector.shape_cast %97 : vector<64xf32> to vector<64x1xf32>
    %cst_68 = arith.constant 2.560000e+02 : f32
    %99 = vector.broadcast %cst_68 : f32 to vector<64x1xf32>
    %100 = arith.divf %98, %99 : vector<64x1xf32>
    %101 = vector.broadcast %100 : vector<64x1xf32> to vector<64x256xf32>
    %102 = arith.subf %96, %101 : vector<64x256xf32>
    %103 = vector.broadcast %100 : vector<64x1xf32> to vector<64x256xf32>
    %104 = arith.subf %96, %103 : vector<64x256xf32>
    %105 = arith.mulf %102, %104 : vector<64x256xf32>
    %cst_69 = arith.constant dense<0.000000e+00> : vector<64xf32>
    %106 = vector.multi_reduction <add>, %105, %cst_69 [1] : vector<64x256xf32> to vector<64xf32>
    %107 = vector.shape_cast %106 : vector<64xf32> to vector<64x1xf32>
    %cst_70 = arith.constant 2.560000e+02 : f32
    %108 = vector.broadcast %cst_70 : f32 to vector<64x1xf32>
    %109 = arith.divf %107, %108 : vector<64x1xf32>
    %110 = vector.broadcast %100 : vector<64x1xf32> to vector<64x256xf32>
    %111 = arith.subf %96, %110 : vector<64x256xf32>
    %cst_71 = arith.constant 9.99999974E-6 : f32
    %112 = vector.broadcast %cst_71 : f32 to vector<64x1xf32>
    %113 = arith.addf %109, %112 : vector<64x1xf32>
    %114 = math.rsqrt %113 : vector<64x1xf32>
    %115 = vector.broadcast %114 : vector<64x1xf32> to vector<64x256xf32>
    %116 = arith.mulf %111, %115 : vector<64x256xf32>
    %c0_72 = arith.constant 0 : index
    %c0_73 = arith.constant 0 : index
    %117 = vector.load %arg10[%c0_72, %c0_73] : memref<1x256xf32, #tpu.memory_space<vmem>>, vector<1x256xf32>
    %118 = vector.broadcast %117 : vector<1x256xf32> to vector<64x256xf32>
    %119 = arith.mulf %116, %118 : vector<64x256xf32>
    %c0_74 = arith.constant 0 : index
    %c0_75 = arith.constant 0 : index
    %120 = vector.load %arg11[%c0_74, %c0_75] : memref<1x256xf32, #tpu.memory_space<vmem>>, vector<1x256xf32>
    %121 = vector.broadcast %120 : vector<1x256xf32> to vector<64x256xf32>
    %122 = arith.addf %119, %121 : vector<64x256xf32>
    %c0_76 = arith.constant 0 : index
    %c0_77 = arith.constant 0 : index
    %123 = vector.load %arg6[%c0_76, %c0_77] : memref<256x256xf32, #tpu.memory_space<vmem>>, vector<256x256xf32>
    %cst_78 = arith.constant dense<0.000000e+00> : vector<64x256xf32>
    %124 = tpu.matmul %122, %123, %cst_78 {dimension_numbers = #tpu.dot_dimension_numbers<[1], [0], [0], [1], [0, 0, 1, 1], [], []>} : vector<64x256xf32>, vector<256x256xf32>, vector<64x256xf32> -> vector<64x256xf32>
    %c0_79 = arith.constant 0 : index
    %c0_80 = arith.constant 0 : index
    %125 = vector.load %arg7[%c0_79, %c0_80] : memref<1x256xf32, #tpu.memory_space<vmem>>, vector<1x256xf32>
    %126 = vector.broadcast %125 : vector<1x256xf32> to vector<64x256xf32>
    %127 = arith.addf %124, %126 : vector<64x256xf32>
    %cst_81 = arith.constant 0.000000e+00 : f32
    %128 = vector.broadcast %cst_81 : f32 to vector<64x256xf32>
    %129 = arith.maximumf %127, %128 : vector<64x256xf32>
    %c0_82 = arith.constant 0 : index
    %c0_83 = arith.constant 0 : index
    %130 = vector.load %arg8[%c0_82, %c0_83] : memref<256x256xf32, #tpu.memory_space<vmem>>, vector<256x256xf32>
    %cst_84 = arith.constant dense<0.000000e+00> : vector<64x256xf32>
    %131 = tpu.matmul %129, %130, %cst_84 {dimension_numbers = #tpu.dot_dimension_numbers<[1], [0], [0], [1], [0, 0, 1, 1], [], []>} : vector<64x256xf32>, vector<256x256xf32>, vector<64x256xf32> -> vector<64x256xf32>
    %c0_85 = arith.constant 0 : index
    %c0_86 = arith.constant 0 : index
    %132 = vector.load %arg9[%c0_85, %c0_86] : memref<1x256xf32, #tpu.memory_space<vmem>>, vector<1x256xf32>
    %133 = vector.broadcast %132 : vector<1x256xf32> to vector<64x256xf32>
    %134 = arith.addf %131, %133 : vector<64x256xf32>
    %135 = arith.addf %122, %134 : vector<64x256xf32>
    %cst_87 = arith.constant dense<0.000000e+00> : vector<64xf32>
    %136 = vector.multi_reduction <add>, %135, %cst_87 [1] : vector<64x256xf32> to vector<64xf32>
    %137 = vector.shape_cast %136 : vector<64xf32> to vector<64x1xf32>
    %cst_88 = arith.constant 2.560000e+02 : f32
    %138 = vector.broadcast %cst_88 : f32 to vector<64x1xf32>
    %139 = arith.divf %137, %138 : vector<64x1xf32>
    %140 = vector.broadcast %139 : vector<64x1xf32> to vector<64x256xf32>
    %141 = arith.subf %135, %140 : vector<64x256xf32>
    %142 = vector.broadcast %139 : vector<64x1xf32> to vector<64x256xf32>
    %143 = arith.subf %135, %142 : vector<64x256xf32>
    %144 = arith.mulf %141, %143 : vector<64x256xf32>
    %cst_89 = arith.constant dense<0.000000e+00> : vector<64xf32>
    %145 = vector.multi_reduction <add>, %144, %cst_89 [1] : vector<64x256xf32> to vector<64xf32>
    %146 = vector.shape_cast %145 : vector<64xf32> to vector<64x1xf32>
    %cst_90 = arith.constant 2.560000e+02 : f32
    %147 = vector.broadcast %cst_90 : f32 to vector<64x1xf32>
    %148 = arith.divf %146, %147 : vector<64x1xf32>
    %149 = vector.broadcast %139 : vector<64x1xf32> to vector<64x256xf32>
    %150 = arith.subf %135, %149 : vector<64x256xf32>
    %cst_91 = arith.constant 9.99999974E-6 : f32
    %151 = vector.broadcast %cst_91 : f32 to vector<64x1xf32>
    %152 = arith.addf %148, %151 : vector<64x1xf32>
    %153 = math.rsqrt %152 : vector<64x1xf32>
    %154 = vector.broadcast %153 : vector<64x1xf32> to vector<64x256xf32>
    %155 = arith.mulf %150, %154 : vector<64x256xf32>
    %c0_92 = arith.constant 0 : index
    %c0_93 = arith.constant 0 : index
    %156 = vector.load %arg12[%c0_92, %c0_93] : memref<1x256xf32, #tpu.memory_space<vmem>>, vector<1x256xf32>
    %157 = vector.broadcast %156 : vector<1x256xf32> to vector<64x256xf32>
    %158 = arith.mulf %155, %157 : vector<64x256xf32>
    %c0_94 = arith.constant 0 : index
    %c0_95 = arith.constant 0 : index
    %159 = vector.load %arg13[%c0_94, %c0_95] : memref<1x256xf32, #tpu.memory_space<vmem>>, vector<1x256xf32>
    %160 = vector.broadcast %159 : vector<1x256xf32> to vector<64x256xf32>
    %161 = arith.addf %158, %160 : vector<64x256xf32>
    %c0_96 = arith.constant 0 : index
    %c0_97 = arith.constant 0 : index
    %162 = vector.load %arg14[%c0_96, %c0_97] : memref<64x256xf32, #tpu.memory_space<vmem>>, vector<64x256xf32>
    tpu.vector_store %arg14[%c0_96, %c0_97], %161 {strides = array<i32>} : memref<64x256xf32, #tpu.memory_space<vmem>>, vector<64x256xf32>,
    return
  }
}

</mosaic_0001>

<bundles_post_ra>
// kernel: decoder_layer_pallas.1
= control target key start
LH: loop header
LB: loop body
LE: loop exit
PB: predicated region body
PF: predicated region fallthrough
CT: control target
= control target key end

     0   :  { %19 = vsyncpa [#allocation5], 0  ;;  %s4501_s0 = inlined_call_operand.hbm [shape: f32[64,256], index: 0, kind: input, shape index: {}]   ;;  %s4502_s1 = inlined_call_operand.hbm [shape: f32[32,32], index: 1, kind: input, shape index: {}]   ;;  %s4503_s2 = inlined_call_operand.hbm [shape: f32[256,768], index: 2, kind: input, shape index: {}]   ;;  %s4504_s3 = inlined_call_operand.vmem [shape: f32[1,768], index: 3, kind: input, shape index: {}]   ;;  %s4505_s4 = inlined_call_operand.hbm [shape: f32[256,256], index: 4, kind: input, shape index: {}]   ;;  %s4506_s5 = inlined_call_operand.hbm [shape: f32[1,256], index: 5, kind: input, shape index: {}]   ;;  %s4507_s6 = inlined_call_operand.hbm [shape: f32[256,256], index: 6, kind: input, shape index: {}]   ;;  %s4508_s7 = inlined_call_operand.hbm [shape: f32[1,256], index: 7, kind: input, shape index: {}]   ;;  %s4509_s8 = inlined_call_operand.hbm [shape: f32[256,256], index: 8, kind: input, shape index: {}]   ;;  %s4510_s9 = inlined_call_operand.hbm [shape: f32[1,256], index: 9, kind: input, shape index: {}]   ;;  %s4511_s10 = inlined_call_operand.vmem [shape: f32[1,256], index: 10, kind: input, shape index: {}]   ;;  %s4512_s11 = inlined_call_operand.hbm [shape: f32[1,256], index: 11, kind: input, shape index: {}]   ;;  %s4513_s12 = inlined_call_operand.hbm [shape: f32[1,256], index: 12, kind: input, shape index: {}]   ;;  %s4514_s13 = inlined_call_operand.hbm [shape: f32[1,256], index: 13, kind: input, shape index: {}]   ;;  %s4515_s14 = inlined_call_operand.hbm [shape: f32[64,256], index: 14, kind: output, shape index: {}]  }
   0x1   :  { %20 = vsyncpa [#allocation8], 0 }
   0x2   :  { %21 = vsyncpa [#allocation11], 0 }
   0x3   :  { %22 = vsyncpa [#allocation14], 0 }
   0x4   :  { %23 = vsyncpa [#allocation17], 0 }
   0x5   :  { %24 = vsyncpa [#allocation20], 0 }
   0x6   :  { %25 = vsyncpa [#allocation23], 0  ;;  %s44_s15 = sshll.u32 %s4502_s1, 4  ;;  %s45_s15 = int_to_ptr.hbm [resolvable:$true] %s44_s15 }
   0x7   :  { %26 = vsyncpa [#allocation6], 0  ;;  %s3326_s16 = smov [#allocation7]   ;;  %s3327_s18 = smov 128  }
   0x8   :  { %s46_s17 = sshll.u32 %s3326_s16, 4  ;;  %s3328_s19 = smov 8   ;;  %s47_s17 = int_to_ptr.vmem [resolvable:$true] %s46_s17 }
   0x9   :  { %52 = dma.hbm_to_vmem [thread:$0]  %s45_s15, 512, %s47_s17, [#allocation8], %s3327_s18, %s3327_s18, %s3328_s19  }
   0xa   :  { %s72_s22 = sshll.u32 %s4505_s4, 4  ;;  %s3329_s23 = smov [#allocation10]   ;;  %s73_s22 = int_to_ptr.hbm [resolvable:$true] %s72_s22 }
   0xb   :  { %s74_s24 = sshll.u32 %s3329_s23, 4  ;;  %s96_s27 = sshll.u32 %s4507_s6, 4  ;;  %s75_s24 = int_to_ptr.vmem [resolvable:$true] %s74_s24  ;;  %s97_s27 = int_to_ptr.hbm [resolvable:$true] %s96_s27 }
   0xc   :  { %s3330_s1 = smov 256   ;;  %s3331_s28 = smov 16  }
   0xd   :  { %80 = dma.hbm_to_vmem [thread:$0]  %s73_s22, 8192, %s75_s24, [#allocation11], %s3330_s1, %s3330_s1, %s3331_s28  }
   0xe   :  { %s120_s15 = sshll.u32 %s4509_s8, 4  ;;  %s3332_s4 = smov [#allocation13]   ;;  %s121_s15 = int_to_ptr.hbm [resolvable:$true] %s120_s15 }
   0xf   :  { %s98_s16 = sshll.u32 %s3332_s4, 4  ;;  %s3333_s6 = smov [#allocation16]   ;;  %s99_s16 = int_to_ptr.vmem [resolvable:$true] %s98_s16 }
  0x10   :  { %104 = dma.hbm_to_vmem [thread:$0]  %s97_s27, 8192, %s99_s16, [#allocation14], %s3330_s1, %s3330_s1, %s3331_s28  }
  0x11   :  { %s122_s17 = sshll.u32 %s3333_s6, 4  ;;  %s147_s20 = sshll.u32 %s4512_s11, 4  ;;  %s123_s17 = int_to_ptr.vmem [resolvable:$true] %s122_s17  ;;  %s148_s20 = int_to_ptr.hbm [resolvable:$true] %s147_s20 }
  0x12   :  { %128 = dma.hbm_to_vmem [thread:$0]  %s121_s15, 8192, %s123_s17, [#allocation17], %s3330_s1, %s3330_s1, %s3331_s28  }
  0x13   :  { %s31_s22 = sshll.u32 %s4501_s0, 4  ;;  %s3334_s23 = smov [#allocation19]   ;;  %s32_s22 = int_to_ptr.hbm [resolvable:$true] %s31_s22 }
  0x14   :  { %s149_s24 = sshll.u32 %s3334_s23, 4  ;;  %s3335_s25 = smov [#allocation4]   ;;  %s150_s24 = int_to_ptr.vmem [resolvable:$true] %s149_s24 }
  0x15   :  { %152 = dma.hbm_to_vmem [thread:$0]  %s148_s20, 32, %s150_s24, [#allocation20]  }
  0x16   :  { %s33_s26 = sshll.u32 %s3335_s25, 4  ;;  %s57_s11 = sshll.u32 %s4503_s2, 4  ;;  %s34_s26 = int_to_ptr.vmem [resolvable:$true] %s33_s26  ;;  %s58_s11 = int_to_ptr.hbm [resolvable:$true] %s57_s11 }
  0x17   :  { %39 = dma.hbm_to_vmem [thread:$0]  %s32_s22, 2048, %s34_s26, [#allocation5], %s3330_s1, %s3330_s1, %s3331_s28  }
  0x18   :  { %s3336_s30 = smov [#allocation9]   ;;  %s86_s16 = sshll.u32 %s4506_s5, 4  ;;  %s87_s16 = int_to_ptr.hbm [resolvable:$true] %s86_s16 }
  0x19   :  { %s59_s15 = sshll.u32 %s3336_s30, 4  ;;  %s3337_s6 = smov 768   ;;  %s60_s15 = int_to_ptr.vmem [resolvable:$true] %s59_s15 }
  0x1a   :  { %s3338_s17 = smov 48   ;;  %s3339_s18 = smov [#allocation12]  }
  0x1b   :  { %65 = dma.hbm_to_vmem [thread:$0]  %s58_s11, 24576, %s60_s15, [#allocation8], %s3337_s6, %s3337_s6, %s3338_s17  }
  0x1c   :  { %s88_s19 = sshll.u32 %s3339_s18, 4  ;;  %s110_s8 = sshll.u32 %s4508_s7, 4  ;;  %s89_s19 = int_to_ptr.vmem [resolvable:$true] %s88_s19  ;;  %s111_s8 = int_to_ptr.hbm [resolvable:$true] %s110_s8 }
  0x1d   :  { %91 = dma.hbm_to_vmem [thread:$0]  %s87_s16, 32, %s89_s19, [#allocation11]  }
  0x1e   :  { %s134_s23 = sshll.u32 %s4510_s9, 4  ;;  %s3340_s24 = smov [#allocation15]   ;;  %s135_s23 = int_to_ptr.hbm [resolvable:$true] %s134_s23 }
  0x1f   :  { %s112_s25 = sshll.u32 %s3340_s24, 4  ;;  %s3341_s5 = smov [#allocation18]   ;;  %s113_s25 = int_to_ptr.vmem [resolvable:$true] %s112_s25 }
  0x20   :  { %115 = dma.hbm_to_vmem [thread:$0]  %s111_s8, 32, %s113_s25, [#allocation14]  }
  0x21   :  { %s136_s26 = sshll.u32 %s3341_s5, 4  ;;  %s158_s11 = sshll.u32 %s4513_s12, 4  ;;  %s137_s26 = int_to_ptr.vmem [resolvable:$true] %s136_s26  ;;  %s159_s11 = int_to_ptr.hbm [resolvable:$true] %s158_s11 }
  0x22   :  { %139 = dma.hbm_to_vmem [thread:$0]  %s135_s23, 32, %s137_s26, [#allocation17]  }
  0x23   :  { %s169_s15 = sshll.u32 %s4514_s13, 4  ;;  %s3342_s0 = smov [#allocation21]   ;;  %s170_s15 = int_to_ptr.hbm [resolvable:$true] %s169_s15 }
  0x24   :  { %s160_s9 = sshll.u32 %s3342_s0, 4  ;;  %s3343_s4 = smov [#allocation22]   ;;  %s161_s9 = int_to_ptr.vmem [resolvable:$true] %s160_s9 }
  0x25   :  { %163 = dma.hbm_to_vmem [thread:$0]  %s159_s11, 32, %s161_s9, [#allocation20]  }
  0x26   :  { %s171_s16 = sshll.u32 %s3343_s4, 4  ;;  %s172_s16 = int_to_ptr.vmem [resolvable:$true] %s171_s16 }
  0x27   :  { %174 = dma.hbm_to_vmem [thread:$0]  %s170_s15, 32, %s172_s16, [#allocation23]  }
  0x28   :  { %3310 = dma.done.wait [#allocation5], 2048  }
  0x29   :  { %3311 = vsyncadd [#allocation5], 4294965248 }
  0x2a   :  { %3312 = dma.done.wait [#allocation8], 25088  }
  0x2b   :  { %3313 = vsyncadd [#allocation8], 4294942208 }
  0x2c   :  { %3314 = dma.done.wait [#allocation11], 8224  }
  0x2d   :  { %3315 = vsyncadd [#allocation11], 4294959072 }
  0x2e   :  { %3316 = dma.done.wait [#allocation14], 8224  }
  0x2f   :  { %3317 = vsyncadd [#allocation14], 4294959072 }
  0x30   :  { %3318 = dma.done.wait [#allocation17], 8224  }
  0x31   :  { %3319 = vsyncadd [#allocation17], 4294959072 }
  0x32   :  { %3320 = dma.done.wait [#allocation20], 64  }
  0x33   :  { %3321 = vsyncadd [#allocation20], 4294967232 }
  0x34   :  { %3322 = dma.done.wait [#allocation23], 32  }
  0x35   :  { %3323 = vsyncadd [#allocation23], 4294967264  ;;  %v329_v0 = vld [vmem:[#allocation9 + $0x2d0] sm:$0xff]  ;;  %v330_v1 = vld [vmem:[#allocation9 + $0x2d8] sm:$0xff]  ;;  %vm1042_vm1 = vcmask 261120   ;;  %s2829_s2 = sshll.u32 %s4515_s14, 4  ;;  %s2830_s2 = int_to_ptr.hbm [resolvable:$true] %s2829_s2 }
  0x36   :  { %v323_v2 = vld [vmem:[#allocation9 + $0x2a0] sm:$0xff]  ;;  %445 = vmatpush.msra.mxu0 %v329_v0  ;;  %527 = vmatpush.msra.mxu2 %v330_v1  ;;  %v425_v3 = vld [vmem:[#allocation9 + $0x5d0] sm:$0xff]  ;;  %v324_v4 = vld [vmem:[#allocation9 + $0x2a8] sm:$0xff] }
  0x37   :  { %v426_v5 = vld [vmem:[#allocation9 + $0x5d8] sm:$0xff]  ;;  %486 = vmatpush.msra.mxu1 %v425_v3  ;;  %v317_v6 = vld [vmem:[#allocation9 + $0x270] sm:$0xff]  ;;  %v419_v7 = vld [vmem:[#allocation9 + $0x5a0] sm:$0xff] }
  0x38   :  { %568 = vmatpush.msra.mxu3 %v426_v5  ;;  %v318_v8 = vld [vmem:[#allocation9 + $0x278] sm:$0xff]  ;;  %446 = vmatpush.msra.mxu0 %v323_v2  ;;  %v420_v9 = vld [vmem:[#allocation9 + $0x5a8] sm:$0xff]  ;;  %v413_v10 = vld [vmem:[#allocation9 + $0x570] sm:$0xff] }
  0x39   :  { %528 = vmatpush.msra.mxu2 %v324_v4  ;;  %487 = vmatpush.msra.mxu1 %v419_v7  ;;  %v311_v11 = vld [vmem:[#allocation9 + $0x240] sm:$0xff]  ;;  %v312_v12 = vld [vmem:[#allocation9 + $0x248] sm:$0xff]  ;;  %v414_v13 = vld [vmem:[#allocation9 + $0x578] sm:$0xff] }
  0x3a   :  { %569 = vmatpush.msra.mxu3 %v420_v9  ;;  %447 = vmatpush.msra.mxu0 %v317_v6  ;;  %v407_v14 = vld [vmem:[#allocation9 + $0x540] sm:$0xff]  ;;  %v408_v15 = vld [vmem:[#allocation9 + $0x548] sm:$0xff]  ;;  %v305_v16 = vld [vmem:[#allocation9 + $0x210] sm:$0xff] }
  0x3b   :  { %529 = vmatpush.msra.mxu2 %v318_v8  ;;  %488 = vmatpush.msra.mxu1 %v413_v10  ;;  %v306_v17 = vld [vmem:[#allocation9 + $0x218] sm:$0xff]  ;;  %v401_v18 = vld [vmem:[#allocation9 + $0x510] sm:$0xff]  ;;  %v299_v20 = vld [vmem:[#allocation9 + $0x1e0] sm:$0xff] }
  0x3c   :  { %570 = vmatpush.msra.mxu3 %v414_v13  ;;  %448 = vmatpush.msra.mxu0 %v311_v11  ;;  %v402_v19 = vld [vmem:[#allocation9 + $0x518] sm:$0xff]  ;;  %v300_v21 = vld [vmem:[#allocation9 + $0x1e8] sm:$0xff]  ;;  %v395_v22 = vld [vmem:[#allocation9 + $0x4e0] sm:$0xff] }
  0x3d   :  { %530 = vmatpush.msra.mxu2 %v312_v12  ;;  %489 = vmatpush.msra.mxu1 %v407_v14  ;;  %v396_v23 = vld [vmem:[#allocation9 + $0x4e8] sm:$0xff]  ;;  %v293_v24 = vld [vmem:[#allocation9 + $0x1b0] sm:$0xff]  ;;  %v294_v25 = vld [vmem:[#allocation9 + $0x1b8] sm:$0xff] }
  0x3e   :  { %571 = vmatpush.msra.mxu3 %v408_v15  ;;  %449 = vmatpush.msra.mxu0 %v305_v16  ;;  %v389_v26 = vld [vmem:[#allocation9 + $0x4b0] sm:$0xff]  ;;  %v390_v27 = vld [vmem:[#allocation9 + $0x4b8] sm:$0xff]  ;;  %v287_v28 = vld [vmem:[#allocation9 + $0x180] sm:$0xff] }
  0x3f   :  { %531 = vmatpush.msra.mxu2 %v306_v17  ;;  %490 = vmatpush.msra.mxu1 %v401_v18  ;;  %v288_v29 = vld [vmem:[#allocation9 + $0x188] sm:$0xff]  ;;  %v383_v30 = vld [vmem:[#allocation9 + $0x480] sm:$0xff]  ;;  %v281_v32 = vld [vmem:[#allocation9 + $0x150] sm:$0xff] }
  0x40   :  { %572 = vmatpush.msra.mxu3 %v402_v19  ;;  %450 = vmatpush.msra.mxu0 %v299_v20  ;;  %v384_v31 = vld [vmem:[#allocation9 + $0x488] sm:$0xff]  ;;  %v282_v33 = vld [vmem:[#allocation9 + $0x158] sm:$0xff]  ;;  %v377_v34 = vld [vmem:[#allocation9 + $0x450] sm:$0xff] }
  0x41   :  { %532 = vmatpush.msra.mxu2 %v300_v21  ;;  %491 = vmatpush.msra.mxu1 %v395_v22  ;;  %v378_v35 = vld [vmem:[#allocation9 + $0x458] sm:$0xff]  ;;  %v275_v36 = vld [vmem:[#allocation9 + $0x120] sm:$0xff]  ;;  %v276_v37 = vld [vmem:[#allocation9 + $0x128] sm:$0xff] }
  0x42   :  { %573 = vmatpush.msra.mxu3 %v396_v23  ;;  %451 = vmatpush.msra.mxu0 %v293_v24  ;;  %v371_v38 = vld [vmem:[#allocation9 + $0x420] sm:$0xff]  ;;  %v372_v39 = vld [vmem:[#allocation9 + $0x428] sm:$0xff]  ;;  %v269_v40 = vld [vmem:[#allocation9 + $0xf0] sm:$0xff] }
  0x43   :  { %533 = vmatpush.msra.mxu2 %v294_v25  ;;  %492 = vmatpush.msra.mxu1 %v389_v26  ;;  %v270_v41 = vld [vmem:[#allocation9 + $0xf8] sm:$0xff]  ;;  %v365_v42 = vld [vmem:[#allocation9 + $0x3f0] sm:$0xff]  ;;  %v263_v44 = vld [vmem:[#allocation9 + $0xc0] sm:$0xff] }
  0x44   :  { %574 = vmatpush.msra.mxu3 %v390_v27  ;;  %452 = vmatpush.msra.mxu0 %v287_v28  ;;  %v366_v43 = vld [vmem:[#allocation9 + $0x3f8] sm:$0xff]  ;;  %v264_v45 = vld [vmem:[#allocation9 + $0xc8] sm:$0xff]  ;;  %v359_v46 = vld [vmem:[#allocation9 + $0x3c0] sm:$0xff] }
  0x45   :  { %534 = vmatpush.msra.mxu2 %v288_v29  ;;  %493 = vmatpush.msra.mxu1 %v383_v30  ;;  %v360_v47 = vld [vmem:[#allocation9 + $0x3c8] sm:$0xff]  ;;  %v257_v48 = vld [vmem:[#allocation9 + $0x90] sm:$0xff]  ;;  %v258_v49 = vld [vmem:[#allocation9 + $0x98] sm:$0xff] }
  0x46   :  { %575 = vmatpush.msra.mxu3 %v384_v31  ;;  %453 = vmatpush.msra.mxu0 %v281_v32  ;;  %v353_v50 = vld [vmem:[#allocation9 + $0x390] sm:$0xff]  ;;  %v354_v51 = vld [vmem:[#allocation9 + $0x398] sm:$0xff]  ;;  %v251_v52 = vld [vmem:[#allocation9 + $0x60] sm:$0xff] }
  0x47   :  { %535 = vmatpush.msra.mxu2 %v282_v33  ;;  %494 = vmatpush.msra.mxu1 %v377_v34  ;;  %v252_v53 = vld [vmem:[#allocation9 + $0x68] sm:$0xff]  ;;  %v347_v54 = vld [vmem:[#allocation9 + $0x360] sm:$0xff]  ;;  %v245_v56 = vld [vmem:[#allocation9 + $0x30] sm:$0xff] }
  0x48   :  { %576 = vmatpush.msra.mxu3 %v378_v35  ;;  %454 = vmatpush.msra.mxu0 %v275_v36  ;;  %v348_v55 = vld [vmem:[#allocation9 + $0x368] sm:$0xff]  ;;  %v246_v57 = vld [vmem:[#allocation9 + $0x38] sm:$0xff]  ;;  %v341_v58 = vld [vmem:[#allocation9 + $0x330] sm:$0xff] }
  0x49   :  { %536 = vmatpush.msra.mxu2 %v276_v37  ;;  %495 = vmatpush.msra.mxu1 %v371_v38  ;;  %v342_v59 = vld [vmem:[#allocation9 + $0x338] sm:$0xff]  ;;  %v239_v60 = vld [vmem:[#allocation9] sm:$0xff]  ;;  %v240_v61 = vld [vmem:[#allocation9 + $0x8] sm:$0xff] }
  0x4a   :  { %577 = vmatpush.msra.mxu3 %v372_v39  ;;  %455 = vmatpush.msra.mxu0 %v269_v40  ;;  %v3469_v62 = vld [vmem:[#allocation4] sm:$0xff]  ;;  %v336_v0 = vld [vmem:[#allocation9 + $0x308] sm:$0xff]  ;;  %v325_v4 = vld [vmem:[#allocation9 + $0x2b0] sm:$0xff] }
  0x4b   :  { %537 = vmatpush.msra.mxu2 %v270_v41  ;;  %496 = vmatpush.msra.mxu1 %v365_v42  ;;  %v335_v63 = vld [vmem:[#allocation9 + $0x300] sm:$0xff]  ;;  %v3471_v1 = vld [vmem:[#allocation4 + $0x8] sm:$0xff]  ;;  %v326_v6 = vld [vmem:[#allocation9 + $0x2b8] sm:$0xff] }
  0x4c   :  { %578 = vmatpush.msra.mxu3 %v366_v43  ;;  %456 = vmatpush.msra.mxu0 %v263_v44  ;;  %v331_v2 = vld [vmem:[#allocation9 + $0x2e0] sm:$0xff]  ;;  %v332_v3 = vld [vmem:[#allocation9 + $0x2e8] sm:$0xff]  ;;  %v421_v8 = vld [vmem:[#allocation9 + $0x5b0] sm:$0xff] }
  0x4d   :  { %538 = vmatpush.msra.mxu2 %v264_v45  ;;  %497 = vmatpush.msra.mxu1 %v359_v46  ;;  %v427_v5 = vld [vmem:[#allocation9 + $0x5e0] sm:$0xff]  ;;  %v428_v7 = vld [vmem:[#allocation9 + $0x5e8] sm:$0xff]  ;;  %v422_v11 = vld [vmem:[#allocation9 + $0x5b8] sm:$0xff] }
  0x4e   :  { %579 = vmatpush.msra.mxu3 %v360_v47  ;;  %457 = vmatpush.msra.mxu0 %v257_v48  ;;  %v319_v9 = vld [vmem:[#allocation9 + $0x280] sm:$0xff]  ;;  %v320_v10 = vld [vmem:[#allocation9 + $0x288] sm:$0xff]  ;;  %v3477_v12 = vld [vmem:[#allocation4 + $0x10] sm:$0xff] }
  0x4f   :  { %539 = vmatpush.msra.mxu2 %v258_v49  ;;  %498 = vmatpush.msra.mxu1 %v353_v50  ;;  %v313_v13 = vld [vmem:[#allocation9 + $0x250] sm:$0xff]  ;;  %v415_v14 = vld [vmem:[#allocation9 + $0x580] sm:$0xff]  ;;  %v3479_v15 = vld [vmem:[#allocation4 + $0x18] sm:$0xff] }
  0x50   :  { %580 = vmatpush.msra.mxu3 %v354_v51  ;;  %458 = vmatpush.msra.mxu0 %v251_v52  ;;  %v314_v16 = vld [vmem:[#allocation9 + $0x258] sm:$0xff]  ;;  %v416_v17 = vld [vmem:[#allocation9 + $0x588] sm:$0xff]  ;;  %v307_v18 = vld [vmem:[#allocation9 + $0x220] sm:$0xff] }
  0x51   :  { %540 = vmatpush.msra.mxu2 %v252_v53  ;;  %499 = vmatpush.msra.mxu1 %v347_v54  ;;  %v409_v19 = vld [vmem:[#allocation9 + $0x550] sm:$0xff]  ;;  %v308_v20 = vld [vmem:[#allocation9 + $0x228] sm:$0xff]  ;;  %v410_v21 = vld [vmem:[#allocation9 + $0x558] sm:$0xff] }
  0x52   :  { %581 = vmatpush.msra.mxu3 %v348_v55  ;;  %459 = vmatpush.msra.mxu0 %v245_v56  ;;  %v301_v22 = vld [vmem:[#allocation9 + $0x1f0] sm:$0xff]  ;;  %v403_v23 = vld [vmem:[#allocation9 + $0x520] sm:$0xff]  ;;  %v302_v24 = vld [vmem:[#allocation9 + $0x1f8] sm:$0xff] }
  0x53   :  { %541 = vmatpush.msra.mxu2 %v246_v57  ;;  %500 = vmatpush.msra.mxu1 %v341_v58  ;;  %v404_v25 = vld [vmem:[#allocation9 + $0x528] sm:$0xff]  ;;  %v3485_v26 = vld [vmem:[#allocation4 + $0x20] sm:$0xff]  ;;  %v397_v28 = vld [vmem:[#allocation9 + $0x4f0] sm:$0xff] }
  0x54   :  { %582 = vmatpush.msra.mxu3 %v342_v59  ;;  %460 = vmatpush.msra.mxu0 %v239_v60  ;;  %v295_v27 = vld [vmem:[#allocation9 + $0x1c0] sm:$0xff]  ;;  %v3487_v29 = vld [vmem:[#allocation4 + $0x28] sm:$0xff]  ;;  %v398_v31 = vld [vmem:[#allocation9 + $0x4f8] sm:$0xff] }
  0x55   :  { %542 = vmatpush.msra.mxu2 %v240_v61  ;;  %461 = vmatmul.f32.vlgmr.msra.gmra.mxu0 %v3469_v62  ;;  %v296_v30 = vld [vmem:[#allocation9 + $0x1c8] sm:$0xff]  ;;  %v289_v32 = vld [vmem:[#allocation9 + $0x190] sm:$0xff]  ;;  %v391_v33 = vld [vmem:[#allocation9 + $0x4c0] sm:$0xff] }
  0x56   :  { %543 = vmatmul.f32.vlgmr.msra.gmra.mxu2 %v3469_v62  ;;  %501 = vmatpush.msra.mxu1 %v335_v63  ;;  %v290_v34 = vld [vmem:[#allocation9 + $0x198] sm:$0xff]  ;;  %v392_v35 = vld [vmem:[#allocation9 + $0x4c8] sm:$0xff]  ;;  %v283_v36 = vld [vmem:[#allocation9 + $0x160] sm:$0xff] }
  0x57   :  { %583 = vmatpush.msra.mxu3 %v336_v0  ;;  %502 = vmatmul.f32.vlgmr.msra.gmra.mxu1 %v3471_v1  ;;  %v385_v37 = vld [vmem:[#allocation9 + $0x490] sm:$0xff]  ;;  %v284_v38 = vld [vmem:[#allocation9 + $0x168] sm:$0xff]  ;;  %v386_v39 = vld [vmem:[#allocation9 + $0x498] sm:$0xff] }
  0x58   :  { %584 = vmatmul.f32.vlgmr.msra.gmra.mxu3 %v3471_v1  ;;  %609 = vmatpush.msrb.mxu0 %v331_v2  ;;  %v3493_v40 = vld [vmem:[#allocation4 + $0x30] sm:$0xff]  ;;  %v379_v42 = vld [vmem:[#allocation9 + $0x460] sm:$0xff]  ;;  %v3495_v43 = vld [vmem:[#allocation4 + $0x38] sm:$0xff] }
  0x59   :  { %691 = vmatpush.msrb.mxu2 %v332_v3  ;;  %650 = vmatpush.msrb.mxu1 %v427_v5  ;;  %v277_v41 = vld [vmem:[#allocation9 + $0x130] sm:$0xff]  ;;  %v278_v44 = vld [vmem:[#allocation9 + $0x138] sm:$0xff]  ;;  %v380_v45 = vld [vmem:[#allocation9 + $0x468] sm:$0xff] }
  0x5a   :  { %732 = vmatpush.msrb.mxu3 %v428_v7  ;;  %610 = vmatpush.msrb.mxu0 %v325_v4  ;;  %v271_v46 = vld [vmem:[#allocation9 + $0x100] sm:$0xff]  ;;  %v373_v47 = vld [vmem:[#allocation9 + $0x430] sm:$0xff]  ;;  %v272_v48 = vld [vmem:[#allocation9 + $0x108] sm:$0xff] }
  0x5b   :  { %692 = vmatpush.msrb.mxu2 %v326_v6  ;;  %651 = vmatpush.msrb.mxu1 %v421_v8  ;;  %v374_v49 = vld [vmem:[#allocation9 + $0x438] sm:$0xff]  ;;  %v265_v50 = vld [vmem:[#allocation9 + $0xd0] sm:$0xff]  ;;  %v367_v51 = vld [vmem:[#allocation9 + $0x400] sm:$0xff] }
  0x5c   :  { %733 = vmatpush.msrb.mxu3 %v422_v11  ;;  %611 = vmatpush.msrb.mxu0 %v319_v9  ;;  %v266_v52 = vld [vmem:[#allocation9 + $0xd8] sm:$0xff]  ;;  %v368_v53 = vld [vmem:[#allocation9 + $0x408] sm:$0xff]  ;;  %v3501_v54 = vld [vmem:[#allocation4 + $0x40] sm:$0xff] }
  0x5d   :  { %693 = vmatpush.msrb.mxu2 %v320_v10  ;;  %464 = vmatmul.f32.gmra.mxu0 %v3477_v12  ;;  %v259_v55 = vld [vmem:[#allocation9 + $0xa0] sm:$0xff]  ;;  %v361_v56 = vld [vmem:[#allocation9 + $0x3d0] sm:$0xff]  ;;  %v3503_v57 = vld [vmem:[#allocation4 + $0x48] sm:$0xff] }
  0x5e   :  { %546 = vmatmul.f32.gmra.mxu2 %v3477_v12  ;;  %612 = vmatpush.msrb.mxu0 %v313_v13  ;;  %v260_v58 = vld [vmem:[#allocation9 + $0xa8] sm:$0xff]  ;;  %v362_v59 = vld [vmem:[#allocation9 + $0x3d8] sm:$0xff]  ;;  %v253_v60 = vld [vmem:[#allocation9 + $0x70] sm:$0xff] }
  0x5f   :  { %652 = vmatpush.msrb.mxu1 %v415_v14  ;;  %694 = vmatpush.msrb.mxu2 %v314_v16  ;;  %v355_v61 = vld [vmem:[#allocation9 + $0x3a0] sm:$0xff]  ;;  %v254_v63 = vld [vmem:[#allocation9 + $0x78] sm:$0xff]  ;;  %v356_v0 = vld [vmem:[#allocation9 + $0x3a8] sm:$0xff] }
  0x60   :  { %505 = vmatmul.f32.gmra.mxu1 %v3479_v15  ;;  %587 = vmatmul.f32.gmra.mxu3 %v3479_v15  ;;  %v247_v2 = vld [vmem:[#allocation9 + $0x40] sm:$0xff]  ;;  %v349_v3 = vld [vmem:[#allocation9 + $0x370] sm:$0xff]  ;;  %v248_v4 = vld [vmem:[#allocation9 + $0x48] sm:$0xff] }
  0x61   :  { %734 = vmatpush.msrb.mxu3 %v416_v17  ;;  %613 = vmatpush.msrb.mxu0 %v307_v18  ;;  %v350_v5 = vld [vmem:[#allocation9 + $0x378] sm:$0xff]  ;;  %v3509_v6 = vld [vmem:[#allocation4 + $0x50] sm:$0xff]  ;;  %v343_v8 = vld [vmem:[#allocation9 + $0x340] sm:$0xff] }
  0x62   :  { %653 = vmatpush.msrb.mxu1 %v409_v19  ;;  %695 = vmatpush.msrb.mxu2 %v308_v20  ;;  %v241_v7 = vld [vmem:[#allocation9 + $0x10] sm:$0xff]  ;;  %v3511_v9 = vld [vmem:[#allocation4 + $0x58] sm:$0xff]  ;;  %v344_v11 = vld [vmem:[#allocation9 + $0x348] sm:$0xff] }
  0x63   :  { %735 = vmatpush.msrb.mxu3 %v410_v21  ;;  %614 = vmatpush.msrb.mxu0 %v301_v22  ;;  %v242_v10 = vld [vmem:[#allocation9 + $0x18] sm:$0xff]  ;;  %v337_v13 = vld [vmem:[#allocation9 + $0x310] sm:$0xff]  ;;  %v3517_v16 = vld [vmem:[#allocation4 + $0x60] sm:$0xff] }
  0x64   :  { %654 = vmatpush.msrb.mxu1 %v403_v23  ;;  %696 = vmatpush.msrb.mxu2 %v302_v24  ;;  %v338_v14 = vld [vmem:[#allocation9 + $0x318] sm:$0xff]  ;;  %v3519_v17 = vld [vmem:[#allocation4 + $0x68] sm:$0xff]  ;;  %v3525_v18 = vld [vmem:[#allocation4 + $0x70] sm:$0xff] }
  0x65   :  { %736 = vmatpush.msrb.mxu3 %v404_v25  ;;  %467 = vmatmul.f32.gmra.mxu0 %v3485_v26  ;;  %v3527_v19 = vld [vmem:[#allocation4 + $0x78] sm:$0xff]  ;;  %v328_v21 = vld [vmem:[#allocation9 + $0x2c8] sm:$0xff] }
  0x66   :  { %549 = vmatmul.f32.gmra.mxu2 %v3485_v26  ;;  %615 = vmatpush.msrb.mxu0 %v295_v27  ;;  %v334_v20 = vld [vmem:[#allocation9 + $0x2f8] sm:$0xff]  ;;  %v424_v24 = vld [vmem:[#allocation9 + $0x5c8] sm:$0xff] }
  0x67   :  { %655 = vmatpush.msrb.mxu1 %v397_v28  ;;  %697 = vmatpush.msrb.mxu2 %v296_v30  ;;  %v430_v22 = vld [vmem:[#allocation9 + $0x5f8] sm:$0xff]  ;;  %v316_v25 = vld [vmem:[#allocation9 + $0x268] sm:$0xff] }
  0x68   :  { %508 = vmatmul.f32.gmra.mxu1 %v3487_v29  ;;  %590 = vmatmul.f32.gmra.mxu3 %v3487_v29  ;;  %v322_v23 = vld [vmem:[#allocation9 + $0x298] sm:$0xff]  ;;  %v412_v30 = vld [vmem:[#allocation9 + $0x568] sm:$0xff] }
  0x69   :  { %737 = vmatpush.msrb.mxu3 %v398_v31  ;;  %616 = vmatpush.msrb.mxu0 %v289_v32  ;;  %v418_v27 = vld [vmem:[#allocation9 + $0x598] sm:$0xff]  ;;  %v304_v31 = vld [vmem:[#allocation9 + $0x208] sm:$0xff] }
  0x6a   :  { %656 = vmatpush.msrb.mxu1 %v391_v33  ;;  %698 = vmatpush.msrb.mxu2 %v290_v34  ;;  %v310_v28 = vld [vmem:[#allocation9 + $0x238] sm:$0xff]  ;;  %v400_v34 = vld [vmem:[#allocation9 + $0x508] sm:$0xff] }
  0x6b   :  { %738 = vmatpush.msrb.mxu3 %v392_v35  ;;  %617 = vmatpush.msrb.mxu0 %v283_v36  ;;  %v406_v32 = vld [vmem:[#allocation9 + $0x538] sm:$0xff]  ;;  %v333_v35 = vld [vmem:[#allocation9 + $0x2f0] sm:$0xff]  ;;  %v292_v36 = vld [vmem:[#allocation9 + $0x1a8] sm:$0xff] }
  0x6c   :  { %657 = vmatpush.msrb.mxu1 %v385_v37  ;;  %699 = vmatpush.msrb.mxu2 %v284_v38  ;;  %v298_v33 = vld [vmem:[#allocation9 + $0x1d8] sm:$0xff]  ;;  %v327_v38 = vld [vmem:[#allocation9 + $0x2c0] sm:$0xff] }
  0x6d   :  { %739 = vmatpush.msrb.mxu3 %v386_v39  ;;  %470 = vmatmul.f32.gmra.mxu0 %v3493_v40  ;;  %v394_v37 = vld [vmem:[#allocation9 + $0x4d8] sm:$0xff] }
  0x6e   :  { %552 = vmatmul.f32.gmra.mxu2 %v3493_v40  ;;  %618 = vmatpush.msrb.mxu0 %v277_v41  ;;  %v286_v39 = vld [vmem:[#allocation9 + $0x178] sm:$0xff]  ;;  %v429_v41 = vld [vmem:[#allocation9 + $0x5f0] sm:$0xff] }
  0x6f   :  { %658 = vmatpush.msrb.mxu1 %v379_v42  ;;  %700 = vmatpush.msrb.mxu2 %v278_v44  ;;  %v388_v42 = vld [vmem:[#allocation9 + $0x4a8] sm:$0xff]  ;;  %v321_v44 = vld [vmem:[#allocation9 + $0x290] sm:$0xff] }
  0x70   :  { %511 = vmatmul.f32.gmra.mxu1 %v3495_v43  ;;  %593 = vmatmul.f32.gmra.mxu3 %v3495_v43 }
  0x71   :  { %740 = vmatpush.msrb.mxu3 %v380_v45  ;;  %619 = vmatpush.msrb.mxu0 %v271_v46  ;;  %v280_v45 = vld [vmem:[#allocation9 + $0x148] sm:$0xff]  ;;  %v423_v46 = vld [vmem:[#allocation9 + $0x5c0] sm:$0xff] }
  0x72   :  { %659 = vmatpush.msrb.mxu1 %v373_v47  ;;  %701 = vmatpush.msrb.mxu2 %v272_v48  ;;  %v315_v47 = vld [vmem:[#allocation9 + $0x260] sm:$0xff]  ;;  %v274_v48 = vld [vmem:[#allocation9 + $0x118] sm:$0xff] }
  0x73   :  { %741 = vmatpush.msrb.mxu3 %v374_v49  ;;  %620 = vmatpush.msrb.mxu0 %v265_v50  ;;  %v309_v49 = vld [vmem:[#allocation9 + $0x230] sm:$0xff]  ;;  %v268_v50 = vld [vmem:[#allocation9 + $0xe8] sm:$0xff] }
  0x74   :  { %660 = vmatpush.msrb.mxu1 %v367_v51  ;;  %702 = vmatpush.msrb.mxu2 %v266_v52  ;;  %v382_v51 = vld [vmem:[#allocation9 + $0x478] sm:$0xff]  ;;  %v303_v52 = vld [vmem:[#allocation9 + $0x200] sm:$0xff] }
  0x75   :  { %742 = vmatpush.msrb.mxu3 %v368_v53  ;;  %473 = vmatmul.f32.gmra.mxu0 %v3501_v54  ;;  %v262_v53 = vld [vmem:[#allocation9 + $0xb8] sm:$0xff] }
  0x76   :  { %555 = vmatmul.f32.gmra.mxu2 %v3501_v54  ;;  %621 = vmatpush.msrb.mxu0 %v259_v55  ;;  %v417_v55 = vld [vmem:[#allocation9 + $0x590] sm:$0xff] }
  0x77   :  { %661 = vmatpush.msrb.mxu1 %v361_v56  ;;  %703 = vmatpush.msrb.mxu2 %v260_v58  ;;  %v376_v56 = vld [vmem:[#allocation9 + $0x448] sm:$0xff]  ;;  %v297_v58 = vld [vmem:[#allocation9 + $0x1d0] sm:$0xff] }
  0x78   :  { %514 = vmatmul.f32.gmra.mxu1 %v3503_v57  ;;  %596 = vmatmul.f32.gmra.mxu3 %v3503_v57 }
  0x79   :  { %743 = vmatpush.msrb.mxu3 %v362_v59  ;;  %622 = vmatpush.msrb.mxu0 %v253_v60  ;;  %v256_v59 = vld [vmem:[#allocation9 + $0x88] sm:$0xff]  ;;  %v411_v60 = vld [vmem:[#allocation9 + $0x560] sm:$0xff] }
  0x7a   :  { %662 = vmatpush.msrb.mxu1 %v355_v61  ;;  %704 = vmatpush.msrb.mxu2 %v254_v63  ;;  %v291_v61 = vld [vmem:[#allocation9 + $0x1a0] sm:$0xff]  ;;  %v250_v63 = vld [vmem:[#allocation9 + $0x58] sm:$0xff] }
  0x7b   :  { %744 = vmatpush.msrb.mxu3 %v356_v0  ;;  %623 = vmatpush.msrb.mxu0 %v247_v2  ;;  %v285_v0 = vld [vmem:[#allocation9 + $0x170] sm:$0xff]  ;;  %v244_v2 = vld [vmem:[#allocation9 + $0x28] sm:$0xff] }
  0x7c   :  { %663 = vmatpush.msrb.mxu1 %v349_v3  ;;  %705 = vmatpush.msrb.mxu2 %v248_v4  ;;  %v370_v3 = vld [vmem:[#allocation9 + $0x418] sm:$0xff]  ;;  %v279_v4 = vld [vmem:[#allocation9 + $0x140] sm:$0xff] }
  0x7d   :  { %745 = vmatpush.msrb.mxu3 %v350_v5  ;;  %476 = vmatmul.f32.gmra.mxu0 %v3509_v6  ;;  %v405_v5 = vld [vmem:[#allocation9 + $0x530] sm:$0xff] }
  0x7e   :  { %558 = vmatmul.f32.gmra.mxu2 %v3509_v6  ;;  %624 = vmatpush.msrb.mxu0 %v241_v7  ;;  %v364_v7 = vld [vmem:[#allocation9 + $0x3e8] sm:$0xff] }
  0x7f   :  { %664 = vmatpush.msrb.mxu1 %v343_v8  ;;  %706 = vmatpush.msrb.mxu2 %v242_v10  ;;  %v273_v8 = vld [vmem:[#allocation9 + $0x110] sm:$0xff]  ;;  %v399_v10 = vld [vmem:[#allocation9 + $0x500] sm:$0xff] }
  0x80   :  { %517 = vmatmul.f32.gmra.mxu1 %v3511_v9  ;;  %599 = vmatmul.f32.gmra.mxu3 %v3511_v9 }
  0x81   :  { %746 = vmatpush.msrb.mxu3 %v344_v11  ;;  %665 = vmatpush.msrb.mxu1 %v337_v13  ;;  %v358_v11 = vld [vmem:[#allocation9 + $0x3b8] sm:$0xff]  ;;  %v267_v13 = vld [vmem:[#allocation9 + $0xe0] sm:$0xff] }
  0x82   :  { %855 = vmatpush.msra.mxu2 %v334_v20  ;;  %773 = vmatpush.msra.mxu0 %v333_v35  ;;  %v261_v20 = vld [vmem:[#allocation9 + $0xb0] sm:$0xff]  ;;  %v363_v35 = vld [vmem:[#allocation9 + $0x3e0] sm:$0xff] }
  0x83   :  { %747 = vmatpush.msrb.mxu3 %v338_v14  ;;  %814 = vmatpush.msra.mxu1 %v429_v41  ;;  %v393_v14 = vld [vmem:[#allocation9 + $0x4d0] sm:$0xff]  ;;  %v351_v41 = vld [vmem:[#allocation9 + $0x380] sm:$0xff] }
  0x84   :  { %856 = vmatpush.msra.mxu2 %v328_v21  ;;  %774 = vmatpush.msra.mxu0 %v327_v38  ;;  %v352_v21 = vld [vmem:[#allocation9 + $0x388] sm:$0xff] }
  0x85   :  { %479 = vmatmul.f32.gmra.mxu0 %v3517_v16  ;;  %896 = vmatpush.msra.mxu3 %v430_v22  ;;  %v255_v22 = vld [vmem:[#allocation9 + $0x80] sm:$0xff] }
  0x86   :  { %561 = vmatmul.f32.gmra.mxu2 %v3517_v16  ;;  %775 = vmatpush.msra.mxu0 %v321_v44  ;;  %v339_v44 = vld [vmem:[#allocation9 + $0x320] sm:$0xff] }
  0x87   :  { %897 = vmatpush.msra.mxu3 %v424_v24  ;;  %857 = vmatpush.msra.mxu2 %v322_v23  ;;  %v387_v23 = vld [vmem:[#allocation9 + $0x4a0] sm:$0xff]  ;;  %v346_v24 = vld [vmem:[#allocation9 + $0x358] sm:$0xff] }
  0x88   :  { %520 = vmatmul.f32.gmra.mxu1 %v3519_v17  ;;  %602 = vmatmul.f32.gmra.mxu3 %v3519_v17 }
  0x89   :  { %858 = vmatpush.msra.mxu2 %v316_v25  ;;  %898 = vmatpush.msra.mxu3 %v418_v27  ;;  %v249_v25 = vld [vmem:[#allocation9 + $0x50] sm:$0xff] }
  0x8a   :  { %815 = vmatpush.msra.mxu1 %v423_v46  ;;  %776 = vmatpush.msra.mxu0 %v315_v47  ;;  %v381_v27 = vld [vmem:[#allocation9 + $0x470] sm:$0xff] }
  0x8b   :  { %859 = vmatpush.msra.mxu2 %v310_v28  ;;  %899 = vmatpush.msra.mxu3 %v412_v30  ;;  %v340_v28 = vld [vmem:[#allocation9 + $0x328] sm:$0xff] }
  0x8c   :  { %777 = vmatpush.msra.mxu0 %v309_v49  ;;  %816 = vmatpush.msra.mxu1 %v417_v55 }
  0x8d   :  { %482 = vmatmul.f32.gmra.mxu0 %v3525_v18  ;;  %860 = vmatpush.msra.mxu2 %v304_v31  ;;  %v243_v31 = vld [vmem:[#allocation9 + $0x20] sm:$0xff] }
  0x8e   :  { %564 = vmatmul.f32.gmra.mxu2 %v3525_v18  ;;  %900 = vmatpush.msra.mxu3 %v406_v32  ;;  %v375_v32 = vld [vmem:[#allocation9 + $0x440] sm:$0xff] }
  0x8f   :  { %861 = vmatpush.msra.mxu2 %v298_v33  ;;  %778 = vmatpush.msra.mxu0 %v303_v52 }
  0x90   :  { %523 = vmatmul.f32.gmra.mxu1 %v3527_v19  ;;  %605 = vmatmul.f32.gmra.mxu3 %v3527_v19 }
  0x91   :  { %901 = vmatpush.msra.mxu3 %v400_v34  ;;  %862 = vmatpush.msra.mxu2 %v292_v36  ;;  %v369_v34 = vld [vmem:[#allocation9 + $0x410] sm:$0xff] }
  0x92   :  { %779 = vmatpush.msra.mxu0 %v297_v58  ;;  %817 = vmatpush.msra.mxu1 %v411_v60 }
  0x93   :  { %863 = vmatpush.msra.mxu2 %v286_v39  ;;  %902 = vmatpush.msra.mxu3 %v394_v37  ;;  %v357_v37 = vld [vmem:[#allocation9 + $0x3b0] sm:$0xff] }
  0x94   :  { %780 = vmatpush.msra.mxu0 %v291_v61  ;;  %818 = vmatpush.msra.mxu1 %v405_v5 }
  0x95   :  { %625 = vmatmul.f32.vlgmr.msrb.gmra.mxu0 %v3469_v62  ;;  %864 = vmatpush.msra.mxu2 %v280_v45 }
  0x96   :  { %707 = vmatmul.f32.vlgmr.msrb.gmra.mxu2 %v3469_v62  ;;  %903 = vmatpush.msra.mxu3 %v388_v42 }
  0x97   :  { %865 = vmatpush.msra.mxu2 %v274_v48  ;;  %781 = vmatpush.msra.mxu0 %v285_v0 }
  0x98   :  { %666 = vmatmul.f32.vlgmr.msrb.gmra.mxu1 %v3471_v1  ;;  %748 = vmatmul.f32.vlgmr.msrb.gmra.mxu3 %v3471_v1 }
  0x99   :  { %866 = vmatpush.msra.mxu2 %v268_v50  ;;  %904 = vmatpush.msra.mxu3 %v382_v51 }
  0x9a   :  { %782 = vmatpush.msra.mxu0 %v279_v4  ;;  %819 = vmatpush.msra.mxu1 %v399_v10  ;;  %v3664_v10 = vld [vmem:[%s4504_s3] sm:$0x3f] }
  0x9b   :  { %867 = vmatpush.msra.mxu2 %v262_v53  ;;  %905 = vmatpush.msra.mxu3 %v376_v56 }
  0x9c   :  { %783 = vmatpush.msra.mxu0 %v273_v8  ;;  %820 = vmatpush.msra.mxu1 %v393_v14 }
  0x9d   :  { %628 = vmatmul.f32.gmra.mxu0 %v3477_v12  ;;  %868 = vmatpush.msra.mxu2 %v256_v59 }
  0x9e   :  { %710 = vmatmul.f32.gmra.mxu2 %v3477_v12  ;;  %906 = vmatpush.msra.mxu3 %v370_v3 }
  0x9f   :  { %869 = vmatpush.msra.mxu2 %v250_v63  ;;  %784 = vmatpush.msra.mxu0 %v267_v13  ;;  %v3667_v13 = vperm.slane %v3664_v10, 2 }
  0xa0   :  { %669 = vmatmul.f32.gmra.mxu1 %v3479_v15  ;;  %751 = vmatmul.f32.gmra.mxu3 %v3479_v15 }
  0xa1   :  { %870 = vmatpush.msra.mxu2 %v244_v2  ;;  %907 = vmatpush.msra.mxu3 %v364_v7 }
  0xa2   :  { %785 = vmatpush.msra.mxu0 %v261_v20  ;;  %821 = vmatpush.msra.mxu1 %v387_v23  ;;  %v3672_v23 = vperm.slane %v3664_v10, 3 }
  0xa3   :  { %908 = vmatpush.msra.mxu3 %v358_v11 }
  0xa4   :  { %786 = vmatpush.msra.mxu0 %v255_v22  ;;  %822 = vmatpush.msra.mxu1 %v381_v27 }
  0xa5   :  { %631 = vmatmul.f32.gmra.mxu0 %v3485_v26  ;;  %909 = vmatpush.msra.mxu3 %v352_v21 }
  0xa6   :  { %713 = vmatmul.f32.gmra.mxu2 %v3485_v26  ;;  %787 = vmatpush.msra.mxu0 %v249_v25 }
  0xa7   :  { %910 = vmatpush.msra.mxu3 %v346_v24  ;;  %823 = vmatpush.msra.mxu1 %v375_v32 }
  0xa8   :  { %672 = vmatmul.f32.gmra.mxu1 %v3487_v29  ;;  %754 = vmatmul.f32.gmra.mxu3 %v3487_v29 }
  0xa9   :  { %788 = vmatpush.msra.mxu0 %v243_v31  ;;  %911 = vmatpush.msra.mxu3 %v340_v28 }
  0xaa   :  { %824 = vmatpush.msra.mxu1 %v369_v34 }
  0xac   :  { %825 = vmatpush.msra.mxu1 %v363_v35 }
  0xad   :  { %634 = vmatmul.f32.gmra.mxu0 %v3493_v40 }
  0xae   :  { %716 = vmatmul.f32.gmra.mxu2 %v3493_v40  ;;  %826 = vmatpush.msra.mxu1 %v357_v37  ;;  %v3680_v37 = vperm.slane %v3664_v10, 0 }
  0xb0   :  { %675 = vmatmul.f32.gmra.mxu1 %v3495_v43  ;;  %757 = vmatmul.f32.gmra.mxu3 %v3495_v43 }
  0xb1   :  { %827 = vmatpush.msra.mxu1 %v351_v41 }
  0xb5   :  { %637 = vmatmul.f32.gmra.mxu0 %v3501_v54 }
  0xb6   :  { %719 = vmatmul.f32.gmra.mxu2 %v3501_v54 }
  0xb8   :  { %678 = vmatmul.f32.gmra.mxu1 %v3503_v57  ;;  %760 = vmatmul.f32.gmra.mxu3 %v3503_v57 }
  0xbd   :  { %640 = vmatmul.f32.gmra.mxu0 %v3509_v6 }
  0xbe   :  { %722 = vmatmul.f32.gmra.mxu2 %v3509_v6 }
  0xc0   :  { %681 = vmatmul.f32.gmra.mxu1 %v3511_v9  ;;  %763 = vmatmul.f32.gmra.mxu3 %v3511_v9 }
  0xc5   :  { %643 = vmatmul.f32.gmra.mxu0 %v3517_v16 }
  0xc6   :  { %725 = vmatmul.f32.gmra.mxu2 %v3517_v16 }
  0xc8   :  { %684 = vmatmul.f32.gmra.mxu1 %v3519_v17  ;;  %766 = vmatmul.f32.gmra.mxu3 %v3519_v17 }
  0xcd   :  { %646 = vmatmul.f32.gmra.mxu0 %v3525_v18 }
  0xce   :  { %728 = vmatmul.f32.gmra.mxu2 %v3525_v18 }
  0xd0   :  { %687 = vmatmul.f32.gmra.mxu1 %v3527_v19  ;;  %769 = vmatmul.f32.gmra.mxu3 %v3527_v19 }
  0xd2   :  { %v3565_v30 = vpop.f32.mrf.mxu0 }
  0xd4   :  { %v3567_v33 = vpop.f32.mrf.mxu1 }
  0xd5   :  { %789 = vmatmul.f32.vlgmr.msra.gmra.mxu0 %v3469_v62 }
  0xd6   :  { %871 = vmatmul.f32.vlgmr.msra.gmra.mxu2 %v3469_v62  ;;  %v345_v62 = vld [vmem:[#allocation9 + $0x350] sm:$0xff] }
  0xd7   :  { %828 = vmatpush.msra.mxu1 %v345_v62 }
  0xd8   :  { %912 = vmatmul.f32.vlgmr.msra.gmra.mxu3 %v3471_v1 }
  0xd9   :  { %v3572_v36 = vpop.f32.mrf.mxu2  ;;  %829 = vmatpush.msra.mxu1 %v339_v44 }
  0xda   :  { %v3574_v38 = vpop.f32.mrf.mxu0  ;;  %830 = vmatmul.f32.vlgmr.msra.gmra.mxu1 %v3471_v1 }
  0xdb   :  { %v3576_v39 = vpop.f32.mrf.mxu3 }
  0xdd   :  { %v3578_v42 = vpop.f32.mrf.mxu1  ;;  %792 = vmatmul.f32.gmra.mxu0 %v3477_v12 }
  0xde   :  { %874 = vmatmul.f32.gmra.mxu2 %v3477_v12 }
  0xe0   :  { %915 = vmatmul.f32.gmra.mxu3 %v3479_v15 }
  0xe1   :  { %v3583_v45 = vpop.f32.mrf.mxu2 }
  0xe2   :  { %v3585_v46 = vpop.f32.mrf.mxu0  ;;  %833 = vmatmul.f32.gmra.mxu1 %v3479_v15 }
  0xe3   :  { %v3587_v47 = vpop.f32.mrf.mxu3 }
  0xe5   :  { %v3590_v48 = vpop.f32.mrf.mxu1  ;;  %795 = vmatmul.f32.gmra.mxu0 %v3485_v26 }
  0xe6   :  { %877 = vmatmul.f32.gmra.mxu2 %v3485_v26 }
  0xe8   :  { %918 = vmatmul.f32.gmra.mxu3 %v3487_v29 }
  0xe9   :  { %v3595_v12 = vpop.f32.mrf.mxu2 }
  0xea   :  { %v3597_v49 = vpop.f32.mrf.mxu0  ;;  %836 = vmatmul.f32.gmra.mxu1 %v3487_v29 }
  0xeb   :  { %v3599_v50 = vpop.f32.mrf.mxu3 }
  0xed   :  { %v3602_v51 = vpop.f32.mrf.mxu1  ;;  %798 = vmatmul.f32.gmra.mxu0 %v3493_v40 }
  0xee   :  { %880 = vmatmul.f32.gmra.mxu2 %v3493_v40 }
  0xf0   :  { %921 = vmatmul.f32.gmra.mxu3 %v3495_v43 }
  0xf1   :  { %v3607_v1 = vpop.f32.mrf.mxu2 }
  0xf2   :  { %v3609_v26 = vpop.f32.mrf.mxu0  ;;  %839 = vmatmul.f32.gmra.mxu1 %v3495_v43 }
  0xf3   :  { %v3611_v52 = vpop.f32.mrf.mxu3 }
  0xf5   :  { %v3614_v53 = vpop.f32.mrf.mxu1  ;;  %801 = vmatmul.f32.gmra.mxu0 %v3501_v54 }
  0xf6   :  { %883 = vmatmul.f32.gmra.mxu2 %v3501_v54 }
  0xf8   :  { %924 = vmatmul.f32.gmra.mxu3 %v3503_v57 }
  0xf9   :  { %v3619_v15 = vpop.f32.mrf.mxu2 }
  0xfa   :  { %v3621_v40 = vpop.f32.mrf.mxu0  ;;  %842 = vmatmul.f32.gmra.mxu1 %v3503_v57 }
  0xfb   :  { %v3623_v55 = vpop.f32.mrf.mxu3 }
  0xfd   :  { %v3626_v56 = vpop.f32.mrf.mxu1  ;;  %804 = vmatmul.f32.gmra.mxu0 %v3509_v6 }
  0xfe   :  { %886 = vmatmul.f32.gmra.mxu2 %v3509_v6 }
 0x100   :  { %927 = vmatmul.f32.gmra.mxu3 %v3511_v9 }
 0x101   :  { %v3631_v29 = vpop.f32.mrf.mxu2 }
 0x102   :  { %v3633_v54 = vpop.f32.mrf.mxu0  ;;  %845 = vmatmul.f32.gmra.mxu1 %v3511_v9 }
 0x103   :  { %v3635_v58 = vpop.f32.mrf.mxu3 }
 0x105   :  { %v3638_v59 = vpop.f32.mrf.mxu1  ;;  %807 = vmatmul.f32.gmra.mxu0 %v3517_v16 }
 0x106   :  { %889 = vmatmul.f32.gmra.mxu2 %v3517_v16 }
 0x108   :  { %930 = vmatmul.f32.gmra.mxu3 %v3519_v17 }
 0x109   :  { %v3643_v43 = vpop.f32.mrf.mxu2 }
 0x10a   :  { %v3645_v6 = vpop.f32.mrf.mxu0  ;;  %848 = vmatmul.f32.gmra.mxu1 %v3519_v17 }
 0x10b   :  { %v3647_v60 = vpop.f32.mrf.mxu3 }
 0x10d   :  { %v3650_v61 = vpop.f32.mrf.mxu1  ;;  %810 = vmatmul.f32.gmra.mxu0 %v3525_v18 }
 0x10e   :  { %892 = vmatmul.f32.gmra.mxu2 %v3525_v18 }
 0x110   :  { %933 = vmatmul.f32.gmra.mxu3 %v3527_v19 }
 0x111   :  { %v3655_v57 = vpop.f32.mrf.mxu2 }
 0x112   :  { %v626_v63 = vpop.f32.mrf.mxu0  ;;  %851 = vmatmul.f32.gmra.mxu1 %v3527_v19 }
 0x113   :  { %v3657_v16 = vpop.f32.mrf.mxu3  ;;  %v627_v62 = vadd.f32 %v626_v63, %v3667_v13 }
 0x115   :  { %v667_v0 = vpop.f32.mrf.mxu1 }
 0x119   :  { %v708_v2 = vpop.f32.mrf.mxu2 }
 0x11a   :  { %v629_v3 = vpop.f32.mrf.mxu0  ;;  %v709_v63 = vadd.f32 %v708_v2, %v3672_v23 }
 0x11b   :  { %v749_v4 = vpop.f32.mrf.mxu3  ;;  %v630_v27 = vadd.f32 %v629_v3, %v3667_v13 }
 0x11d   :  { %v670_v9 = vpop.f32.mrf.mxu1 }
 0x11e   :  { %v671_v44 = vadd.f32 %v670_v9, %v630_v27 }
 0x121   :  { %v711_v5 = vpop.f32.mrf.mxu2 }
 0x122   :  { %v632_v7 = vpop.f32.mrf.mxu0  ;;  %v712_v3 = vadd.f32 %v711_v5, %v3672_v23 }
 0x123   :  { %v752_v8 = vpop.f32.mrf.mxu3  ;;  %v633_v20 = vadd.f32 %v632_v7, %v3667_v13 }
 0x124   :  { %v753_v9 = vadd.f32 %v752_v8, %v712_v3 }
 0x125   :  { %v673_v18 = vpop.f32.mrf.mxu1 }
 0x126   :  { %v674_v24 = vadd.f32 %v673_v18, %v633_v20  ;;  %v463_v18 = vadd.f32 %v3565_v30, %v3680_v37  ;;  %v3691_v20 = vperm.slane %v3664_v10, 1 }
 0x128   :  { %v504_v5 = vadd.f32 %v3567_v33, %v463_v18  ;;  %v545_v30 = vadd.f32 %v3572_v36, %v3691_v20  ;;  %v548_v33 = vadd.f32 %v3583_v45, %v3691_v20  ;;  %v469_v36 = vadd.f32 %v3585_v46, %v3680_v37 }
 0x129   :  { %v714_v11 = vpop.f32.mrf.mxu2  ;;  %v551_v45 = vadd.f32 %v3595_v12, %v3691_v20 }
 0x12a   :  { %v635_v17 = vpop.f32.mrf.mxu0  ;;  %v715_v34 = vadd.f32 %v714_v11, %v3672_v23  ;;  %v668_v11 = vadd.f32 %v667_v0, %v627_v62  ;;  %v750_v0 = vadd.f32 %v749_v4, %v709_v63 }
 0x12b   :  { %v755_v14 = vpop.f32.mrf.mxu3  ;;  %v636_v19 = vadd.f32 %v635_v17, %v3667_v13 }
 0x12c   :  { %v756_v7 = vadd.f32 %v755_v14, %v715_v34 }
 0x12d   :  { %v676_v21 = vpop.f32.mrf.mxu1 }
 0x12e   :  { %v677_v22 = vadd.f32 %v676_v21, %v636_v19 }
 0x130   :  { %1017 = vmatpush.xpose.msrb.mxu0 %v677_v22  ;;  %v466_v22 = vadd.f32 %v3574_v38, %v3680_v37  ;;  %v589_v38 = vadd.f32 %v3587_v47, %v548_v33  ;;  %v472_v47 = vadd.f32 %v3597_v49, %v3680_v37 }
 0x131   :  { %v717_v25 = vpop.f32.mrf.mxu2 }
 0x132   :  { %v718_v28 = vadd.f32 %v717_v25, %v3672_v23  ;;  %v3676_v31 = vpop.f32.mrf.mxu0  ;;  %v586_v25 = vadd.f32 %v3576_v39, %v545_v30  ;;  %v507_v8 = vadd.f32 %v3578_v42, %v466_v22  ;;  %v510_v42 = vadd.f32 %v3590_v48, %v469_v36 }
 0x133   :  { %v758_v32 = vpop.f32.mrf.mxu3  ;;  %v592_v48 = vadd.f32 %v3599_v50, %v551_v45  ;;  %v639_v12 = vadd.f32 %v3676_v31, %v3667_v13  ;;  %v513_v30 = vadd.f32 %v3602_v51, %v472_v47  ;;  %v554_v22 = vadd.f32 %v3607_v1, %v3691_v20 }
 0x134   :  { %v759_v35 = vadd.f32 %v758_v32, %v718_v28  ;;  %1018 = vmatpush.xpose.msrb.mxu0 %v674_v24 }
 0x135   :  { %v3682_v41 = vpop.f32.mrf.mxu1 }
 0x136   :  { %1156 = vmatpush.xpose.msrb.mxu2 %v759_v35  ;;  %v680_v50 = vadd.f32 %v3682_v41, %v639_v12 }
 0x138   :  { %1019 = vmatpush.xpose.msrb.mxu0 %v671_v44 }
 0x139   :  { %v3688_v17 = vpop.f32.mrf.mxu2 }
 0x13a   :  { %1157 = vmatpush.xpose.msrb.mxu2 %v756_v7  ;;  %v641_v19 = vpop.f32.mrf.mxu0 }
 0x13b   :  { %v3693_v21 = vpop.f32.mrf.mxu3  ;;  %v642_v46 = vadd.f32 %v641_v19, %v3667_v13 }
 0x13c   :  { %1020 = vmatpush.xpose.msrb.mxu0 %v668_v11 }
 0x13d   :  { %v682_v14 = vpop.f32.mrf.mxu1 }
 0x13e   :  { %1158 = vmatpush.xpose.msrb.mxu2 %v753_v9 }
 0x13f   :  { %1021 = vmatmul.f32.vlgmr.msrb.gmra.mxu0 %v504_v5  ;;  %v683_v5 = vadd.f32 %v682_v14, %v642_v46  ;;  %v721_v14 = vadd.f32 %v3688_v17, %v3672_v23 }
 0x141   :  { %v723_v24 = vpop.f32.mrf.mxu2  ;;  %v762_v41 = vadd.f32 %v3693_v21, %v721_v14  ;;  %v560_v21 = vadd.f32 %v3631_v29, %v3691_v20 }
 0x142   :  { %1159 = vmatpush.xpose.msrb.mxu2 %v750_v0  ;;  %v644_v27 = vpop.f32.mrf.mxu0  ;;  %v724_v49 = vadd.f32 %v723_v24, %v3672_v23  ;;  %v595_v24 = vadd.f32 %v3611_v52, %v554_v22 }
 0x143   :  { %v764_v2 = vpop.f32.mrf.mxu3  ;;  %v645_v39 = vadd.f32 %v644_v27, %v3667_v13 }
 0x144   :  { %v765_v51 = vadd.f32 %v764_v2, %v724_v49 }
 0x145   :  { %v685_v28 = vpop.f32.mrf.mxu1  ;;  %1160 = vmatmul.f32.vlgmr.msrb.gmra.mxu2 %v586_v25 }
 0x146   :  { %v686_v3 = vadd.f32 %v685_v28, %v645_v39 }
 0x147   :  { %1024 = vmatmul.f32.gmra.mxu0 %v507_v8 }
 0x149   :  { %v726_v4 = vpop.f32.mrf.mxu2 }
 0x14a   :  { %v647_v32 = vpop.f32.mrf.mxu0  ;;  %v727_v18 = vadd.f32 %v726_v4, %v3672_v23 }
 0x14b   :  { %v767_v34 = vpop.f32.mrf.mxu3  ;;  %v648_v35 = vadd.f32 %v647_v32, %v3667_v13  ;;  %v475_v13 = vadd.f32 %v3609_v26, %v3680_v37  ;;  %v557_v26 = vadd.f32 %v3619_v15, %v3691_v20  ;;  %v481_v15 = vadd.f32 %v3633_v54, %v3680_v37 }
 0x14c   :  { %v768_v0 = vadd.f32 %v767_v34, %v727_v18  ;;  %v438_v32 = vperm.slane %v3664_v10, 5  ;;  %v484_v34 = vadd.f32 %v3645_v6, %v3680_v37  ;;  %v566_v6 = vadd.f32 %v3655_v57, %v3691_v20 }
 0x14d   :  { %v688_v62 = vpop.f32.mrf.mxu1  ;;  %1163 = vmatmul.f32.gmra.mxu2 %v589_v38  ;;  %v516_v1 = vadd.f32 %v3614_v53, %v475_v13  ;;  %v598_v52 = vadd.f32 %v3623_v55, %v557_v26  ;;  %v522_v55 = vadd.f32 %v3638_v59, %v481_v15 }
 0x14e   :  { %v689_v44 = vadd.f32 %v688_v62, %v648_v35  ;;  %v437_v35 = vperm.slane %v3664_v10, 4 }
 0x14f   :  { %1027 = vmatmul.f32.gmra.mxu0 %v510_v42 }
 0x150   :  { %1294 = vmatpush.xpose.msra.mxu0 %v689_v44 }
 0x151   :  { %v729_v7 = vpop.f32.mrf.mxu2 }
 0x152   :  { %v730_v11 = vadd.f32 %v729_v7, %v3672_v23  ;;  %v3719_v9 = vpop.f32.mrf.mxu0  ;;  %v478_v23 = vadd.f32 %v3621_v40, %v3680_v37  ;;  %v601_v40 = vadd.f32 %v3635_v58, %v560_v21 }
 0x153   :  { %v770_v63 = vpop.f32.mrf.mxu3 }
 0x154   :  { %v771_v19 = vadd.f32 %v770_v63, %v730_v11  ;;  %1295 = vmatpush.xpose.msra.mxu0 %v686_v3  ;;  %v519_v53 = vadd.f32 %v3626_v56, %v478_v23  ;;  %v563_v56 = vadd.f32 %v3643_v43, %v3691_v20  ;;  %v525_v43 = vadd.f32 %v3650_v61, %v484_v34 }
 0x155   :  { %1166 = vmatmul.f32.gmra.mxu2 %v592_v48  ;;  %v791_v48 = vadd.f32 %v3719_v9, %v437_v35  ;;  %v607_v61 = vadd.f32 %v3657_v16, %v566_v6 }
 0x156   :  { %1432 = vmatpush.xpose.msra.mxu2 %v771_v19  ;;  %v604_v62 = vadd.f32 %v3647_v60, %v563_v56 }
 0x157   :  { %1030 = vmatmul.f32.gmra.mxu0 %v513_v30  ;;  %v831_v2 = vpop.f32.mrf.mxu1 }
 0x158   :  { %1296 = vmatpush.xpose.msra.mxu0 %v683_v5  ;;  %v832_v57 = vadd.f32 %v831_v2, %v791_v48 }
 0x159   :  { %v872_v31 = vpop.f32.mrf.mxu2 }
 0x15a   :  { %1433 = vmatpush.xpose.msra.mxu2 %v768_v0  ;;  %v793_v25 = vpop.f32.mrf.mxu0  ;;  %v873_v44 = vadd.f32 %v872_v31, %v438_v32 }
 0x15b   :  { %v913_v27 = vpop.f32.mrf.mxu3  ;;  %v794_v10 = vadd.f32 %v793_v25, %v437_v35 }
 0x15c   :  { %1297 = vmatpush.xpose.msra.mxu0 %v680_v50  ;;  %v914_v37 = vadd.f32 %v913_v27, %v873_v44 }
 0x15d   :  { %1169 = vmatmul.f32.gmra.mxu2 %v595_v24 }
 0x15e   :  { %1434 = vmatpush.xpose.msra.mxu2 %v765_v51 }
 0x15f   :  { %1298 = vmatmul.f32.vlgmr.msra.gmra.mxu0 %v516_v1  ;;  %v834_v36 = vpop.f32.mrf.mxu1 }
 0x160   :  { %v835_v19 = vadd.f32 %v834_v36, %v794_v10 }
 0x161   :  { %v875_v17 = vpop.f32.mrf.mxu2 }
 0x162   :  { %1435 = vmatpush.xpose.msra.mxu2 %v762_v41  ;;  %v796_v8 = vpop.f32.mrf.mxu0  ;;  %v876_v58 = vadd.f32 %v875_v17, %v438_v32 }
 0x163   :  { %v916_v28 = vpop.f32.mrf.mxu3  ;;  %v797_v47 = vadd.f32 %v796_v8, %v437_v35 }
 0x164   :  { %v917_v18 = vadd.f32 %v916_v28, %v876_v58 }
 0x165   :  { %1436 = vmatmul.f32.vlgmr.msra.gmra.mxu2 %v598_v52 }
 0x167   :  { %1301 = vmatmul.f32.gmra.mxu0 %v519_v53  ;;  %v837_v39 = vpop.f32.mrf.mxu1 }
 0x168   :  { %v838_v63 = vadd.f32 %v837_v39, %v797_v47  ;;  %v986_v39 = vld [vmem:[#allocation7 + $0x8] sm:$0xff] }
 0x169   :  { %v878_v33 = vpop.f32.mrf.mxu2  ;;  %vm990_vm2 = vcmp.eq.f32.partialorder %v986_v39, 0.0 }
 0x16a   :  { %v799_v4 = vpop.f32.mrf.mxu0  ;;  %v879_v29 = vadd.f32 %v878_v33, %v438_v32 }
 0x16b   :  { %v919_v38 = vpop.f32.mrf.mxu3  ;;  %v800_v7 = vadd.f32 %v799_v4, %v437_v35 }
 0x16c   :  { %v920_v46 = vadd.f32 %v919_v38, %v879_v29  ;;  %v985_v38 = vld [vmem:[#allocation7] sm:$0xff] }
 0x16d   :  { %1439 = vmatmul.f32.gmra.mxu2 %v601_v40  ;;  %vm989_vm0 = vcmp.eq.f32.partialorder %v985_v38, 0.0 }
 0x16f   :  { %1304 = vmatmul.f32.gmra.mxu0 %v522_v55  ;;  %v840_v11 = vpop.f32.mrf.mxu1 }
 0x170   :  { %v841_v12 = vadd.f32 %v840_v11, %v800_v7 }
 0x171   :  { %v881_v54 = vpop.f32.mrf.mxu2 }
 0x172   :  { %v882_v42 = vadd.f32 %v881_v54, %v438_v32  ;;  %v802_v45 = vpop.f32.mrf.mxu0  ;;  %1111 = vmatpush.msrb.mxu1 %v841_v12 }
 0x173   :  { %v922_v59 = vpop.f32.mrf.mxu3  ;;  %v803_v53 = vadd.f32 %v802_v45, %v437_v35 }
 0x174   :  { %v923_v3 = vadd.f32 %v922_v59, %v882_v42  ;;  %1112 = vmatpush.msrb.mxu1 %v838_v63 }
 0x175   :  { %1442 = vmatmul.f32.gmra.mxu2 %v604_v62 }
 0x176   :  { %1249 = vmatpush.msrb.mxu3 %v923_v3  ;;  %1113 = vmatpush.msrb.mxu1 %v835_v19  ;;  %v987_v3 = vld [vmem:[#allocation7 + $0x10] sm:$0xff] }
 0x177   :  { %1307 = vmatmul.f32.gmra.mxu0 %v525_v43  ;;  %v843_v49 = vpop.f32.mrf.mxu1  ;;  %vm991_vm3 = vcmp.eq.f32.partialorder %v987_v3, 0.0 }
 0x178   :  { %1250 = vmatpush.msrb.mxu3 %v920_v46  ;;  %1114 = vmatpush.msrb.mxu1 %v832_v57  ;;  %v844_v36 = vadd.f32 %v843_v49, %v803_v53 }
 0x179   :  { %v884_v60 = vpop.f32.mrf.mxu2 }
 0x17a   :  { %1251 = vmatpush.msrb.mxu3 %v917_v18  ;;  %v805_v30 = vpop.f32.mrf.mxu0  ;;  %v885_v1 = vadd.f32 %v884_v60, %v438_v32 }
 0x17b   :  { %v925_v5 = vpop.f32.mrf.mxu3  ;;  %v806_v52 = vadd.f32 %v805_v30, %v437_v35 }
 0x17c   :  { %1252 = vmatpush.msrb.mxu3 %v914_v37  ;;  %v926_v8 = vadd.f32 %v925_v5, %v885_v1  ;;  %v3784_v37 = vld [vmem:[#allocation7 + $0x18] sm:$0xff] }
 0x17d   :  { %1445 = vmatmul.f32.gmra.mxu2 %v607_v61  ;;  %vm992_vm4 = vcmp.eq.f32.partialorder %v3784_v37, 0.0 }
 0x17f   :  { %v846_v50 = vpop.f32.mrf.mxu1 }
 0x180   :  { %v847_v33 = vadd.f32 %v846_v50, %v806_v52 }
 0x181   :  { %v887_v20 = vpop.f32.mrf.mxu2 }
 0x182   :  { %v808_v22 = vpop.f32.mrf.mxu0  ;;  %v888_v51 = vadd.f32 %v887_v20, %v438_v32 }
 0x183   :  { %v928_v0 = vpop.f32.mrf.mxu3  ;;  %v809_v23 = vadd.f32 %v808_v22, %v437_v35 }
 0x184   :  { %v929_v2 = vadd.f32 %v928_v0, %v888_v51 }
 0x187   :  { %v849_v16 = vpop.f32.mrf.mxu1 }
 0x188   :  { %v850_v21 = vadd.f32 %v849_v16, %v809_v23 }
 0x189   :  { %v890_v9 = vpop.f32.mrf.mxu2 }
 0x18a   :  { %v891_v31 = vadd.f32 %v890_v9, %v438_v32  ;;  %v811_v25 = vpop.f32.mrf.mxu0 }
 0x18b   :  { %v931_v13 = vpop.f32.mrf.mxu3  ;;  %v812_v17 = vadd.f32 %v811_v25, %v437_v35 }
 0x18c   :  { %v932_v41 = vadd.f32 %v931_v13, %v891_v31 }
 0x18f   :  { %v852_v28 = vpop.f32.mrf.mxu1 }
 0x190   :  { %v853_v15 = vadd.f32 %v852_v28, %v812_v17 }
 0x191   :  { %v893_v14 = vpop.f32.mrf.mxu2 }
 0x192   :  { %v894_v24 = vadd.f32 %v893_v14, %v438_v32  ;;  %1387 = vmatpush.msra.mxu1 %v853_v15 }
 0x193   :  { %v934_v27 = vpop.f32.mrf.mxu3 }
 0x194   :  { %v935_v26 = vadd.f32 %v934_v27, %v894_v24  ;;  %1388 = vmatpush.msra.mxu1 %v850_v21 }
 0x196   :  { %1525 = vmatpush.msra.mxu3 %v935_v26  ;;  %1389 = vmatpush.msra.mxu1 %v847_v33 }
 0x198   :  { %1526 = vmatpush.msra.mxu3 %v932_v41  ;;  %1390 = vmatpush.msra.mxu1 %v844_v36 }
 0x19a   :  { %1527 = vmatpush.msra.mxu3 %v929_v2 }
 0x19c   :  { %1528 = vmatpush.msra.mxu3 %v926_v8 }
 0x1bc   :  { %v1022_v40 = vpop.f32.mrf.mxu0 }
 0x1bd   :  { %v1034_v54 = vmul.f32 0.088388346, %v1022_v40 }
 0x1bf   :  { %v3765_v42 = vsel %vm989_vm0, -1e+09, %v1034_v54 }
 0x1c0   :  { %v1043_v45 = vsel %vm1042_vm1, %v3765_v42, -inf }
 0x1c4   :  { %v1025_v4 = vpop.f32.mrf.mxu0 }
 0x1c5   :  { %v1035_v46 = vmul.f32 0.088388346, %v1025_v4 }
 0x1c7   :  { %v3775_v7 = vsel %vm990_vm2, -1e+09, %v1035_v46 }
 0x1c8   :  { %v1161_v55 = vpop.f32.mrf.mxu2  ;;  %v1046_v10 = vsel %vm1042_vm1, %v3775_v7, -inf }
 0x1c9   :  { %v1173_v32 = vmul.f32 0.088388346, %v1161_v55 }
 0x1cb   :  { %v3760_v56 = vsel %vm989_vm0, -1e+09, %v1173_v32 }
 0x1cc   :  { %v1028_v29 = vpop.f32.mrf.mxu0  ;;  %v1181_v34 = vsel %vm1042_vm1, %v3760_v56, -inf }
 0x1cd   :  { %1182 = vmax.xlane.f32.xlu0 %v1181_v34  ;;  %v1036_v60 = vmul.f32 0.088388346, %v1028_v29 }
 0x1cf   :  { %v3788_v61 = vsel %vm991_vm3, -1e+09, %v1036_v60 }
 0x1d0   :  { %v1164_v35 = vpop.f32.mrf.mxu2  ;;  %v1049_v57 = vsel %vm1042_vm1, %v3788_v61, -inf }
 0x1d1   :  { %v1174_v58 = vmul.f32 0.088388346, %v1164_v35 }
 0x1d3   :  { %v3768_v62 = vsel %vm990_vm2, -1e+09, %v1174_v58 }
 0x1d4   :  { %v1031_v59 = vpop.f32.mrf.mxu0  ;;  %v1184_v44 = vsel %vm1042_vm1, %v3768_v62, -inf }
 0x1d5   :  { %1185 = vmax.xlane.f32.xlu1 %v1184_v44  ;;  %1044 = vmax.xlane.f32.xlu0 %v1043_v45  ;;  %v1037_v11 = vmul.f32 0.088388346, %v1031_v59 }
 0x1d7   :  { %v3792_v5 = vsel %vm992_vm4, -1e+09, %v1037_v11 }
 0x1d8   :  { %v1167_v43 = vpop.f32.mrf.mxu2  ;;  %v1052_v49 = vsel %vm1042_vm1, %v3792_v5, -inf }
 0x1d9   :  { %v1175_v47 = vmul.f32 0.088388346, %v1167_v43 }
 0x1db   :  { %v3778_v18 = vsel %vm991_vm3, -1e+09, %v1175_v47 }
 0x1dc   :  { %v1187_v6 = vsel %vm1042_vm1, %v3778_v18, -inf  ;;  %v1299_v48 = vpop.f32.mrf.mxu0 }
 0x1dd   :  { %1188 = vmax.xlane.f32.xlu2 %v1187_v6  ;;  %1047 = vmax.xlane.f32.xlu1 %v1046_v10  ;;  %v1311_v20 = vmul.f32 0.088388346, %v1299_v48 }
 0x1df   :  { %v3805_v50 = vsel %vm989_vm0, -1e+09, %v1311_v20 }
 0x1e0   :  { %v1170_v63 = vpop.f32.mrf.mxu2  ;;  %v1319_v14 = vsel %vm1042_vm1, %v3805_v50, -inf }
 0x1e1   :  { %v1176_v12 = vmul.f32 0.088388346, %v1170_v63 }
 0x1e3   :  { %v3796_v19 = vsel %vm992_vm4, -1e+09, %v1176_v12 }
 0x1e4   :  { %v1190_v30 = vsel %vm1042_vm1, %v3796_v19, -inf  ;;  %v1302_v0 = vpop.f32.mrf.mxu0 }
 0x1e5   :  { %1191 = vmax.xlane.f32.xlu0 %v1190_v30  ;;  %1050 = vmax.xlane.f32.xlu2 %v1049_v57  ;;  %v1312_v16 = vmul.f32 0.088388346, %v1302_v0 }
 0x1e6   :  { %1053 = vmax.xlane.f32.xlu1 %v1052_v49 }
 0x1e7   :  { %v3815_v25 = vsel %vm990_vm2, -1e+09, %v1312_v16 }
 0x1e8   :  { %v1437_v22 = vpop.f32.mrf.mxu2  ;;  %v1322_v41 = vsel %vm1042_vm1, %v3815_v25, -inf }
 0x1e9   :  { %v1449_v9 = vmul.f32 0.088388346, %v1437_v22 }
 0x1eb   :  { %v3808_v13 = vsel %vm989_vm0, -1e+09, %v1449_v9 }
 0x1ec   :  { %v1457_v31 = vsel %vm1042_vm1, %v3808_v13, -inf  ;;  %v1305_v27 = vpop.f32.mrf.mxu0 }
 0x1ed   :  { %1458 = vmax.xlane.f32.xlu2 %v1457_v31  ;;  %1320 = vmax.xlane.f32.xlu0 %v1319_v14  ;;  %v1313_v23 = vmul.f32 0.088388346, %v1305_v27 }
 0x1ef   :  { %v3825_v52 = vsel %vm991_vm3, -1e+09, %v1313_v23 }
 0x1f0   :  { %v1440_v51 = vpop.f32.mrf.mxu2  ;;  %v1325_v53 = vsel %vm1042_vm1, %v3825_v52, -inf }
 0x1f1   :  { %v1450_v24 = vmul.f32 0.088388346, %v1440_v51 }
 0x1f3   :  { %v3818_v1 = vsel %vm990_vm2, -1e+09, %v1450_v24 }
 0x1f4   :  { %v1460_v26 = vsel %vm1042_vm1, %v3818_v1, -inf  ;;  %v1308_v44 = vpop.f32.mrf.mxu0 }
 0x1f5   :  { %1323 = vmax.xlane.f32.xlu2 %v1322_v41  ;;  %1461 = vmax.xlane.f32.xlu1 %v1460_v26 }
 0x1f8   :  { %v1443_v17 = vpop.f32.mrf.mxu2 }
 0x1f9   :  { %v1451_v2 = vmul.f32 0.088388346, %v1443_v17 }
 0x1fb   :  { %v3828_v8 = vsel %vm991_vm3, -1e+09, %v1451_v2 }
 0x1fc   :  { %v1463_v28 = vsel %vm1042_vm1, %v3828_v8, -inf }
 0x1fd   :  { %1464 = vmax.xlane.f32.xlu0 %v1463_v28  ;;  %1326 = vmax.xlane.f32.xlu2 %v1325_v53 }
 0x200   :  { %v1446_v55 = vpop.f32.mrf.mxu2 }
 0x201   :  { %v1452_v39 = vmul.f32 0.088388346, %v1446_v55 }
 0x240   :  { %v1183_v21 = vpop.xlane.xlu0 %1182 }
 0x241   :  { %v1193_v15 = vsub.f32 %v3760_v56, %v1183_v21 }
 0x243   :  { %v1197_v33 = vmul.f32 1.442695, %v1193_v15 }
 0x245   :  { %2884 = vpow2.f32 %v1197_v33 }
 0x248   :  { %v1186_v36 = vpop.xlane.xlu1 %1185  ;;  %v1045_v40 = vpop.xlane.xlu0 %1044 }
 0x249   :  { %v1194_v4 = vsub.f32 %v3768_v62, %v1186_v36  ;;  %v1055_v38 = vsub.f32 %v3765_v42, %v1045_v40  ;;  %v3845_v42 = vsel %vm992_vm4, -1e+09, %v1452_v39 }
 0x24a   :  { %v1466_v47 = vsel %vm1042_vm1, %v3845_v42, -inf }
 0x24b   :  { %v3837_v32 = vpop.eup %2884  ;;  %v1199_v29 = vmul.f32 1.442695, %v1194_v4  ;;  %v1059_v34 = vmul.f32 1.442695, %v1055_v38 }
 0x24c   :  { %v1205_v54 = vsel %vm1042_vm1, %v3837_v32, 0.0 }
 0x24d   :  { %2886 = vpow2.f32 %v1199_v29  ;;  %1206 = vadd.xlane.f32.xlu1 %v1205_v54 }
 0x24e   :  { %2888 = vpow2.f32 %v1059_v34 }
 0x250   :  { %v1189_v56 = vpop.xlane.xlu2 %1188  ;;  %v1048_v35 = vpop.xlane.xlu1 %1047 }
 0x251   :  { %v1195_v58 = vsub.f32 %v3778_v18, %v1189_v56  ;;  %v1056_v62 = vsub.f32 %v3775_v7, %v1048_v35  ;;  %v1314_v18 = vmul.f32 0.088388346, %v1308_v44 }
 0x253   :  { %v3847_v59 = vpop.eup %2886  ;;  %v1201_v45 = vmul.f32 1.442695, %v1195_v58  ;;  %v1061_v46 = vmul.f32 1.442695, %v1056_v62  ;;  %v3862_v12 = vsel %vm992_vm4, -1e+09, %v1314_v18 }
 0x254   :  { %v3849_v3 = vpop.eup %2888  ;;  %v1208_v43 = vsel %vm1042_vm1, %v3847_v59, 0.0 }
 0x255   :  { %2890 = vpow2.f32 %v1201_v45  ;;  %v1067_v7 = vsel %vm1042_vm1, %v3849_v3, 0.0  ;;  %1209 = vadd.xlane.f32.xlu2 %v1208_v43  ;;  %1467 = vmax.xlane.f32.xlu1 %v1466_v47 }
 0x256   :  { %2892 = vpow2.f32 %v1061_v46  ;;  %1068 = vadd.xlane.f32.xlu0 %v1067_v7 }
 0x258   :  { %v1192_v6 = vpop.xlane.xlu0 %1191  ;;  %v1051_v10 = vpop.xlane.xlu2 %1050 }
 0x259   :  { %v1196_v60 = vsub.f32 %v3796_v19, %v1192_v6  ;;  %v1057_v11 = vsub.f32 %v3788_v61, %v1051_v10  ;;  %v1054_v48 = vpop.xlane.xlu1 %1053  ;;  %v1328_v61 = vsel %vm1042_vm1, %v3862_v12, -inf }
 0x25a   :  { %v1058_v63 = vsub.f32 %v3792_v5, %v1054_v48 }
 0x25b   :  { %v3864_v30 = vpop.eup %2890  ;;  %v1203_v57 = vmul.f32 1.442695, %v1196_v60  ;;  %v1063_v20 = vmul.f32 1.442695, %v1057_v11 }
 0x25c   :  { %v3866_v49 = vpop.eup %2892  ;;  %v1065_v0 = vmul.f32 1.442695, %v1058_v63  ;;  %v1211_v22 = vsel %vm1042_vm1, %v3864_v30, 0.0 }
 0x25d   :  { %2894 = vpow2.f32 %v1203_v57  ;;  %1212 = vadd.xlane.f32.xlu2 %v1211_v22  ;;  %v1070_v37 = vsel %vm1042_vm1, %v3866_v49, 0.0 }
 0x25e   :  { %2896 = vpow2.f32 %v1063_v20  ;;  %1329 = vmax.xlane.f32.xlu0 %v1328_v61  ;;  %1071 = vadd.xlane.f32.xlu1 %v1070_v37 }
 0x25f   :  { %2898 = vpow2.f32 %v1065_v0 }
 0x260   :  { %v1459_v5 = vpop.xlane.xlu2 %1458  ;;  %v1321_v19 = vpop.xlane.xlu0 %1320 }
 0x261   :  { %v1469_v9 = vsub.f32 %v3808_v13, %v1459_v5  ;;  %v1331_v31 = vsub.f32 %v3805_v50, %v1321_v19 }
 0x263   :  { %v3876_v14 = vpop.eup %2894  ;;  %v1473_v16 = vmul.f32 1.442695, %v1469_v9  ;;  %v1335_v51 = vmul.f32 1.442695, %v1331_v31 }
 0x264   :  { %v3878_v24 = vpop.eup %2896  ;;  %v1214_v27 = vsel %vm1042_vm1, %v3876_v14, 0.0 }
 0x265   :  { %v3882_v41 = vpop.eup %2898  ;;  %2900 = vpow2.f32 %v1473_v16  ;;  %v1073_v26 = vsel %vm1042_vm1, %v3878_v24, 0.0 }
 0x266   :  { %2902 = vpow2.f32 %v1335_v51  ;;  %1074 = vadd.xlane.f32.xlu0 %v1073_v26  ;;  %1215 = vadd.xlane.f32.xlu1 %v1214_v27  ;;  %v1076_v50 = vsel %vm1042_vm1, %v3882_v41, 0.0  ;;  %v1592_v51 = vld [vmem:[#allocation10 + $0xf0] sm:$0xff]  ;;  %v1593_v27 = vld [vmem:[#allocation10 + $0xf8] sm:$0xff]  ;;  %v1590_v26 = vld [vmem:[#allocation10 + $0xe0] sm:$0xff] }
 0x267   :  { %1077 = vadd.xlane.f32.xlu2 %v1076_v50  ;;  %1632 = vmatpush.msrb.mxu0 %v1592_v51  ;;  %v1591_v50 = vld [vmem:[#allocation10 + $0xe8] sm:$0xff]  ;;  %v1564_v51 = vld [vmem:[#allocation10 + $0x10] sm:$0xff] }
 0x268   :  { %v1324_v13 = vpop.xlane.xlu2 %1323  ;;  %v1462_v23 = vpop.xlane.xlu1 %1461  ;;  %1714 = vmatpush.msrb.mxu2 %v1593_v27  ;;  %v1565_v27 = vld [vmem:[#allocation10 + $0x18] sm:$0xff] }
 0x269   :  { %v1332_v17 = vsub.f32 %v3815_v25, %v1324_v13  ;;  %v1470_v2 = vsub.f32 %v3818_v1, %v1462_v23  ;;  %v1588_v23 = vld [vmem:[#allocation10 + $0xd0] sm:$0xff]  ;;  %1633 = vmatpush.msrb.mxu0 %v1590_v26  ;;  %v1607_v26 = vld [vmem:[#allocation10 + $0x168] sm:$0xff] }
 0x26a   :  { %1715 = vmatpush.msrb.mxu2 %v1591_v50  ;;  %v1562_v50 = vld [vmem:[#allocation10] sm:$0xff] }
 0x26b   :  { %v3890_v28 = vpop.eup %2900  ;;  %v1337_v53 = vmul.f32 1.442695, %v1332_v17  ;;  %v1475_v21 = vmul.f32 1.442695, %v1470_v2  ;;  %v1589_v17 = vld [vmem:[#allocation10 + $0xd8] sm:$0xff]  ;;  %1634 = vmatpush.msrb.mxu0 %v1588_v23  ;;  %v1563_v23 = vld [vmem:[#allocation10 + $0x8] sm:$0xff] }
 0x26c   :  { %v3892_v15 = vpop.eup %2902  ;;  %v1481_v33 = vsel %vm1042_vm1, %v3890_v28, 0.0  ;;  %1716 = vmatpush.msrb.mxu2 %v1589_v17  ;;  %v1605_v17 = vld [vmem:[#allocation10 + $0x158] sm:$0xff] }
 0x26d   :  { %2904 = vpow2.f32 %v1337_v53  ;;  %v1343_v36 = vsel %vm1042_vm1, %v3892_v15, 0.0  ;;  %v1587_v53 = vld [vmem:[#allocation10 + $0xc8] sm:$0xff] }
 0x26e   :  { %2906 = vpow2.f32 %v1475_v21  ;;  %1482 = vadd.xlane.f32.xlu0 %v1481_v33  ;;  %1344 = vadd.xlane.f32.xlu1 %v1343_v36  ;;  %v1625_v21 = vld [vmem:[#allocation10 + $0x1f8] sm:$0xff] }
 0x26f   :  { %1717 = vmatpush.msrb.mxu2 %v1587_v53  ;;  %v1608_v53 = vld [vmem:[#allocation10 + $0x170] sm:$0xff] }
 0x270   :  { %v1465_v40 = vpop.xlane.xlu0 %1464  ;;  %v1327_v25 = vpop.xlane.xlu2 %1326 }
 0x271   :  { %v1471_v1 = vsub.f32 %v3828_v8, %v1465_v40  ;;  %v1333_v4 = vsub.f32 %v3825_v52, %v1327_v25 }
 0x273   :  { %v3900_v38 = vpop.eup %2904  ;;  %v1477_v55 = vmul.f32 1.442695, %v1471_v1  ;;  %v1339_v29 = vmul.f32 1.442695, %v1333_v4  ;;  %v1584_v1 = vld [vmem:[#allocation10 + $0xb0] sm:$0xff]  ;;  %v1585_v4 = vld [vmem:[#allocation10 + $0xb8] sm:$0xff] }
 0x274   :  { %v3902_v34 = vpop.eup %2906  ;;  %v1346_v54 = vsel %vm1042_vm1, %v3900_v38, 0.0  ;;  %1718 = vmatpush.msrb.mxu2 %v1585_v4  ;;  %v1600_v4 = vld [vmem:[#allocation10 + $0x130] sm:$0xff] }
 0x275   :  { %2908 = vpow2.f32 %v1477_v55  ;;  %v1484_v39 = vsel %vm1042_vm1, %v3902_v34, 0.0  ;;  %v1624_v55 = vld [vmem:[#allocation10 + $0x1f0] sm:$0xff] }
 0x276   :  { %2910 = vpow2.f32 %v1339_v29  ;;  %1347 = vadd.xlane.f32.xlu0 %v1346_v54  ;;  %1485 = vadd.xlane.f32.xlu2 %v1484_v39  ;;  %v1582_v29 = vld [vmem:[#allocation10 + $0xa0] sm:$0xff]  ;;  %v1583_v54 = vld [vmem:[#allocation10 + $0xa8] sm:$0xff]  ;;  %v1621_v39 = vld [vmem:[#allocation10 + $0x1d8] sm:$0xff] }
 0x277   :  { %1719 = vmatpush.msrb.mxu2 %v1583_v54  ;;  %v1594_v54 = vld [vmem:[#allocation10 + $0x100] sm:$0xff] }
 0x27b   :  { %v3908_v56 = vpop.eup %2908 }
 0x27c   :  { %v3910_v8 = vpop.eup %2910  ;;  %v1487_v52 = vsel %vm1042_vm1, %v3908_v56, 0.0 }
 0x27d   :  { %1488 = vadd.xlane.f32.xlu1 %v1487_v52  ;;  %v1349_v35 = vsel %vm1042_vm1, %v3910_v8, 0.0  ;;  %v1622_v52 = vld [vmem:[#allocation10 + $0x1e0] sm:$0xff] }
 0x27e   :  { %1350 = vadd.xlane.f32.xlu2 %v1349_v35  ;;  %v1581_v35 = vld [vmem:[#allocation10 + $0x98] sm:$0xff] }
 0x27f   :  { %1720 = vmatpush.msrb.mxu2 %v1581_v35 }
 0x2c0   :  { %v1207_v58 = vpop.xlane.xlu1 %1206 }
 0x2c1   :  { %2912 = vrcp.f32 %v1207_v58 }
 0x2c7   :  { %v2913_v62 = vpop.eup %2912 }
 0x2c8   :  { %v1221_v44 = vmul.f32 %v2913_v62, %v3837_v32  ;;  %v1210_v45 = vpop.xlane.xlu2 %1209  ;;  %v1468_v46 = vpop.xlane.xlu1 %1467  ;;  %v1619_v62 = vld [vmem:[#allocation10 + $0x1c8] sm:$0xff] }
 0x2c9   :  { %v1069_v43 = vpop.xlane.xlu0 %1068  ;;  %2914 = vrcp.f32 %v1210_v45  ;;  %v1472_v47 = vsub.f32 %v3845_v42, %v1468_v46  ;;  %v1578_v45 = vld [vmem:[#allocation10 + $0x80] sm:$0xff]  ;;  %v1579_v46 = vld [vmem:[#allocation10 + $0x88] sm:$0xff] }
 0x2ca   :  { %2916 = vrcp.f32 %v1069_v43  ;;  %2852 = vmatmul.msk.f32.vlgmr.msrb.gmra.mxu3 %vm1042_vm1, %v1221_v44  ;;  %v1620_v44 = vld [vmem:[#allocation10 + $0x1d0] sm:$0xff]  ;;  %1721 = vmatpush.msrb.mxu2 %v1579_v46 }
 0x2cb   :  { %v1479_v7 = vmul.f32 1.442695, %v1472_v47  ;;  %1755 = vmatpush.msrb.mxu3 %v1625_v21  ;;  %v1617_v47 = vld [vmem:[#allocation10 + $0x1b8] sm:$0xff] }
 0x2cc   :  { %v1601_v21 = vld [vmem:[#allocation10 + $0x138] sm:$0xff] }
 0x2cd   :  { %2918 = vpow2.f32 %v1479_v7 }
 0x2cf   :  { %v2915_v18 = vpop.eup %2914 }
 0x2d0   :  { %v2917_v6 = vpop.eup %2916  ;;  %v1213_v10 = vpop.xlane.xlu2 %1212  ;;  %v1222_v60 = vmul.f32 %v2915_v18, %v3847_v59 }
 0x2d1   :  { %v1083_v11 = vmul.f32 %v2917_v6, %v3849_v3  ;;  %2920 = vrcp.f32 %v1213_v10  ;;  %v1330_v32 = vpop.xlane.xlu0 %1329  ;;  %v1072_v48 = vpop.xlane.xlu1 %1071  ;;  %v1576_v6 = vld [vmem:[#allocation10 + $0x70] sm:$0xff]  ;;  %v1577_v10 = vld [vmem:[#allocation10 + $0x78] sm:$0xff] }
 0x2d2   :  { %v1334_v63 = vsub.f32 %v3862_v12, %v1330_v32  ;;  %2922 = vrcp.f32 %v1072_v48  ;;  %2853 = vmatmul.msk.f32.gmra.mxu3 %vm1042_vm1, %v1222_v60  ;;  %v1575_v32 = vld [vmem:[#allocation10 + $0x68] sm:$0xff]  ;;  %1722 = vmatpush.msrb.mxu2 %v1577_v10 }
 0x2d3   :  { %v3923_v42 = vpop.eup %2918  ;;  %2848 = vmatmul.msk.f32.vlgmr.msrb.gmra.mxu1 %vm1042_vm1, %v1083_v11  ;;  %v1574_v11 = vld [vmem:[#allocation10 + $0x60] sm:$0xff]  ;;  %v1615_v48 = vld [vmem:[#allocation10 + $0x1a8] sm:$0xff] }
 0x2d4   :  { %v1341_v57 = vmul.f32 1.442695, %v1334_v63  ;;  %v1490_v20 = vsel %vm1042_vm1, %v3923_v42, 0.0  ;;  %1673 = vmatpush.msrb.mxu1 %v1624_v55  ;;  %1723 = vmatpush.msrb.mxu2 %v1575_v32  ;;  %v1598_v55 = vld [vmem:[#allocation10 + $0x120] sm:$0xff] }
 0x2d5   :  { %1491 = vadd.xlane.f32.xlu0 %v1490_v20 }
 0x2d6   :  { %2924 = vpow2.f32 %v1341_v57  ;;  %1674 = vmatpush.msrb.mxu1 %v1622_v52  ;;  %v1573_v57 = vld [vmem:[#allocation10 + $0x58] sm:$0xff] }
 0x2d7   :  { %v2921_v59 = vpop.eup %2920  ;;  %1724 = vmatpush.msrb.mxu2 %v1573_v57 }
 0x2d8   :  { %v2923_v3 = vpop.eup %2922  ;;  %v1223_v0 = vmul.f32 %v2921_v59, %v3864_v30  ;;  %1675 = vmatpush.msrb.mxu1 %v1620_v44  ;;  %v1613_v59 = vld [vmem:[#allocation10 + $0x198] sm:$0xff] }
 0x2d9   :  { %v1075_v22 = vpop.xlane.xlu0 %1074  ;;  %v1216_v61 = vpop.xlane.xlu1 %1215  ;;  %v1084_v12 = vmul.f32 %v2923_v3, %v3866_v49  ;;  %v1570_v3 = vld [vmem:[#allocation10 + $0x40] sm:$0xff] }
 0x2da   :  { %2926 = vrcp.f32 %v1075_v22  ;;  %2854 = vmatmul.msk.f32.gmra.mxu3 %vm1042_vm1, %v1223_v0  ;;  %v1078_v5 = vpop.xlane.xlu2 %1077  ;;  %v1571_v0 = vld [vmem:[#allocation10 + $0x48] sm:$0xff] }
 0x2db   :  { %2849 = vmatmul.msk.f32.gmra.mxu1 %vm1042_vm1, %v1084_v12  ;;  %2928 = vrcp.f32 %v1216_v61  ;;  %1725 = vmatpush.msrb.mxu2 %v1571_v0 }
 0x2dc   :  { %v3932_v37 = vpop.eup %2924  ;;  %2930 = vrcp.f32 %v1078_v5 }
 0x2dd   :  { %v1352_v19 = vsel %vm1042_vm1, %v3932_v37, 0.0 }
 0x2de   :  { %1353 = vadd.xlane.f32.xlu1 %v1352_v19  ;;  %v1568_v19 = vld [vmem:[#allocation10 + $0x30] sm:$0xff] }
 0x2e0   :  { %v2927_v9 = vpop.eup %2926 }
 0x2e1   :  { %v1483_v30 = vpop.xlane.xlu0 %1482  ;;  %v1085_v31 = vmul.f32 %v2927_v9, %v3878_v24  ;;  %v2929_v16 = vpop.eup %2928  ;;  %v1586_v24 = vld [vmem:[#allocation10 + $0xc0] sm:$0xff] }
 0x2e2   :  { %2932 = vrcp.f32 %v1483_v30  ;;  %v1224_v49 = vmul.f32 %v2929_v16, %v3876_v14  ;;  %v1345_v13 = vpop.xlane.xlu1 %1344  ;;  %v2931_v2 = vpop.eup %2930  ;;  %v1623_v14 = vld [vmem:[#allocation10 + $0x1e8] sm:$0xff]  ;;  %1635 = vmatpush.msrb.mxu0 %v1586_v24  ;;  %v1618_v9 = vld [vmem:[#allocation10 + $0x1c0] sm:$0xff]  ;;  %v1569_v30 = vld [vmem:[#allocation10 + $0x38] sm:$0xff] }
 0x2e3   :  { %2850 = vmatmul.msk.f32.gmra.mxu1 %vm1042_vm1, %v1085_v31  ;;  %2934 = vrcp.f32 %v1345_v13  ;;  %v1086_v25 = vmul.f32 %v2931_v2, %v3882_v41  ;;  %1756 = vmatpush.msrb.mxu3 %v1623_v14  ;;  %v1580_v41 = vld [vmem:[#allocation10 + $0x90] sm:$0xff]  ;;  %v1566_v31 = vld [vmem:[#allocation10 + $0x20] sm:$0xff]  ;;  %v1567_v16 = vld [vmem:[#allocation10 + $0x28] sm:$0xff] }
 0x2e4   :  { %2855 = vmatmul.msk.f32.gmra.mxu3 %vm1042_vm1, %v1224_v49  ;;  %1636 = vmatpush.msrb.mxu0 %v1584_v1  ;;  %v1609_v49 = vld [vmem:[#allocation10 + $0x178] sm:$0xff]  ;;  %v1612_v13 = vld [vmem:[#allocation10 + $0x190] sm:$0xff]  ;;  %v1610_v2 = vld [vmem:[#allocation10 + $0x180] sm:$0xff] }
 0x2e5   :  { %1757 = vmatpush.msrb.mxu3 %v1621_v39  ;;  %1676 = vmatpush.msrb.mxu1 %v1618_v9  ;;  %v1603_v24 = vld [vmem:[#allocation10 + $0x148] sm:$0xff] }
 0x2e6   :  { %1637 = vmatpush.msrb.mxu0 %v1582_v29  ;;  %1726 = vmatpush.msrb.mxu2 %v1569_v30  ;;  %v1599_v14 = vld [vmem:[#allocation10 + $0x128] sm:$0xff]  ;;  %v1596_v29 = vld [vmem:[#allocation10 + $0x110] sm:$0xff] }
 0x2e7   :  { %1758 = vmatpush.msrb.mxu3 %v1619_v62  ;;  %v1595_v1 = vld [vmem:[#allocation10 + $0x108] sm:$0xff] }
 0x2e8   :  { %v2933_v33 = vpop.eup %2932  ;;  %1638 = vmatpush.msrb.mxu0 %v1580_v41  ;;  %1727 = vmatpush.msrb.mxu2 %v1567_v16  ;;  %v2982_v9 = vld [vmem:[#allocation4 + $0x8] sm:$0xff] }
 0x2e9   :  { %v1497_v36 = vmul.f32 %v2933_v33, %v3890_v28  ;;  %v1486_v40 = vpop.xlane.xlu2 %1485  ;;  %v1348_v28 = vpop.xlane.xlu0 %1347  ;;  %1759 = vmatpush.msrb.mxu3 %v1617_v47  ;;  %v1606_v33 = vld [vmem:[#allocation10 + $0x160] sm:$0xff] }
 0x2ea   :  { %2936 = vrcp.f32 %v1486_v40  ;;  %v2935_v58 = vpop.eup %2934  ;;  %1639 = vmatpush.msrb.mxu0 %v1578_v45  ;;  %1728 = vmatpush.msrb.mxu2 %v1565_v27  ;;  %v1597_v40 = vld [vmem:[#allocation10 + $0x118] sm:$0xff] }
 0x2eb   :  { %2851 = vmatmul.msk.f32.gmra.mxu1 %vm1042_vm1, %v1086_v25  ;;  %2938 = vrcp.f32 %v1348_v28  ;;  %v1359_v18 = vmul.f32 %v2935_v58, %v3892_v15  ;;  %v1572_v15 = vld [vmem:[#allocation10 + $0x50] sm:$0xff]  ;;  %1760 = vmatpush.msrb.mxu3 %v1615_v48  ;;  %v1602_v25 = vld [vmem:[#allocation10 + $0x140] sm:$0xff] }
 0x2ec   :  { %2860 = vmatmul.msk.f32.vlgmr.msra.gmra.mxu3 %vm1042_vm1, %v1497_v36  ;;  %1640 = vmatpush.msrb.mxu0 %v1576_v6  ;;  %v1604_v36 = vld [vmem:[#allocation10 + $0x150] sm:$0xff] }
 0x2ed   :  { %1761 = vmatpush.msrb.mxu3 %v1613_v59  ;;  %1729 = vmatpush.msrb.mxu2 %v1563_v23  ;;  %v2984_v23 = vld [vmem:[#allocation4 + $0x18] sm:$0xff] }
 0x2ee   :  { %1641 = vmatpush.msrb.mxu0 %v1574_v11 }
 0x2f0   :  { %v1489_v43 = vpop.xlane.xlu1 %1488  ;;  %v2937_v7 = vpop.eup %2936  ;;  %1642 = vmatpush.msrb.mxu0 %v1572_v15  ;;  %v1626_v15 = vld [vmem:[#allocation12] sm:$0x3] }
 0x2f1   :  { %2940 = vrcp.f32 %v1489_v43  ;;  %v1498_v60 = vmul.f32 %v2937_v7, %v3902_v34  ;;  %v1351_v63 = vpop.xlane.xlu2 %1350  ;;  %v2939_v20 = vpop.eup %2938 }
 0x2f2   :  { %2942 = vrcp.f32 %v1351_v63  ;;  %v1360_v22 = vmul.f32 %v2939_v20, %v3900_v38  ;;  %1643 = vmatpush.msrb.mxu0 %v1570_v3  ;;  %v1611_v38 = vld [vmem:[#allocation10 + $0x188] sm:$0xff]  ;;  %v3958_v20 = vperm.slane %v1626_v15, 1 }
 0x2f3   :  { %2856 = vmatmul.msk.f32.vlgmr.msra.gmra.mxu1 %vm1042_vm1, %v1359_v18  ;;  %1762 = vmatpush.msrb.mxu3 %v1611_v38  ;;  %v2983_v38 = vld [vmem:[#allocation4] sm:$0xff] }
 0x2f4   :  { %2861 = vmatmul.msk.f32.gmra.mxu3 %vm1042_vm1, %v1498_v60  ;;  %1644 = vmatpush.msrb.mxu0 %v1568_v19 }
 0x2f5   :  { %1763 = vmatpush.msrb.mxu3 %v1609_v49 }
 0x2f6   :  { %1645 = vmatpush.msrb.mxu0 %v1566_v31 }
 0x2f7   :  { %v2941_v34 = vpop.eup %2940  ;;  %1764 = vmatpush.msrb.mxu3 %v1607_v26 }
 0x2f8   :  { %v1499_v61 = vmul.f32 %v2941_v34, %v3908_v56  ;;  %v2943_v12 = vpop.eup %2942  ;;  %v1616_v56 = vld [vmem:[#allocation10 + $0x1b0] sm:$0xff]  ;;  %1646 = vmatpush.msrb.mxu0 %v1564_v51  ;;  %v3960_v34 = vperm.slane %v1626_v15, 0  ;;  %v2990_v15 = vld [vmem:[#allocation4 + $0x48] sm:$0xff] }
 0x2f9   :  { %v1361_v5 = vmul.f32 %v2943_v12, %v3910_v8  ;;  %1677 = vmatpush.msrb.mxu1 %v1616_v56  ;;  %v1614_v8 = vld [vmem:[#allocation10 + $0x1a0] sm:$0xff]  ;;  %1765 = vmatpush.msrb.mxu3 %v1605_v17 }
 0x2fa   :  { %1647 = vmatpush.msrb.mxu0 %v1562_v50 }
 0x2fb   :  { %2857 = vmatmul.msk.f32.gmra.mxu1 %vm1042_vm1, %v1360_v22  ;;  %1766 = vmatpush.msrb.mxu3 %v1603_v24 }
 0x2fc   :  { %2862 = vmatmul.msk.f32.gmra.mxu3 %vm1042_vm1, %v1499_v61  ;;  %1678 = vmatpush.msrb.mxu1 %v1614_v8 }
 0x2fd   :  { %1767 = vmatpush.msrb.mxu3 %v1601_v21 }
 0x2fe   :  { %1679 = vmatpush.msrb.mxu1 %v1612_v13 }
 0x2ff   :  { %1768 = vmatpush.msrb.mxu3 %v1599_v14 }
 0x300   :  { %1680 = vmatpush.msrb.mxu1 %v1610_v2  ;;  %v2985_v2 = vld [vmem:[#allocation4 + $0x10] sm:$0xff] }
 0x301   :  { %1769 = vmatpush.msrb.mxu3 %v1597_v40 }
 0x302   :  { %1681 = vmatpush.msrb.mxu1 %v1608_v53 }
 0x303   :  { %2858 = vmatmul.msk.f32.gmra.mxu1 %vm1042_vm1, %v1361_v5  ;;  %1770 = vmatpush.msrb.mxu3 %v1595_v1 }
 0x304   :  { %1682 = vmatpush.msrb.mxu1 %v1606_v33 }
 0x306   :  { %1683 = vmatpush.msrb.mxu1 %v1604_v36 }
 0x308   :  { %1684 = vmatpush.msrb.mxu1 %v1602_v25 }
 0x30a   :  { %1685 = vmatpush.msrb.mxu1 %v1600_v4 }
 0x30c   :  { %1686 = vmatpush.msrb.mxu1 %v1598_v55  ;;  %v2986_v55 = vld [vmem:[#allocation4 + $0x28] sm:$0xff] }
 0x30e   :  { %1687 = vmatpush.msrb.mxu1 %v1596_v29 }
 0x310   :  { %1688 = vmatpush.msrb.mxu1 %v1594_v54  ;;  %v2987_v54 = vld [vmem:[#allocation4 + $0x20] sm:$0xff] }
 0x348   :  { %v1492_v39 = vpop.xlane.xlu0 %1491 }
 0x349   :  { %2944 = vrcp.f32 %v1492_v39 }
 0x34d   :  { %v1254_v52 = vpop.f32.mrf.mxu3 }
 0x34f   :  { %v2945_v28 = vpop.eup %2944 }
 0x350   :  { %v1116_v41 = vpop.f32.mrf.mxu1  ;;  %v1500_v35 = vmul.f32 %v2945_v28, %v3923_v42 }
 0x351   :  { %1648 = vmatmul.f32.vlgmr.msrb.gmra.mxu0 %v1116_v41  ;;  %1730 = vmatmul.f32.vlgmr.msrb.gmra.mxu2 %v1116_v41  ;;  %v1354_v58 = vpop.xlane.xlu1 %1353 }
 0x352   :  { %2946 = vrcp.f32 %v1354_v58  ;;  %2863 = vmatmul.msk.f32.gmra.mxu3 %vm1042_vm1, %v1500_v35 }
 0x355   :  { %v1257_v62 = vpop.f32.mrf.mxu3 }
 0x358   :  { %v2947_v44 = vpop.eup %2946  ;;  %v1119_v45 = vpop.f32.mrf.mxu1 }
 0x359   :  { %1651 = vmatmul.f32.gmra.mxu0 %v1119_v45  ;;  %1733 = vmatmul.f32.gmra.mxu2 %v1119_v45  ;;  %v1362_v46 = vmul.f32 %v2947_v44, %v3932_v37 }
 0x35a   :  { %1771 = vmatmul.f32.vlgmr.msrb.gmra.mxu3 %v1254_v52 }
 0x35b   :  { %2859 = vmatmul.msk.f32.gmra.mxu1 %vm1042_vm1, %v1362_v46 }
 0x35d   :  { %v1260_v47 = vpop.f32.mrf.mxu3 }
 0x360   :  { %v1122_v43 = vpop.f32.mrf.mxu1 }
 0x361   :  { %1654 = vmatmul.f32.gmra.mxu0 %v1122_v43  ;;  %1736 = vmatmul.f32.gmra.mxu2 %v1122_v43  ;;  %v2988_v43 = vld [vmem:[#allocation4 + $0x38] sm:$0xff] }
 0x362   :  { %1774 = vmatmul.f32.gmra.mxu3 %v1257_v62 }
 0x363   :  { %1689 = vmatmul.f32.vlgmr.msrb.gmra.mxu1 %v1254_v52 }
 0x367   :  { %v1263_v7 = vpop.f32.mrf.mxu3 }
 0x368   :  { %v1125_v42 = vpop.f32.mrf.mxu1 }
 0x369   :  { %1657 = vmatmul.f32.gmra.mxu0 %v1125_v42  ;;  %1739 = vmatmul.f32.gmra.mxu2 %v1125_v42  ;;  %v2989_v42 = vld [vmem:[#allocation4 + $0x30] sm:$0xff] }
 0x36a   :  { %1777 = vmatmul.f32.gmra.mxu3 %v1260_v47 }
 0x36b   :  { %1692 = vmatmul.f32.gmra.mxu1 %v1257_v62 }
 0x36f   :  { %v1530_v37 = vpop.f32.mrf.mxu3 }
 0x370   :  { %v1392_v18 = vpop.f32.mrf.mxu1 }
 0x371   :  { %1660 = vmatmul.f32.gmra.mxu0 %v1392_v18  ;;  %1742 = vmatmul.f32.gmra.mxu2 %v1392_v18 }
 0x372   :  { %1780 = vmatmul.f32.gmra.mxu3 %v1263_v7 }
 0x373   :  { %1695 = vmatmul.f32.gmra.mxu1 %v1260_v47 }
 0x377   :  { %v1533_v10 = vpop.f32.mrf.mxu3 }
 0x378   :  { %v1395_v6 = vpop.f32.mrf.mxu1 }
 0x379   :  { %1663 = vmatmul.f32.gmra.mxu0 %v1395_v6  ;;  %1745 = vmatmul.f32.gmra.mxu2 %v1395_v6 }
 0x37a   :  { %1783 = vmatmul.f32.gmra.mxu3 %v1530_v37 }
 0x37b   :  { %1698 = vmatmul.f32.gmra.mxu1 %v1263_v7 }
 0x37f   :  { %v1536_v11 = vpop.f32.mrf.mxu3 }
 0x380   :  { %v1398_v60 = vpop.f32.mrf.mxu1 }
 0x381   :  { %1666 = vmatmul.f32.gmra.mxu0 %v1398_v60  ;;  %1748 = vmatmul.f32.gmra.mxu2 %v1398_v60 }
 0x382   :  { %1786 = vmatmul.f32.gmra.mxu3 %v1533_v10 }
 0x383   :  { %1701 = vmatmul.f32.gmra.mxu1 %v1530_v37 }
 0x38a   :  { %1789 = vmatmul.f32.gmra.mxu3 %v1536_v11 }
 0x38b   :  { %1704 = vmatmul.f32.gmra.mxu1 %v1533_v10 }
 0x393   :  { %1707 = vmatmul.f32.gmra.mxu1 %v1536_v11 }
 0x3ce   :  { %v1649_v32 = vpop.f32.mrf.mxu0 }
 0x3cf   :  { %v1650_v61 = vadd.f32 %v1649_v32, %v3960_v34 }
 0x3d4   :  { %v1731_v48 = vpop.f32.mrf.mxu2 }
 0x3d5   :  { %v1539_v63 = vpop.f32.mrf.mxu3  ;;  %v1732_v0 = vadd.f32 %v1731_v48, %v3958_v20 }
 0x3d6   :  { %1710 = vmatmul.f32.gmra.mxu1 %v1539_v63  ;;  %1792 = vmatmul.f32.gmra.mxu3 %v1539_v63  ;;  %v1652_v59 = vpop.f32.mrf.mxu0 }
 0x3d7   :  { %v1653_v27 = vadd.f32 %v1652_v59, %v3960_v34  ;;  %v2991_v59 = vld [vmem:[#allocation4 + $0x40] sm:$0xff] }
 0x3d8   :  { %v1401_v57 = vpop.f32.mrf.mxu1 }
 0x3d9   :  { %1669 = vmatmul.f32.gmra.mxu0 %v1401_v57  ;;  %1751 = vmatmul.f32.gmra.mxu2 %v1401_v57 }
 0x3dc   :  { %v1734_v3 = vpop.f32.mrf.mxu2 }
 0x3dd   :  { %v1772_v22 = vpop.f32.mrf.mxu3  ;;  %v1735_v49 = vadd.f32 %v1734_v3, %v3958_v20 }
 0x3de   :  { %v1773_v12 = vadd.f32 %v1772_v22, %v1732_v0  ;;  %v1655_v56 = vpop.f32.mrf.mxu0 }
 0x3df   :  { %v1656_v40 = vadd.f32 %v1655_v56, %v3960_v34  ;;  %v2992_v56 = vld [vmem:[#allocation4 + $0x58] sm:$0xff] }
 0x3e0   :  { %v1690_v5 = vpop.f32.mrf.mxu1  ;;  %v3964_v30 = vadd.f32 %v2982_v9, %v1773_v12 }
 0x3e1   :  { %v1691_v19 = vadd.f32 %v1690_v5, %v1650_v61 }
 0x3e3   :  { %v3966_v31 = vadd.f32 %v2983_v38, %v1691_v19 }
 0x3e4   :  { %v1737_v16 = vpop.f32.mrf.mxu2 }
 0x3e5   :  { %v1775_v51 = vpop.f32.mrf.mxu3  ;;  %v1812_v8 = vadd.f32 %v3964_v30, %v3966_v31  ;;  %v1738_v21 = vadd.f32 %v1737_v16, %v3958_v20 }
 0x3e6   :  { %v1776_v26 = vadd.f32 %v1775_v51, %v1735_v49  ;;  %v1658_v36 = vpop.f32.mrf.mxu0  ;;  %v2993_v49 = vld [vmem:[#allocation4 + $0x50] sm:$0xff] }
 0x3e7   :  { %1813 = vadd.xlane.f32.xlu2 %v1812_v8  ;;  %v1659_v58 = vadd.f32 %v1658_v36, %v3960_v34 }
 0x3e8   :  { %v1693_v50 = vpop.f32.mrf.mxu1  ;;  %v3972_v17 = vadd.f32 %v2984_v23, %v1776_v26 }
 0x3e9   :  { %v1694_v13 = vadd.f32 %v1693_v50, %v1653_v27 }
 0x3eb   :  { %v3974_v24 = vadd.f32 %v2985_v2, %v1694_v13 }
 0x3ec   :  { %v1740_v53 = vpop.f32.mrf.mxu2 }
 0x3ed   :  { %v1778_v33 = vpop.f32.mrf.mxu3  ;;  %v1815_v14 = vadd.f32 %v3972_v17, %v3974_v24  ;;  %v1741_v52 = vadd.f32 %v1740_v53, %v3958_v20 }
 0x3ee   :  { %v1779_v25 = vadd.f32 %v1778_v33, %v1738_v21  ;;  %v1661_v44 = vpop.f32.mrf.mxu0  ;;  %v2994_v21 = vld [vmem:[#allocation4 + $0x68] sm:$0xff] }
 0x3ef   :  { %1816 = vadd.xlane.f32.xlu0 %v1815_v14  ;;  %v1662_v10 = vadd.f32 %v1661_v44, %v3960_v34  ;;  %v2995_v14 = vld [vmem:[#allocation4 + $0x60] sm:$0xff] }
 0x3f0   :  { %v1696_v1 = vpop.f32.mrf.mxu1  ;;  %v3980_v29 = vadd.f32 %v2986_v55, %v1779_v25  ;;  %v3344_v25 = vmov 256.0  }
 0x3f1   :  { %v1697_v4 = vadd.f32 %v1696_v1, %v1656_v40  ;;  %2948 = vrcp.f32 %v3344_v25 }
 0x3f3   :  { %v3982_v39 = vadd.f32 %v2987_v54, %v1697_v4 }
 0x3f4   :  { %v1743_v35 = vpop.f32.mrf.mxu2 }
 0x3f5   :  { %v1781_v28 = vpop.f32.mrf.mxu3  ;;  %v1818_v41 = vadd.f32 %v3980_v29, %v3982_v39  ;;  %v1744_v18 = vadd.f32 %v1743_v35, %v3958_v20 }
 0x3f6   :  { %v1782_v62 = vadd.f32 %v1781_v28, %v1741_v52  ;;  %v1664_v63 = vpop.f32.mrf.mxu0 }
 0x3f7   :  { %1819 = vadd.xlane.f32.xlu1 %v1818_v41  ;;  %v1665_v12 = vadd.f32 %v1664_v63, %v3960_v34  ;;  %v2949_v1 = vpop.eup %2948 }
 0x3f8   :  { %v1699_v45 = vpop.f32.mrf.mxu1  ;;  %v3988_v47 = vadd.f32 %v2988_v43, %v1782_v62  ;;  %v1837_v4 = vmul.f32 256.0, %v2949_v1  ;;  %vm1841_vm5 = vweird.f32 %v2949_v1 }
 0x3f9   :  { %v1700_v46 = vadd.f32 %v1699_v45, %v1659_v58 }
 0x3fa   :  { %v1838_v55 = vsub.f32 1.0, %v1837_v4 }
 0x3fb   :  { %v3990_v7 = vadd.f32 %v2989_v42, %v1700_v46 }
 0x3fc   :  { %v1746_v11 = vpop.f32.mrf.mxu2  ;;  %v1839_v54 = vmul.f32 %v2949_v1, %v1838_v55 }
 0x3fd   :  { %v1784_v37 = vpop.f32.mrf.mxu3  ;;  %v1821_v6 = vadd.f32 %v3988_v47, %v3990_v7  ;;  %v1747_v0 = vadd.f32 %v1746_v11, %v3958_v20  ;;  %v2996_v11 = vld [vmem:[#allocation4 + $0x70] sm:$0xff] }
 0x3fe   :  { %v1785_v60 = vadd.f32 %v1784_v37, %v1744_v18  ;;  %v1667_v8 = vpop.f32.mrf.mxu0  ;;  %v1840_v52 = vadd.f32 %v2949_v1, %v1839_v54 }
 0x3ff   :  { %1822 = vadd.xlane.f32.xlu2 %v1821_v6  ;;  %v1668_v13 = vadd.f32 %v1667_v8, %v3960_v34  ;;  %v2093_v8 = vld [vmem:[#allocation13 + $0xf0] sm:$0xff] }
 0x400   :  { %v1702_v32 = vpop.f32.mrf.mxu1  ;;  %v3996_v57 = vadd.f32 %v2990_v15, %v1785_v60  ;;  %v4018_v41 = vsel %vm1841_vm5, %v2949_v1, %v1840_v52  ;;  %2133 = vmatpush.msra.mxu0 %v2093_v8  ;;  %v2111_v8 = vld [vmem:[#allocation13 + $0x180] sm:$0xff] }
 0x401   :  { %v1703_v48 = vadd.f32 %v1702_v32, %v1662_v10 }
 0x403   :  { %v3998_v3 = vadd.f32 %v2991_v59, %v1703_v48  ;;  %v2997_v48 = vld [vmem:[#allocation4 + $0x78] sm:$0xff] }
 0x404   :  { %v1749_v38 = vpop.f32.mrf.mxu2 }
 0x405   :  { %v1787_v22 = vpop.f32.mrf.mxu3  ;;  %v1824_v61 = vadd.f32 %v3996_v57, %v3998_v3  ;;  %v1750_v27 = vadd.f32 %v1749_v38, %v3958_v20 }
 0x406   :  { %v1788_v5 = vadd.f32 %v1787_v22, %v1747_v0 }
 0x407   :  { %1825 = vadd.xlane.f32.xlu0 %v1824_v61 }
 0x408   :  { %v1705_v19 = vpop.f32.mrf.mxu1  ;;  %v4004_v16 = vadd.f32 %v2992_v56, %v1788_v5 }
 0x409   :  { %v1706_v9 = vadd.f32 %v1705_v19, %v1665_v12 }
 0x40b   :  { %v4006_v51 = vadd.f32 %v2993_v49, %v1706_v9 }
 0x40d   :  { %v1790_v26 = vpop.f32.mrf.mxu3  ;;  %v1827_v50 = vadd.f32 %v4004_v16, %v4006_v51 }
 0x40e   :  { %v1791_v23 = vadd.f32 %v1790_v26, %v1750_v27  ;;  %v2125_v27 = vld [vmem:[#allocation13 + $0x1f0] sm:$0xff]  ;;  %v2094_v26 = vld [vmem:[#allocation13 + $0xf8] sm:$0xff] }
 0x40f   :  { %1828 = vadd.xlane.f32.xlu1 %v1827_v50  ;;  %2174 = vmatpush.msra.mxu1 %v2125_v27  ;;  %v2091_v50 = vld [vmem:[#allocation13 + $0xe0] sm:$0xff]  ;;  %v2080_v27 = vld [vmem:[#allocation13 + $0x88] sm:$0xff] }
 0x410   :  { %v1708_v2 = vpop.f32.mrf.mxu1  ;;  %v4012_v33 = vadd.f32 %v2994_v21, %v1791_v23  ;;  %2215 = vmatpush.msra.mxu2 %v2094_v26  ;;  %2134 = vmatpush.msra.mxu0 %v2091_v50  ;;  %v2112_v26 = vld [vmem:[#allocation13 + $0x188] sm:$0xff]  ;;  %v2109_v50 = vld [vmem:[#allocation13 + $0x170] sm:$0xff] }
 0x411   :  { %v1709_v53 = vadd.f32 %v1708_v2, %v1668_v13  ;;  %v2092_v2 = vld [vmem:[#allocation13 + $0xe8] sm:$0xff] }
 0x412   :  { %2216 = vmatpush.msra.mxu2 %v2092_v2  ;;  %v2110_v2 = vld [vmem:[#allocation13 + $0x178] sm:$0xff] }
 0x413   :  { %v4014_v36 = vadd.f32 %v2995_v14, %v1709_v53  ;;  %v2124_v53 = vld [vmem:[#allocation13 + $0x1e8] sm:$0xff] }
 0x415   :  { %v1830_v40 = vadd.f32 %v4012_v33, %v4014_v36 }
 0x417   :  { %1831 = vadd.xlane.f32.xlu2 %v1830_v40 }
 0x453   :  { %v1711_v44 = vpop.f32.mrf.mxu1 }
 0x456   :  { %v1670_v28 = vpop.f32.mrf.mxu0 }
 0x457   :  { %v1671_v35 = vadd.f32 %v1670_v28, %v3960_v34 }
 0x459   :  { %v1712_v46 = vadd.f32 %v1711_v44, %v1671_v35  ;;  %v1793_v37 = vpop.f32.mrf.mxu3 }
 0x45a   :  { %v1814_v58 = vpop.xlane.xlu2 %1813 }
 0x45b   :  { %v1843_v62 = vmul.f32 %v4018_v41, %v1814_v58  ;;  %v4033_v32 = vadd.f32 %v2996_v11, %v1712_v46  ;;  %v2119_v11 = vld [vmem:[#allocation13 + $0x1c0] sm:$0xff] }
 0x45c   :  { %v1752_v45 = vpop.f32.mrf.mxu2 }
 0x45d   :  { %v4023_v43 = vsub.f32 %v3966_v31, %v1843_v62  ;;  %v4026_v42 = vsub.f32 %v3964_v30, %v1843_v62  ;;  %v1753_v18 = vadd.f32 %v1752_v45, %v3958_v20 }
 0x45f   :  { %v1794_v6 = vadd.f32 %v1793_v37, %v1753_v18  ;;  %v1867_v10 = vmul.f32 %v4023_v43, %v4023_v43  ;;  %v1868_v34 = vmul.f32 %v4026_v42, %v4026_v42 }
 0x461   :  { %v1883_v60 = vadd.f32 %v1868_v34, %v1867_v10  ;;  %v4035_v31 = vadd.f32 %v2997_v48, %v1794_v6  ;;  %v2089_v6 = vld [vmem:[#allocation13 + $0xd0] sm:$0xff]  ;;  %v2090_v34 = vld [vmem:[#allocation13 + $0xd8] sm:$0xff]  ;;  %v2120_v48 = vld [vmem:[#allocation13 + $0x1c8] sm:$0xff] }
 0x462   :  { %v1817_v63 = vpop.xlane.xlu0 %1816  ;;  %v2121_v10 = vld [vmem:[#allocation13 + $0x1d0] sm:$0xff]  ;;  %2135 = vmatpush.msra.mxu0 %v2089_v6  ;;  %2217 = vmatpush.msra.mxu2 %v2090_v34  ;;  %v2100_v6 = vld [vmem:[#allocation13 + $0x128] sm:$0xff] }
 0x463   :  { %v1844_v30 = vmul.f32 %v4018_v41, %v1817_v63  ;;  %1884 = vadd.xlane.f32.xlu0 %v1883_v60  ;;  %v1833_v20 = vadd.f32 %v4035_v31, %v4033_v32  ;;  %v2122_v60 = vld [vmem:[#allocation13 + $0x1d8] sm:$0xff]  ;;  %v2085_v63 = vld [vmem:[#allocation13 + $0xb0] sm:$0xff] }
 0x464   :  { %v2097_v34 = vld [vmem:[#allocation13 + $0x110] sm:$0xff] }
 0x465   :  { %v4041_v15 = vsub.f32 %v3974_v24, %v1844_v30  ;;  %v4044_v59 = vsub.f32 %v3972_v17, %v1844_v30  ;;  %1834 = vadd.xlane.f32.xlu1 %v1833_v20  ;;  %v2117_v30 = vld [vmem:[#allocation13 + $0x1b0] sm:$0xff]  ;;  %v2086_v20 = vld [vmem:[#allocation13 + $0xb8] sm:$0xff] }
 0x467   :  { %v1869_v0 = vmul.f32 %v4041_v15, %v4041_v15  ;;  %v1870_v22 = vmul.f32 %v4044_v59, %v4044_v59 }
 0x469   :  { %v1886_v61 = vadd.f32 %v1870_v22, %v1869_v0  ;;  %v2118_v0 = vld [vmem:[#allocation13 + $0x1b8] sm:$0xff]  ;;  %v2083_v22 = vld [vmem:[#allocation13 + $0xa0] sm:$0xff] }
 0x46a   :  { %v1820_v12 = vpop.xlane.xlu1 %1819 }
 0x46b   :  { %v1845_v5 = vmul.f32 %v4018_v41, %v1820_v12  ;;  %1887 = vadd.xlane.f32.xlu2 %v1886_v61  ;;  %v2115_v61 = vld [vmem:[#allocation13 + $0x1a0] sm:$0xff]  ;;  %v2084_v12 = vld [vmem:[#allocation13 + $0xa8] sm:$0xff] }
 0x46d   :  { %v4052_v19 = vsub.f32 %v3982_v39, %v1845_v5  ;;  %v4055_v24 = vsub.f32 %v3980_v29, %v1845_v5  ;;  %v2126_v39 = vld [vmem:[#allocation13 + $0x1f8] sm:$0xff]  ;;  %v2123_v29 = vld [vmem:[#allocation13 + $0x1e0] sm:$0xff]  ;;  %v2116_v5 = vld [vmem:[#allocation13 + $0x1a8] sm:$0xff] }
 0x46e   :  { %2256 = vmatpush.msra.mxu3 %v2126_v39  ;;  %2175 = vmatpush.msra.mxu1 %v2123_v29  ;;  %v2077_v39 = vld [vmem:[#allocation13 + $0x70] sm:$0xff]  ;;  %v2078_v29 = vld [vmem:[#allocation13 + $0x78] sm:$0xff] }
 0x46f   :  { %v1871_v17 = vmul.f32 %v4052_v19, %v4052_v19  ;;  %v1872_v9 = vmul.f32 %v4055_v24, %v4055_v24 }
 0x470   :  { %2257 = vmatpush.msra.mxu3 %v2124_v53  ;;  %2176 = vmatpush.msra.mxu1 %v2121_v10  ;;  %v2075_v53 = vld [vmem:[#allocation13 + $0x60] sm:$0xff]  ;;  %v2065_v10 = vld [vmem:[#allocation13 + $0x10] sm:$0xff] }
 0x471   :  { %v1889_v38 = vadd.f32 %v1872_v9, %v1871_v17  ;;  %v2081_v17 = vld [vmem:[#allocation13 + $0x90] sm:$0xff] }
 0x472   :  { %v1823_v56 = vpop.xlane.xlu2 %1822  ;;  %2258 = vmatpush.msra.mxu3 %v2122_v60  ;;  %2177 = vmatpush.msra.mxu1 %v2119_v11  ;;  %v2113_v9 = vld [vmem:[#allocation13 + $0x190] sm:$0xff]  ;;  %v2066_v60 = vld [vmem:[#allocation13 + $0x18] sm:$0xff]  ;;  %v2063_v11 = vld [vmem:[#allocation13] sm:$0xff] }
 0x473   :  { %v1846_v49 = vmul.f32 %v4018_v41, %v1823_v56  ;;  %1890 = vadd.xlane.f32.xlu0 %v1889_v38  ;;  %v2082_v38 = vld [vmem:[#allocation13 + $0x98] sm:$0xff] }
 0x474   :  { %2259 = vmatpush.msra.mxu3 %v2120_v48  ;;  %2178 = vmatpush.msra.mxu1 %v2117_v30  ;;  %v2114_v56 = vld [vmem:[#allocation13 + $0x198] sm:$0xff]  ;;  %v2064_v48 = vld [vmem:[#allocation13 + $0x8] sm:$0xff] }
 0x475   :  { %v4063_v13 = vsub.f32 %v3990_v7, %v1846_v49  ;;  %v4066_v23 = vsub.f32 %v3988_v47, %v1846_v49  ;;  %v2079_v49 = vld [vmem:[#allocation13 + $0x80] sm:$0xff] }
 0x476   :  { %2260 = vmatpush.msra.mxu3 %v2118_v0  ;;  %2179 = vmatpush.msra.mxu1 %v2115_v61 }
 0x477   :  { %v1873_v21 = vmul.f32 %v4063_v13, %v4063_v13  ;;  %v1874_v14 = vmul.f32 %v4066_v23, %v4066_v23 }
 0x478   :  { %2261 = vmatpush.msra.mxu3 %v2116_v5  ;;  %2180 = vmatpush.msra.mxu1 %v2113_v9 }
 0x479   :  { %v1892_v40 = vadd.f32 %v1874_v14, %v1873_v21  ;;  %v2107_v21 = vld [vmem:[#allocation13 + $0x160] sm:$0xff]  ;;  %v2076_v14 = vld [vmem:[#allocation13 + $0x68] sm:$0xff] }
 0x47a   :  { %v1826_v7 = vpop.xlane.xlu0 %1825  ;;  %2262 = vmatpush.msra.mxu3 %v2114_v56  ;;  %2181 = vmatpush.msra.mxu1 %v2111_v8 }
 0x47b   :  { %v1847_v25 = vmul.f32 %v4018_v41, %v1826_v7  ;;  %1893 = vadd.xlane.f32.xlu1 %v1892_v40  ;;  %v2108_v40 = vld [vmem:[#allocation13 + $0x168] sm:$0xff]  ;;  %v2073_v7 = vld [vmem:[#allocation13 + $0x50] sm:$0xff] }
 0x47c   :  { %2263 = vmatpush.msra.mxu3 %v2112_v26  ;;  %2182 = vmatpush.msra.mxu1 %v2109_v50 }
 0x47d   :  { %v4074_v47 = vsub.f32 %v3998_v3, %v1847_v25  ;;  %v4077_v1 = vsub.f32 %v3996_v57, %v1847_v25  ;;  %v2105_v25 = vld [vmem:[#allocation13 + $0x150] sm:$0xff] }
 0x47e   :  { %2264 = vmatpush.msra.mxu3 %v2110_v2  ;;  %2183 = vmatpush.msra.mxu1 %v2107_v21 }
 0x47f   :  { %v1875_v4 = vmul.f32 %v4074_v47, %v4074_v47  ;;  %v1876_v55 = vmul.f32 %v4077_v1, %v4077_v1 }
 0x480   :  { %2265 = vmatpush.msra.mxu3 %v2108_v40  ;;  %2184 = vmatpush.msra.mxu1 %v2105_v25 }
 0x481   :  { %v1895_v54 = vadd.f32 %v1876_v55, %v1875_v4  ;;  %v2074_v4 = vld [vmem:[#allocation13 + $0x58] sm:$0xff] }
 0x482   :  { %v1829_v52 = vpop.xlane.xlu1 %1828  ;;  %v2106_v55 = vld [vmem:[#allocation13 + $0x158] sm:$0xff] }
 0x483   :  { %v1848_v28 = vmul.f32 %v4018_v41, %v1829_v52  ;;  %1896 = vadd.xlane.f32.xlu2 %v1895_v54  ;;  %2266 = vmatpush.msra.mxu3 %v2106_v55  ;;  %v2071_v54 = vld [vmem:[#allocation13 + $0x40] sm:$0xff] }
 0x484   :  { %v2103_v52 = vld [vmem:[#allocation13 + $0x140] sm:$0xff] }
 0x485   :  { %v4085_v35 = vsub.f32 %v4006_v51, %v1848_v28  ;;  %v4088_v3 = vsub.f32 %v4004_v16, %v1848_v28  ;;  %v2072_v28 = vld [vmem:[#allocation13 + $0x48] sm:$0xff]  ;;  %2185 = vmatpush.msra.mxu1 %v2103_v52 }
 0x487   :  { %v1877_v57 = vmul.f32 %v4085_v35, %v4085_v35  ;;  %v1878_v58 = vmul.f32 %v4088_v3, %v4088_v3 }
 0x489   :  { %v1898_v62 = vadd.f32 %v1878_v58, %v1877_v57  ;;  %v2104_v57 = vld [vmem:[#allocation13 + $0x148] sm:$0xff]  ;;  %v2069_v58 = vld [vmem:[#allocation13 + $0x30] sm:$0xff] }
 0x48a   :  { %v1832_v44 = vpop.xlane.xlu2 %1831  ;;  %2267 = vmatpush.msra.mxu3 %v2104_v57 }
 0x48b   :  { %v1849_v45 = vmul.f32 %v4018_v41, %v1832_v44  ;;  %1899 = vadd.xlane.f32.xlu0 %v1898_v62  ;;  %v2101_v62 = vld [vmem:[#allocation13 + $0x130] sm:$0xff]  ;;  %v2070_v44 = vld [vmem:[#allocation13 + $0x38] sm:$0xff] }
 0x48c   :  { %2186 = vmatpush.msra.mxu1 %v2101_v62 }
 0x48d   :  { %v4096_v46 = vsub.f32 %v4014_v36, %v1849_v45  ;;  %v4099_v51 = vsub.f32 %v4012_v33, %v1849_v45  ;;  %v2087_v36 = vld [vmem:[#allocation13 + $0xc0] sm:$0xff]  ;;  %v2088_v33 = vld [vmem:[#allocation13 + $0xc8] sm:$0xff]  ;;  %v2102_v45 = vld [vmem:[#allocation13 + $0x138] sm:$0xff] }
 0x48e   :  { %2136 = vmatpush.msra.mxu0 %v2087_v36  ;;  %2218 = vmatpush.msra.mxu2 %v2088_v33  ;;  %v2098_v36 = vld [vmem:[#allocation13 + $0x118] sm:$0xff]  ;;  %v2095_v33 = vld [vmem:[#allocation13 + $0x100] sm:$0xff] }
 0x48f   :  { %v1879_v16 = vmul.f32 %v4096_v46, %v4096_v46  ;;  %v1880_v18 = vmul.f32 %v4099_v51, %v4099_v51  ;;  %2268 = vmatpush.msra.mxu3 %v2102_v45 }
 0x490   :  { %2137 = vmatpush.msra.mxu0 %v2085_v63  ;;  %2219 = vmatpush.msra.mxu2 %v2086_v20  ;;  %v2096_v63 = vld [vmem:[#allocation13 + $0x108] sm:$0xff] }
 0x491   :  { %v1901_v37 = vadd.f32 %v1880_v18, %v1879_v16  ;;  %v2067_v16 = vld [vmem:[#allocation13 + $0x20] sm:$0xff]  ;;  %2269 = vmatpush.msra.mxu3 %v2100_v6 }
 0x492   :  { %2138 = vmatpush.msra.mxu0 %v2083_v22  ;;  %2220 = vmatpush.msra.mxu2 %v2084_v12  ;;  %v2099_v18 = vld [vmem:[#allocation13 + $0x120] sm:$0xff] }
 0x493   :  { %1902 = vadd.xlane.f32.xlu1 %v1901_v37  ;;  %v2068_v37 = vld [vmem:[#allocation13 + $0x28] sm:$0xff]  ;;  %2187 = vmatpush.msra.mxu1 %v2099_v18 }
 0x494   :  { %2139 = vmatpush.msra.mxu0 %v2081_v17  ;;  %2221 = vmatpush.msra.mxu2 %v2082_v38 }
 0x495   :  { %2188 = vmatpush.msra.mxu1 %v2097_v34  ;;  %2270 = vmatpush.msra.mxu3 %v2098_v36 }
 0x496   :  { %2140 = vmatpush.msra.mxu0 %v2079_v49  ;;  %2222 = vmatpush.msra.mxu2 %v2080_v27 }
 0x497   :  { %2189 = vmatpush.msra.mxu1 %v2095_v33  ;;  %2271 = vmatpush.msra.mxu3 %v2096_v63 }
 0x498   :  { %2141 = vmatpush.msra.mxu0 %v2077_v39  ;;  %2223 = vmatpush.msra.mxu2 %v2078_v29  ;;  %v2019_v29 = vld [vmem:[%s4511_s10] sm:$0x3]  ;;  %s3345_s10 = smov [#allocation24]  }
 0x499   :  { %v4122_v25 = vperm.slane %v2019_v29, 0  ;;  %s2827_s17 = sshll.u32 %s3345_s10, 4  ;;  %s2828_s17 = int_to_ptr.vmem [resolvable:$true] %s2827_s17 }
 0x49a   :  { %2142 = vmatpush.msra.mxu0 %v2075_v53  ;;  %2224 = vmatpush.msra.mxu2 %v2076_v14 }
 0x49c   :  { %2143 = vmatpush.msra.mxu0 %v2073_v7  ;;  %2225 = vmatpush.msra.mxu2 %v2074_v4  ;;  %v2041_v7 = vld [vmem:[#allocation19] sm:$0x3]  ;;  %v4124_v4 = vperm.slane %v2019_v29, 1 }
 0x49d   :  { %v4128_v57 = vperm.slane %v2041_v7, 0 }
 0x49e   :  { %2144 = vmatpush.msra.mxu0 %v2071_v54  ;;  %2226 = vmatpush.msra.mxu2 %v2072_v28 }
 0x4a0   :  { %2145 = vmatpush.msra.mxu0 %v2069_v58  ;;  %2227 = vmatpush.msra.mxu2 %v2070_v44  ;;  %v4130_v58 = vperm.slane %v2041_v7, 1 }
 0x4a2   :  { %2146 = vmatpush.msra.mxu0 %v2067_v16  ;;  %2228 = vmatpush.msra.mxu2 %v2068_v37 }
 0x4a4   :  { %2147 = vmatpush.msra.mxu0 %v2065_v10  ;;  %2229 = vmatpush.msra.mxu2 %v2066_v60 }
 0x4a6   :  { %2148 = vmatpush.msra.mxu0 %v2063_v11  ;;  %2230 = vmatpush.msra.mxu2 %v2064_v48 }
 0x4d6   :  { %v1885_v30 = vpop.xlane.xlu0 %1884 }
 0x4d7   :  { %v1907_v20 = vmul.f32 %v1885_v30, %v4018_v41 }
 0x4d8   :  { %v1835_v0 = vpop.xlane.xlu1 %1834 }
 0x4d9   :  { %v1915_v22 = vadd.f32 1e-05, %v1907_v20  ;;  %v1850_v61 = vmul.f32 %v4018_v41, %v1835_v0 }
 0x4db   :  { %2950 = vrsqrt.f32 %v1915_v22  ;;  %v4108_v12 = vsub.f32 %v4033_v32, %v1850_v61  ;;  %v4111_v5 = vsub.f32 %v4035_v31, %v1850_v61  ;;  %vm1929_vm7 = vweird.f32 %v1915_v22 }
 0x4dd   :  { %v1881_v17 = vmul.f32 %v4108_v12, %v4108_v12  ;;  %v1882_v9 = vmul.f32 %v4111_v5, %v4111_v5 }
 0x4de   :  { %v1888_v38 = vpop.xlane.xlu2 %1887 }
 0x4df   :  { %v1908_v56 = vmul.f32 %v1888_v38, %v4018_v41  ;;  %v1904_v49 = vadd.f32 %v1882_v9, %v1881_v17 }
 0x4e1   :  { %v2951_v8 = vpop.eup %2950  ;;  %v1916_v27 = vadd.f32 1e-05, %v1908_v56  ;;  %1905 = vadd.xlane.f32.xlu2 %v1904_v49 }
 0x4e2   :  { %v1924_v26 = vmul.f32 %v2951_v8, %v1915_v22  ;;  %vm1930_vm6 = vweird.f32 %v2951_v8 }
 0x4e3   :  { %2952 = vrsqrt.f32 %v1916_v27  ;;  %vm1931_vm8 = vmor %vm1929_vm7, %vm1930_vm6  ;;  %vm1939_vm10 = vweird.f32 %v1916_v27 }
 0x4e4   :  { %v1925_v32 = vmul.f32 %v2951_v8, %v1924_v26 }
 0x4e6   :  { %v1926_v39 = vmul.f32 0.5, %v1925_v32  ;;  %v1891_v50 = vpop.xlane.xlu0 %1890 }
 0x4e7   :  { %v1909_v31 = vmul.f32 %v1891_v50, %v4018_v41 }
 0x4e8   :  { %v1927_v2 = vsub.f32 1.5, %v1926_v39 }
 0x4e9   :  { %v2953_v53 = vpop.eup %2952  ;;  %v1917_v21 = vadd.f32 1e-05, %v1909_v31 }
 0x4ea   :  { %v1928_v14 = vmul.f32 %v2951_v8, %v1927_v2  ;;  %v1934_v40 = vmul.f32 %v2953_v53, %v1916_v27  ;;  %vm1940_vm9 = vweird.f32 %v2953_v53 }
 0x4eb   :  { %2954 = vrsqrt.f32 %v1917_v21  ;;  %vm1941_vm11 = vmor %vm1939_vm10, %vm1940_vm9  ;;  %vm1949_vm13 = vweird.f32 %v1917_v21 }
 0x4ec   :  { %v1932_v55 = vsel %vm1931_vm8, %v2951_v8, %v1928_v14  ;;  %v1935_v54 = vmul.f32 %v2953_v53, %v1934_v40 }
 0x4ed   :  { %v2003_v52 = vmul.f32 %v1932_v55, %v4023_v43  ;;  %v2004_v28 = vmul.f32 %v1932_v55, %v4026_v42 }
 0x4ee   :  { %v1936_v62 = vmul.f32 0.5, %v1935_v54  ;;  %v1894_v44 = vpop.xlane.xlu1 %1893 }
 0x4ef   :  { %v2025_v45 = vmul.f32 %v4122_v25, %v2003_v52  ;;  %v2026_v16 = vmul.f32 %v4124_v4, %v2004_v28  ;;  %v1910_v18 = vmul.f32 %v1894_v44, %v4018_v41 }
 0x4f0   :  { %v1937_v37 = vsub.f32 1.5, %v1936_v62 }
 0x4f1   :  { %v2955_v6 = vpop.eup %2954  ;;  %v1918_v10 = vadd.f32 1e-05, %v1910_v18  ;;  %v4136_v43 = vadd.f32 %v4128_v57, %v2025_v45  ;;  %v4139_v42 = vadd.f32 %v4130_v58, %v2026_v16 }
 0x4f2   :  { %v1938_v34 = vmul.f32 %v2953_v53, %v1937_v37  ;;  %v1944_v60 = vmul.f32 %v2955_v6, %v1917_v21  ;;  %vm1950_vm12 = vweird.f32 %v2955_v6 }
 0x4f3   :  { %2956 = vrsqrt.f32 %v1918_v10  ;;  %2149 = vmatmul.f32.vlgmr.msra.gmra.mxu0 %v4136_v43  ;;  %2190 = vmatmul.f32.vlgmr.msra.gmra.mxu1 %v4139_v42  ;;  %vm1951_vm14 = vmor %vm1949_vm13, %vm1950_vm12  ;;  %vm1959_vm0 = vweird.f32 %v1918_v10 }
 0x4f4   :  { %v1942_v36 = vsel %vm1941_vm11, %v2953_v53, %v1938_v34  ;;  %v1945_v11 = vmul.f32 %v2955_v6, %v1944_v60  ;;  %2231 = vmatmul.f32.vlgmr.msra.gmra.mxu2 %v4136_v43  ;;  %2272 = vmatmul.f32.vlgmr.msra.gmra.mxu3 %v4139_v42 }
 0x4f5   :  { %v2005_v33 = vmul.f32 %v1942_v36, %v4041_v15  ;;  %v2006_v48 = vmul.f32 %v1942_v36, %v4044_v59 }
 0x4f6   :  { %v1946_v63 = vmul.f32 0.5, %v1945_v11  ;;  %v1897_v30 = vpop.xlane.xlu2 %1896 }
 0x4f7   :  { %v1911_v20 = vmul.f32 %v1897_v30, %v4018_v41  ;;  %v2027_v0 = vmul.f32 %v4122_v25, %v2005_v33  ;;  %v2028_v22 = vmul.f32 %v4124_v4, %v2006_v48 }
 0x4f8   :  { %v1947_v61 = vsub.f32 1.5, %v1946_v63 }
 0x4f9   :  { %v2957_v17 = vpop.eup %2956  ;;  %v1919_v9 = vadd.f32 1e-05, %v1911_v20  ;;  %v4151_v38 = vadd.f32 %v4128_v57, %v2027_v0  ;;  %v4154_v56 = vadd.f32 %v4130_v58, %v2028_v22 }
 0x4fa   :  { %v1948_v15 = vmul.f32 %v2955_v6, %v1947_v61  ;;  %v1954_v59 = vmul.f32 %v2957_v17, %v1918_v10  ;;  %vm1960_vm15 = vweird.f32 %v2957_v17 }
 0x4fb   :  { %2958 = vrsqrt.f32 %v1919_v9  ;;  %2152 = vmatmul.f32.gmra.mxu0 %v4151_v38  ;;  %2193 = vmatmul.f32.gmra.mxu1 %v4154_v56  ;;  %vm1961_vm1 = vmor %vm1959_vm0, %vm1960_vm15  ;;  %vm1969_vm3 = vweird.f32 %v1919_v9 }
 0x4fc   :  { %v1952_v49 = vsel %vm1951_vm14, %v2955_v6, %v1948_v15  ;;  %v1955_v8 = vmul.f32 %v2957_v17, %v1954_v59  ;;  %2234 = vmatmul.f32.gmra.mxu2 %v4151_v38  ;;  %2275 = vmatmul.f32.gmra.mxu3 %v4154_v56 }
 0x4fd   :  { %v2007_v27 = vmul.f32 %v1952_v49, %v4052_v19  ;;  %v2008_v26 = vmul.f32 %v1952_v49, %v4055_v24 }
 0x4fe   :  { %v1956_v32 = vmul.f32 0.5, %v1955_v8  ;;  %v1900_v39 = vpop.xlane.xlu0 %1899 }
 0x4ff   :  { %v1912_v50 = vmul.f32 %v1900_v39, %v4018_v41  ;;  %v2029_v31 = vmul.f32 %v4122_v25, %v2007_v27  ;;  %v2030_v29 = vmul.f32 %v4124_v4, %v2008_v26 }
 0x500   :  { %v1957_v2 = vsub.f32 1.5, %v1956_v32 }
 0x501   :  { %v2959_v53 = vpop.eup %2958  ;;  %v1920_v21 = vadd.f32 1e-05, %v1912_v50  ;;  %v4166_v14 = vadd.f32 %v4128_v57, %v2029_v31  ;;  %v4169_v40 = vadd.f32 %v4130_v58, %v2030_v29 }
 0x502   :  { %v1958_v19 = vmul.f32 %v2957_v17, %v1957_v2  ;;  %v1964_v24 = vmul.f32 %v2959_v53, %v1919_v9  ;;  %vm1970_vm2 = vweird.f32 %v2959_v53 }
 0x503   :  { %2960 = vrsqrt.f32 %v1920_v21  ;;  %2155 = vmatmul.f32.gmra.mxu0 %v4166_v14  ;;  %2196 = vmatmul.f32.gmra.mxu1 %v4169_v40  ;;  %vm1971_vm4 = vmor %vm1969_vm3, %vm1970_vm2  ;;  %vm1979_vm6 = vweird.f32 %v1920_v21 }
 0x504   :  { %v1962_v7 = vsel %vm1961_vm1, %v2957_v17, %v1958_v19  ;;  %v1965_v55 = vmul.f32 %v2959_v53, %v1964_v24  ;;  %2237 = vmatmul.f32.gmra.mxu2 %v4166_v14  ;;  %2278 = vmatmul.f32.gmra.mxu3 %v4169_v40  ;;  %v2341_v19 = vld [vmem:[#allocation16 + $0xe0] sm:$0xff]  ;;  %v2342_v24 = vld [vmem:[#allocation16 + $0xe8] sm:$0xff] }
 0x505   :  { %v2009_v54 = vmul.f32 %v1962_v7, %v4063_v13  ;;  %v2010_v52 = vmul.f32 %v1962_v7, %v4066_v23  ;;  %v2339_v7 = vld [vmem:[#allocation16 + $0xd0] sm:$0xff] }
 0x506   :  { %v1966_v28 = vmul.f32 0.5, %v1965_v55  ;;  %v1903_v62 = vpop.xlane.xlu1 %1902  ;;  %v2375_v55 = vld [vmem:[#allocation16 + $0x1f0] sm:$0xff] }
 0x507   :  { %v1913_v44 = vmul.f32 %v1903_v62, %v4018_v41  ;;  %v2031_v45 = vmul.f32 %v4122_v25, %v2009_v54  ;;  %v2032_v16 = vmul.f32 %v4124_v4, %v2010_v52  ;;  %v2340_v54 = vld [vmem:[#allocation16 + $0xd8] sm:$0xff]  ;;  %2424 = vmatpush.msrb.mxu1 %v2375_v55  ;;  %v2373_v62 = vld [vmem:[#allocation16 + $0x1e0] sm:$0xff] }
 0x508   :  { %v1967_v18 = vsub.f32 1.5, %v1966_v28  ;;  %v2376_v52 = vld [vmem:[#allocation16 + $0x1f8] sm:$0xff]  ;;  %v2337_v28 = vld [vmem:[#allocation16 + $0xc0] sm:$0xff] }
 0x509   :  { %v2961_v37 = vpop.eup %2960  ;;  %v1921_v6 = vadd.f32 1e-05, %v1913_v44  ;;  %v4181_v10 = vadd.f32 %v4128_v57, %v2031_v45  ;;  %v4184_v34 = vadd.f32 %v4130_v58, %v2032_v16  ;;  %2506 = vmatpush.msrb.mxu3 %v2376_v52  ;;  %v2338_v44 = vld [vmem:[#allocation16 + $0xc8] sm:$0xff]  ;;  %2425 = vmatpush.msrb.mxu1 %v2373_v62  ;;  %v2335_v16 = vld [vmem:[#allocation16 + $0xb0] sm:$0xff]  ;;  %v2356_v55 = vld [vmem:[#allocation16 + $0x158] sm:$0xff] }
 0x50a   :  { %v1968_v13 = vmul.f32 %v2959_v53, %v1967_v18  ;;  %v1974_v23 = vmul.f32 %v2961_v37, %v1920_v21  ;;  %vm1980_vm5 = vweird.f32 %v2961_v37  ;;  %v2374_v45 = vld [vmem:[#allocation16 + $0x1e8] sm:$0xff]  ;;  %v2371_v18 = vld [vmem:[#allocation16 + $0x1d0] sm:$0xff]  ;;  %v2317_v52 = vld [vmem:[#allocation16 + $0x20] sm:$0xff] }
 0x50b   :  { %2962 = vrsqrt.f32 %v1921_v6  ;;  %2158 = vmatmul.f32.gmra.mxu0 %v4181_v10  ;;  %2199 = vmatmul.f32.gmra.mxu1 %v4184_v34  ;;  %vm1981_vm7 = vmor %vm1979_vm6, %vm1980_vm5  ;;  %vm1989_vm9 = vweird.f32 %v1921_v6  ;;  %v2318_v62 = vld [vmem:[#allocation16 + $0x28] sm:$0xff] }
 0x50c   :  { %v1972_v60 = vsel %vm1971_vm4, %v2959_v53, %v1968_v13  ;;  %v1975_v36 = vmul.f32 %v2961_v37, %v1974_v23  ;;  %2240 = vmatmul.f32.gmra.mxu2 %v4181_v10  ;;  %2281 = vmatmul.f32.gmra.mxu3 %v4184_v34  ;;  %v2333_v13 = vld [vmem:[#allocation16 + $0xa0] sm:$0xff] }
 0x50d   :  { %v2011_v11 = vmul.f32 %v1972_v60, %v4074_v47  ;;  %v2012_v33 = vmul.f32 %v1972_v60, %v4077_v1  ;;  %2507 = vmatpush.msrb.mxu3 %v2374_v45  ;;  %2426 = vmatpush.msrb.mxu1 %v2371_v18  ;;  %v2369_v23 = vld [vmem:[#allocation16 + $0x1c0] sm:$0xff]  ;;  %v2334_v60 = vld [vmem:[#allocation16 + $0xa8] sm:$0xff]  ;;  %v2351_v18 = vld [vmem:[#allocation16 + $0x130] sm:$0xff] }
 0x50e   :  { %v1976_v48 = vmul.f32 0.5, %v1975_v36  ;;  %v2370_v36 = vld [vmem:[#allocation16 + $0x1c8] sm:$0xff] }
 0x50f   :  { %v2033_v63 = vmul.f32 %v4122_v25, %v2011_v11  ;;  %v2034_v30 = vmul.f32 %v4124_v4, %v2012_v33  ;;  %2427 = vmatpush.msrb.mxu1 %v2369_v23  ;;  %v2331_v11 = vld [vmem:[#allocation16 + $0x90] sm:$0xff]  ;;  %v2349_v23 = vld [vmem:[#allocation16 + $0x120] sm:$0xff] }
 0x510   :  { %v1977_v20 = vsub.f32 1.5, %v1976_v48  ;;  %v2367_v33 = vld [vmem:[#allocation16 + $0x1b0] sm:$0xff]  ;;  %v2332_v48 = vld [vmem:[#allocation16 + $0x98] sm:$0xff] }
 0x511   :  { %v2963_v0 = vpop.eup %2962  ;;  %v4195_v22 = vadd.f32 %v4128_v57, %v2033_v63  ;;  %v4198_v61 = vadd.f32 %v4130_v58, %v2034_v30  ;;  %2428 = vmatpush.msrb.mxu1 %v2367_v33  ;;  %v2368_v63 = vld [vmem:[#allocation16 + $0x1b8] sm:$0xff]  ;;  %v2329_v30 = vld [vmem:[#allocation16 + $0x80] sm:$0xff] }
 0x512   :  { %v1978_v17 = vmul.f32 %v2961_v37, %v1977_v20  ;;  %v1984_v9 = vmul.f32 %v2963_v0, %v1921_v6  ;;  %vm1990_vm8 = vweird.f32 %v2963_v0  ;;  %v2372_v6 = vld [vmem:[#allocation16 + $0x1d8] sm:$0xff]  ;;  %v2365_v20 = vld [vmem:[#allocation16 + $0x1a0] sm:$0xff] }
 0x513   :  { %2161 = vmatmul.f32.gmra.mxu0 %v4195_v22  ;;  %2202 = vmatmul.f32.gmra.mxu1 %v4198_v61  ;;  %vm1991_vm10 = vmor %vm1989_vm9, %vm1990_vm8  ;;  %v2348_v33 = vld [vmem:[#allocation16 + $0x118] sm:$0xff] }
 0x514   :  { %v1982_v47 = vsel %vm1981_vm7, %v2961_v37, %v1978_v17  ;;  %v1985_v1 = vmul.f32 %v2963_v0, %v1984_v9  ;;  %2243 = vmatmul.f32.gmra.mxu2 %v4195_v22  ;;  %2284 = vmatmul.f32.gmra.mxu3 %v4198_v61  ;;  %v2336_v37 = vld [vmem:[#allocation16 + $0xb8] sm:$0xff]  ;;  %v2366_v17 = vld [vmem:[#allocation16 + $0x1a8] sm:$0xff]  ;;  %v2327_v9 = vld [vmem:[#allocation16 + $0x70] sm:$0xff] }
 0x515   :  { %v2013_v15 = vmul.f32 %v1982_v47, %v4085_v35  ;;  %v2014_v59 = vmul.f32 %v1982_v47, %v4088_v3  ;;  %2508 = vmatpush.msrb.mxu3 %v2372_v6  ;;  %2429 = vmatpush.msrb.mxu1 %v2365_v20  ;;  %v2363_v47 = vld [vmem:[#allocation16 + $0x190] sm:$0xff]  ;;  %v2352_v6 = vld [vmem:[#allocation16 + $0x138] sm:$0xff] }
 0x516   :  { %v1986_v49 = vmul.f32 0.5, %v1985_v1  ;;  %v2328_v1 = vld [vmem:[#allocation16 + $0x78] sm:$0xff] }
 0x517   :  { %v2035_v8 = vmul.f32 %v4122_v25, %v2013_v15  ;;  %v2036_v27 = vmul.f32 %v4124_v4, %v2014_v59  ;;  %2509 = vmatpush.msrb.mxu3 %v2370_v36  ;;  %v2364_v15 = vld [vmem:[#allocation16 + $0x198] sm:$0xff]  ;;  %v2325_v59 = vld [vmem:[#allocation16 + $0x60] sm:$0xff]  ;;  %2430 = vmatpush.msrb.mxu1 %v2363_v47  ;;  %v2350_v36 = vld [vmem:[#allocation16 + $0x128] sm:$0xff] }
 0x518   :  { %v1987_v26 = vsub.f32 1.5, %v1986_v49  ;;  %v2361_v49 = vld [vmem:[#allocation16 + $0x180] sm:$0xff] }
 0x519   :  { %v4209_v32 = vadd.f32 %v4128_v57, %v2035_v8  ;;  %v4212_v39 = vadd.f32 %v4130_v58, %v2036_v27  ;;  %2510 = vmatpush.msrb.mxu3 %v2368_v63  ;;  %v2326_v8 = vld [vmem:[#allocation16 + $0x68] sm:$0xff]  ;;  %2431 = vmatpush.msrb.mxu1 %v2361_v49 }
 0x51a   :  { %v1988_v50 = vmul.f32 %v2963_v0, %v1987_v26  ;;  %v2362_v27 = vld [vmem:[#allocation16 + $0x188] sm:$0xff]  ;;  %v2323_v26 = vld [vmem:[#allocation16 + $0x50] sm:$0xff] }
 0x51b   :  { %2164 = vmatmul.f32.gmra.mxu0 %v4209_v32  ;;  %2205 = vmatmul.f32.gmra.mxu1 %v4212_v39  ;;  %v2346_v63 = vld [vmem:[#allocation16 + $0x108] sm:$0xff] }
 0x51c   :  { %v1992_v35 = vsel %vm1991_vm10, %v2963_v0, %v1988_v50  ;;  %2246 = vmatmul.f32.gmra.mxu2 %v4209_v32  ;;  %2287 = vmatmul.f32.gmra.mxu3 %v4212_v39  ;;  %v2330_v0 = vld [vmem:[#allocation16 + $0x88] sm:$0xff]  ;;  %v2359_v50 = vld [vmem:[#allocation16 + $0x170] sm:$0xff] }
 0x51d   :  { %v2015_v3 = vmul.f32 %v1992_v35, %v4096_v46  ;;  %v2016_v31 = vmul.f32 %v1992_v35, %v4099_v51  ;;  %v2343_v46 = vld [vmem:[#allocation16 + $0xf0] sm:$0xff]  ;;  %v2344_v51 = vld [vmem:[#allocation16 + $0xf8] sm:$0xff]  ;;  %2511 = vmatpush.msrb.mxu3 %v2366_v17  ;;  %2432 = vmatpush.msrb.mxu1 %v2359_v50 }
 0x51e   :  { %2383 = vmatpush.msrb.mxu0 %v2343_v46  ;;  %2465 = vmatpush.msrb.mxu2 %v2344_v51  ;;  %v2324_v35 = vld [vmem:[#allocation16 + $0x58] sm:$0xff]  ;;  %v2358_v46 = vld [vmem:[#allocation16 + $0x168] sm:$0xff]  ;;  %v2319_v51 = vld [vmem:[#allocation16 + $0x30] sm:$0xff] }
 0x51f   :  { %v2037_v29 = vmul.f32 %v4122_v25, %v2015_v3  ;;  %v2038_v2 = vmul.f32 %v4124_v4, %v2016_v31  ;;  %2512 = vmatpush.msrb.mxu3 %v2364_v15  ;;  %v2360_v3 = vld [vmem:[#allocation16 + $0x178] sm:$0xff]  ;;  %v2321_v31 = vld [vmem:[#allocation16 + $0x40] sm:$0xff] }
 0x520   :  { %2384 = vmatpush.msrb.mxu0 %v2341_v19  ;;  %2466 = vmatpush.msrb.mxu2 %v2342_v24  ;;  %v2355_v19 = vld [vmem:[#allocation16 + $0x150] sm:$0xff]  ;;  %v2320_v24 = vld [vmem:[#allocation16 + $0x38] sm:$0xff] }
 0x521   :  { %v4223_v53 = vadd.f32 %v4128_v57, %v2037_v29  ;;  %v4226_v21 = vadd.f32 %v4130_v58, %v2038_v2  ;;  %2513 = vmatpush.msrb.mxu3 %v2362_v27  ;;  %v2357_v29 = vld [vmem:[#allocation16 + $0x160] sm:$0xff]  ;;  %v2322_v2 = vld [vmem:[#allocation16 + $0x48] sm:$0xff]  ;;  %v2127_v15 = vld [vmem:[#allocation15] sm:$0x3] }
 0x522   :  { %2385 = vmatpush.msrb.mxu0 %v2339_v7  ;;  %2467 = vmatpush.msrb.mxu2 %v2340_v54 }
 0x523   :  { %2167 = vmatmul.f32.gmra.mxu0 %v4223_v53  ;;  %2208 = vmatmul.f32.gmra.mxu1 %v4226_v21 }
 0x524   :  { %2249 = vmatmul.f32.gmra.mxu2 %v4223_v53  ;;  %2290 = vmatmul.f32.gmra.mxu3 %v4226_v21 }
 0x525   :  { %2386 = vmatpush.msrb.mxu0 %v2337_v28  ;;  %2468 = vmatpush.msrb.mxu2 %v2338_v44  ;;  %v2353_v28 = vld [vmem:[#allocation16 + $0x140] sm:$0xff]  ;;  %v2354_v44 = vld [vmem:[#allocation16 + $0x148] sm:$0xff] }
 0x526   :  { %2514 = vmatpush.msrb.mxu3 %v2360_v3  ;;  %2433 = vmatpush.msrb.mxu1 %v2357_v29 }
 0x527   :  { %2387 = vmatpush.msrb.mxu0 %v2335_v16  ;;  %2469 = vmatpush.msrb.mxu2 %v2336_v37  ;;  %v2315_v16 = vld [vmem:[#allocation16 + $0x10] sm:$0xff]  ;;  %v2316_v37 = vld [vmem:[#allocation16 + $0x18] sm:$0xff] }
 0x528   :  { %2515 = vmatpush.msrb.mxu3 %v2358_v46  ;;  %2434 = vmatpush.msrb.mxu1 %v2355_v19 }
 0x529   :  { %2388 = vmatpush.msrb.mxu0 %v2333_v13  ;;  %2470 = vmatpush.msrb.mxu2 %v2334_v60  ;;  %v2313_v13 = vld [vmem:[#allocation16] sm:$0xff]  ;;  %v2314_v60 = vld [vmem:[#allocation16 + $0x8] sm:$0xff] }
 0x52a   :  { %2516 = vmatpush.msrb.mxu3 %v2356_v55  ;;  %2435 = vmatpush.msrb.mxu1 %v2353_v28 }
 0x52b   :  { %2389 = vmatpush.msrb.mxu0 %v2331_v11  ;;  %2471 = vmatpush.msrb.mxu2 %v2332_v48  ;;  %v2347_v11 = vld [vmem:[#allocation16 + $0x110] sm:$0xff]  ;;  %v2345_v48 = vld [vmem:[#allocation16 + $0x100] sm:$0xff] }
 0x52c   :  { %2517 = vmatpush.msrb.mxu3 %v2354_v44  ;;  %2436 = vmatpush.msrb.mxu1 %v2351_v18 }
 0x52d   :  { %2390 = vmatpush.msrb.mxu0 %v2329_v30  ;;  %2472 = vmatpush.msrb.mxu2 %v2330_v0 }
 0x52e   :  { %2518 = vmatpush.msrb.mxu3 %v2352_v6  ;;  %2437 = vmatpush.msrb.mxu1 %v2349_v23 }
 0x52f   :  { %2391 = vmatpush.msrb.mxu0 %v2327_v9  ;;  %2473 = vmatpush.msrb.mxu2 %v2328_v1 }
 0x530   :  { %2519 = vmatpush.msrb.mxu3 %v2350_v36  ;;  %2438 = vmatpush.msrb.mxu1 %v2347_v11 }
 0x531   :  { %2392 = vmatpush.msrb.mxu0 %v2325_v59  ;;  %2474 = vmatpush.msrb.mxu2 %v2326_v8  ;;  %v4235_v8 = vperm.slane %v2127_v15, 0 }
 0x532   :  { %2520 = vmatpush.msrb.mxu3 %v2348_v33  ;;  %2439 = vmatpush.msrb.mxu1 %v2345_v48 }
 0x533   :  { %2393 = vmatpush.msrb.mxu0 %v2323_v26  ;;  %2475 = vmatpush.msrb.mxu2 %v2324_v35 }
 0x534   :  { %2521 = vmatpush.msrb.mxu3 %v2346_v63 }
 0x535   :  { %2394 = vmatpush.msrb.mxu0 %v2321_v31  ;;  %2476 = vmatpush.msrb.mxu2 %v2322_v2 }
 0x537   :  { %2395 = vmatpush.msrb.mxu0 %v2319_v51  ;;  %2477 = vmatpush.msrb.mxu2 %v2320_v24 }
 0x539   :  { %2396 = vmatpush.msrb.mxu0 %v2317_v52  ;;  %2478 = vmatpush.msrb.mxu2 %v2318_v62 }
 0x53b   :  { %2397 = vmatpush.msrb.mxu0 %v2315_v16  ;;  %2479 = vmatpush.msrb.mxu2 %v2316_v37 }
 0x53d   :  { %2398 = vmatpush.msrb.mxu0 %v2313_v13  ;;  %2480 = vmatpush.msrb.mxu2 %v2314_v60 }
 0x554   :  { %v1906_v7 = vpop.xlane.xlu2 %1905 }
 0x555   :  { %v1914_v54 = vmul.f32 %v1906_v7, %v4018_v41 }
 0x557   :  { %v1922_v45 = vadd.f32 1e-05, %v1914_v54 }
 0x559   :  { %2964 = vrsqrt.f32 %v1922_v45  ;;  %vm1999_vm12 = vweird.f32 %v1922_v45 }
 0x55f   :  { %v2965_v30 = vpop.eup %2964 }
 0x560   :  { %v1994_v20 = vmul.f32 %v2965_v30, %v1922_v45  ;;  %vm2000_vm11 = vweird.f32 %v2965_v30 }
 0x561   :  { %vm2001_vm13 = vmor %vm1999_vm12, %vm2000_vm11 }
 0x562   :  { %v1995_v0 = vmul.f32 %v2965_v30, %v1994_v20 }
 0x564   :  { %v1996_v17 = vmul.f32 0.5, %v1995_v0 }
 0x566   :  { %v1997_v9 = vsub.f32 1.5, %v1996_v17 }
 0x568   :  { %v1998_v47 = vmul.f32 %v2965_v30, %v1997_v9 }
 0x56a   :  { %v2002_v1 = vsel %vm2001_vm13, %v2965_v30, %v1998_v47 }
 0x56b   :  { %v2017_v59 = vmul.f32 %v2002_v1, %v4108_v12  ;;  %v2018_v49 = vmul.f32 %v2002_v1, %v4111_v5  ;;  %v4250_v5 = vperm.slane %v2127_v15, 1 }
 0x56d   :  { %v2039_v27 = vmul.f32 %v4122_v25, %v2017_v59  ;;  %v2040_v26 = vmul.f32 %v4124_v4, %v2018_v49 }
 0x56f   :  { %v4240_v50 = vadd.f32 %v4128_v57, %v2039_v27  ;;  %v4243_v35 = vadd.f32 %v4130_v58, %v2040_v26 }
 0x570   :  { %v2150_v3 = vpop.f32.mrf.mxu0  ;;  %v2191_v31 = vpop.f32.mrf.mxu1 }
 0x571   :  { %v2151_v29 = vadd.f32 %v2150_v3, %v4235_v8  ;;  %2170 = vmatmul.f32.gmra.mxu0 %v4240_v50  ;;  %2211 = vmatmul.f32.gmra.mxu1 %v4243_v35 }
 0x572   :  { %2252 = vmatmul.f32.gmra.mxu2 %v4240_v50  ;;  %2293 = vmatmul.f32.gmra.mxu3 %v4243_v35 }
 0x573   :  { %v2192_v12 = vadd.f32 %v2191_v31, %v2151_v29 }
 0x575   :  { %v2297_v25 = vmax.f32 %v2192_v12, 0.0 }
 0x577   :  { %v2232_v4 = vpop.f32.mrf.mxu2  ;;  %v2273_v57 = vpop.f32.mrf.mxu3 }
 0x578   :  { %v2233_v58 = vadd.f32 %v2232_v4, %v4250_v5  ;;  %v2153_v2 = vpop.f32.mrf.mxu0  ;;  %v2194_v46 = vpop.f32.mrf.mxu1 }
 0x579   :  { %v2154_v51 = vadd.f32 %v2153_v2, %v4235_v8  ;;  %2399 = vmatmul.f32.vlgmr.msrb.gmra.mxu0 %v2297_v25 }
 0x57a   :  { %v2274_v19 = vadd.f32 %v2273_v57, %v2233_v58  ;;  %2481 = vmatmul.f32.vlgmr.msrb.gmra.mxu2 %v2297_v25 }
 0x57b   :  { %v2195_v24 = vadd.f32 %v2194_v46, %v2154_v51 }
 0x57c   :  { %v2298_v7 = vmax.f32 %v2274_v19, 0.0 }
 0x57d   :  { %v2299_v55 = vmax.f32 %v2195_v24, 0.0 }
 0x57e   :  { %2440 = vmatmul.f32.vlgmr.msrb.gmra.mxu1 %v2298_v7  ;;  %2522 = vmatmul.f32.vlgmr.msrb.gmra.mxu3 %v2298_v7 }
 0x57f   :  { %v2235_v54 = vpop.f32.mrf.mxu2  ;;  %v2276_v52 = vpop.f32.mrf.mxu3 }
 0x580   :  { %v2236_v28 = vadd.f32 %v2235_v54, %v4250_v5  ;;  %v2156_v62 = vpop.f32.mrf.mxu0  ;;  %v2197_v44 = vpop.f32.mrf.mxu1 }
 0x581   :  { %v2157_v45 = vadd.f32 %v2156_v62, %v4235_v8  ;;  %2402 = vmatmul.f32.gmra.mxu0 %v2299_v55 }
 0x582   :  { %v2277_v16 = vadd.f32 %v2276_v52, %v2236_v28  ;;  %2484 = vmatmul.f32.gmra.mxu2 %v2299_v55 }
 0x583   :  { %v2198_v18 = vadd.f32 %v2197_v44, %v2157_v45 }
 0x584   :  { %v2300_v37 = vmax.f32 %v2277_v16, 0.0 }
 0x585   :  { %v2301_v6 = vmax.f32 %v2198_v18, 0.0 }
 0x586   :  { %2443 = vmatmul.f32.gmra.mxu1 %v2300_v37  ;;  %2525 = vmatmul.f32.gmra.mxu3 %v2300_v37 }
 0x587   :  { %v2238_v13 = vpop.f32.mrf.mxu2  ;;  %v2279_v23 = vpop.f32.mrf.mxu3 }
 0x588   :  { %v2239_v60 = vadd.f32 %v2238_v13, %v4250_v5  ;;  %v2159_v36 = vpop.f32.mrf.mxu0  ;;  %v2200_v11 = vpop.f32.mrf.mxu1 }
 0x589   :  { %v2160_v33 = vadd.f32 %v2159_v36, %v4235_v8  ;;  %2405 = vmatmul.f32.gmra.mxu0 %v2301_v6 }
 0x58a   :  { %v2280_v48 = vadd.f32 %v2279_v23, %v2239_v60  ;;  %2487 = vmatmul.f32.gmra.mxu2 %v2301_v6 }
 0x58b   :  { %v2201_v63 = vadd.f32 %v2200_v11, %v2160_v33 }
 0x58c   :  { %v2302_v30 = vmax.f32 %v2280_v48, 0.0 }
 0x58d   :  { %v2303_v20 = vmax.f32 %v2201_v63, 0.0 }
 0x58e   :  { %2446 = vmatmul.f32.gmra.mxu1 %v2302_v30  ;;  %2528 = vmatmul.f32.gmra.mxu3 %v2302_v30 }
 0x58f   :  { %v2241_v0 = vpop.f32.mrf.mxu2  ;;  %v2282_v17 = vpop.f32.mrf.mxu3 }
 0x590   :  { %v2242_v9 = vadd.f32 %v2241_v0, %v4250_v5  ;;  %v2162_v47 = vpop.f32.mrf.mxu0  ;;  %v2203_v1 = vpop.f32.mrf.mxu1 }
 0x591   :  { %v2163_v15 = vadd.f32 %v2162_v47, %v4235_v8  ;;  %2408 = vmatmul.f32.gmra.mxu0 %v2303_v20 }
 0x592   :  { %v2283_v59 = vadd.f32 %v2282_v17, %v2242_v9  ;;  %2490 = vmatmul.f32.gmra.mxu2 %v2303_v20  ;;  %v2377_v20 = vld [vmem:[#allocation18] sm:$0x3] }
 0x593   :  { %v2204_v49 = vadd.f32 %v2203_v1, %v2163_v15  ;;  %v4267_v9 = vperm.slane %v2377_v20, 0  ;;  %v4269_v1 = vperm.slane %v2377_v20, 1 }
 0x594   :  { %v2304_v27 = vmax.f32 %v2283_v59, 0.0 }
 0x595   :  { %v2305_v26 = vmax.f32 %v2204_v49, 0.0 }
 0x596   :  { %2449 = vmatmul.f32.gmra.mxu1 %v2304_v27  ;;  %2531 = vmatmul.f32.gmra.mxu3 %v2304_v27 }
 0x597   :  { %v2244_v3 = vpop.f32.mrf.mxu2  ;;  %v2285_v31 = vpop.f32.mrf.mxu3 }
 0x598   :  { %v2245_v29 = vadd.f32 %v2244_v3, %v4250_v5  ;;  %v2165_v12 = vpop.f32.mrf.mxu0  ;;  %v2206_v25 = vpop.f32.mrf.mxu1 }
 0x599   :  { %v2166_v4 = vadd.f32 %v2165_v12, %v4235_v8  ;;  %2411 = vmatmul.f32.gmra.mxu0 %v2305_v26 }
 0x59a   :  { %v2286_v57 = vadd.f32 %v2285_v31, %v2245_v29  ;;  %2493 = vmatmul.f32.gmra.mxu2 %v2305_v26 }
 0x59b   :  { %v2207_v58 = vadd.f32 %v2206_v25, %v2166_v4 }
 0x59c   :  { %v2306_v2 = vmax.f32 %v2286_v57, 0.0 }
 0x59d   :  { %v2307_v46 = vmax.f32 %v2207_v58, 0.0 }
 0x59e   :  { %2452 = vmatmul.f32.gmra.mxu1 %v2306_v2  ;;  %2534 = vmatmul.f32.gmra.mxu3 %v2306_v2 }
 0x59f   :  { %v2247_v51 = vpop.f32.mrf.mxu2  ;;  %v2288_v19 = vpop.f32.mrf.mxu3 }
 0x5a0   :  { %v2248_v24 = vadd.f32 %v2247_v51, %v4250_v5  ;;  %v2168_v7 = vpop.f32.mrf.mxu0  ;;  %v2209_v52 = vpop.f32.mrf.mxu1 }
 0x5a1   :  { %v2169_v55 = vadd.f32 %v2168_v7, %v4235_v8  ;;  %2414 = vmatmul.f32.gmra.mxu0 %v2307_v46 }
 0x5a2   :  { %v2289_v54 = vadd.f32 %v2288_v19, %v2248_v24  ;;  %2496 = vmatmul.f32.gmra.mxu2 %v2307_v46 }
 0x5a3   :  { %v2210_v28 = vadd.f32 %v2209_v52, %v2169_v55 }
 0x5a4   :  { %v2308_v62 = vmax.f32 %v2289_v54, 0.0 }
 0x5a5   :  { %v2309_v44 = vmax.f32 %v2210_v28, 0.0 }
 0x5a6   :  { %2455 = vmatmul.f32.gmra.mxu1 %v2308_v62  ;;  %2537 = vmatmul.f32.gmra.mxu3 %v2308_v62 }
 0x5a7   :  { %v2250_v45 = vpop.f32.mrf.mxu2  ;;  %v2291_v18 = vpop.f32.mrf.mxu3 }
 0x5a8   :  { %v2251_v16 = vadd.f32 %v2250_v45, %v4250_v5 }
 0x5a9   :  { %2417 = vmatmul.f32.gmra.mxu0 %v2309_v44 }
 0x5aa   :  { %v2292_v37 = vadd.f32 %v2291_v18, %v2251_v16  ;;  %2499 = vmatmul.f32.gmra.mxu2 %v2309_v44 }
 0x5ac   :  { %v2310_v6 = vmax.f32 %v2292_v37, 0.0 }
 0x5ae   :  { %2458 = vmatmul.f32.gmra.mxu1 %v2310_v6  ;;  %2540 = vmatmul.f32.gmra.mxu3 %v2310_v6 }
 0x5ee   :  { %v2171_v13 = vpop.f32.mrf.mxu0  ;;  %v2212_v60 = vpop.f32.mrf.mxu1 }
 0x5ef   :  { %v2172_v23 = vadd.f32 %v2171_v13, %v4235_v8 }
 0x5f1   :  { %v2213_v36 = vadd.f32 %v2212_v60, %v2172_v23 }
 0x5f3   :  { %v2311_v11 = vmax.f32 %v2213_v36, 0.0 }
 0x5f5   :  { %v2253_v33 = vpop.f32.mrf.mxu2  ;;  %2420 = vmatmul.f32.gmra.mxu0 %v2311_v11  ;;  %2502 = vmatmul.f32.gmra.mxu2 %v2311_v11  ;;  %v2294_v30 = vpop.f32.mrf.mxu3 }
 0x5f6   :  { %v2254_v48 = vadd.f32 %v2253_v33, %v4250_v5  ;;  %v2400_v63 = vpop.f32.mrf.mxu0 }
 0x5f7   :  { %v2401_v15 = vadd.f32 %v2400_v63, %v4267_v9 }
 0x5f8   :  { %v2295_v0 = vadd.f32 %v2294_v30, %v2254_v48 }
 0x5fa   :  { %v2312_v17 = vmax.f32 %v2295_v0, 0.0 }
 0x5fb   :  { %v2441_v47 = vpop.f32.mrf.mxu1 }
 0x5fc   :  { %2461 = vmatmul.f32.gmra.mxu1 %v2312_v17  ;;  %2543 = vmatmul.f32.gmra.mxu3 %v2312_v17  ;;  %v2442_v49 = vadd.f32 %v2441_v47, %v2401_v15 }
 0x5fd   :  { %v2482_v8 = vpop.f32.mrf.mxu2 }
 0x5fe   :  { %v2403_v59 = vpop.f32.mrf.mxu0  ;;  %v2483_v27 = vadd.f32 %v2482_v8, %v4269_v1  ;;  %v4274_v31 = vadd.f32 %v2442_v49, %v4136_v43 }
 0x5ff   :  { %v2404_v25 = vadd.f32 %v2403_v59, %v4267_v9 }
 0x601   :  { %v2523_v5 = vpop.f32.mrf.mxu3 }
 0x602   :  { %v2524_v26 = vadd.f32 %v2523_v5, %v2483_v27 }
 0x603   :  { %v2444_v3 = vpop.f32.mrf.mxu1 }
 0x604   :  { %v4277_v29 = vadd.f32 %v2524_v26, %v4139_v42  ;;  %v2445_v58 = vadd.f32 %v2444_v3, %v2404_v25 }
 0x605   :  { %v2485_v12 = vpop.f32.mrf.mxu2 }
 0x606   :  { %v2406_v4 = vpop.f32.mrf.mxu0  ;;  %v2563_v57 = vadd.f32 %v4277_v29, %v4274_v31  ;;  %v2486_v2 = vadd.f32 %v2485_v12, %v4269_v1  ;;  %v4284_v43 = vadd.f32 %v2445_v58, %v4151_v38 }
 0x607   :  { %v2407_v7 = vadd.f32 %v2406_v4, %v4267_v9 }
 0x608   :  { %2564 = vadd.xlane.f32.xlu0 %v2563_v57 }
 0x609   :  { %v2526_v46 = vpop.f32.mrf.mxu3 }
 0x60a   :  { %v2527_v51 = vadd.f32 %v2526_v46, %v2486_v2 }
 0x60b   :  { %v2447_v19 = vpop.f32.mrf.mxu1 }
 0x60c   :  { %v4287_v42 = vadd.f32 %v2527_v51, %v4154_v56  ;;  %v2448_v52 = vadd.f32 %v2447_v19, %v2407_v7 }
 0x60d   :  { %v2488_v24 = vpop.f32.mrf.mxu2 }
 0x60e   :  { %v2409_v55 = vpop.f32.mrf.mxu0  ;;  %v2566_v54 = vadd.f32 %v4287_v42, %v4284_v43  ;;  %v2489_v28 = vadd.f32 %v2488_v24, %v4269_v1  ;;  %v4294_v38 = vadd.f32 %v2448_v52, %v4166_v14 }
 0x60f   :  { %v2410_v18 = vadd.f32 %v2409_v55, %v4267_v9 }
 0x610   :  { %2567 = vadd.xlane.f32.xlu1 %v2566_v54 }
 0x611   :  { %v2529_v62 = vpop.f32.mrf.mxu3 }
 0x612   :  { %v2530_v44 = vadd.f32 %v2529_v62, %v2489_v28 }
 0x613   :  { %v2450_v45 = vpop.f32.mrf.mxu1 }
 0x614   :  { %v4297_v56 = vadd.f32 %v2530_v44, %v4169_v40  ;;  %v2451_v13 = vadd.f32 %v2450_v45, %v2410_v18 }
 0x615   :  { %v2491_v16 = vpop.f32.mrf.mxu2 }
 0x616   :  { %v2569_v37 = vadd.f32 %v4297_v56, %v4294_v38  ;;  %v2412_v6 = vpop.f32.mrf.mxu0  ;;  %v2492_v23 = vadd.f32 %v2491_v16, %v4269_v1  ;;  %v4304_v14 = vadd.f32 %v2451_v13, %v4181_v10 }
 0x617   :  { %v2413_v48 = vadd.f32 %v2412_v6, %v4267_v9 }
 0x618   :  { %2570 = vadd.xlane.f32.xlu2 %v2569_v37 }
 0x619   :  { %v2532_v60 = vpop.f32.mrf.mxu3 }
 0x61a   :  { %v2533_v36 = vadd.f32 %v2532_v60, %v2492_v23 }
 0x61b   :  { %v2453_v11 = vpop.f32.mrf.mxu1 }
 0x61c   :  { %v4307_v40 = vadd.f32 %v2533_v36, %v4184_v34  ;;  %v2454_v30 = vadd.f32 %v2453_v11, %v2413_v48 }
 0x61d   :  { %v2494_v33 = vpop.f32.mrf.mxu2 }
 0x61e   :  { %v2572_v63 = vadd.f32 %v4307_v40, %v4304_v14  ;;  %v2495_v20 = vadd.f32 %v2494_v33, %v4269_v1  ;;  %v2415_v0 = vpop.f32.mrf.mxu0  ;;  %v4314_v10 = vadd.f32 %v2454_v30, %v4195_v22 }
 0x61f   :  { %v2416_v59 = vadd.f32 %v2415_v0, %v4267_v9 }
 0x620   :  { %2573 = vadd.xlane.f32.xlu0 %v2572_v63 }
 0x621   :  { %v2535_v17 = vpop.f32.mrf.mxu3 }
 0x622   :  { %v2536_v47 = vadd.f32 %v2535_v17, %v2495_v20 }
 0x623   :  { %v2456_v8 = vpop.f32.mrf.mxu1 }
 0x624   :  { %v4317_v34 = vadd.f32 %v2536_v47, %v4198_v61  ;;  %v2457_v27 = vadd.f32 %v2456_v8, %v2416_v59 }
 0x625   :  { %v2497_v15 = vpop.f32.mrf.mxu2 }
 0x626   :  { %v2575_v49 = vadd.f32 %v4317_v34, %v4314_v10  ;;  %v2498_v5 = vadd.f32 %v2497_v15, %v4269_v1  ;;  %v2418_v12 = vpop.f32.mrf.mxu0  ;;  %v4324_v25 = vadd.f32 %v2457_v27, %v4209_v32 }
 0x627   :  { %v2419_v57 = vadd.f32 %v2418_v12, %v4267_v9 }
 0x628   :  { %2576 = vadd.xlane.f32.xlu1 %v2575_v49 }
 0x629   :  { %v2538_v26 = vpop.f32.mrf.mxu3 }
 0x62a   :  { %v2539_v3 = vadd.f32 %v2538_v26, %v2498_v5 }
 0x62b   :  { %v2459_v61 = vpop.f32.mrf.mxu1 }
 0x62c   :  { %v4327_v22 = vadd.f32 %v2539_v3, %v4212_v39  ;;  %v2460_v2 = vadd.f32 %v2459_v61, %v2419_v57 }
 0x62d   :  { %v2500_v4 = vpop.f32.mrf.mxu2 }
 0x62e   :  { %v2578_v58 = vadd.f32 %v4327_v22, %v4324_v25  ;;  %v2501_v46 = vadd.f32 %v2500_v4, %v4269_v1  ;;  %v4334_v24 = vadd.f32 %v2460_v2, %v4223_v53 }
 0x630   :  { %2579 = vadd.xlane.f32.xlu2 %v2578_v58 }
 0x631   :  { %v2541_v51 = vpop.f32.mrf.mxu3 }
 0x632   :  { %v2542_v19 = vadd.f32 %v2541_v51, %v2501_v46 }
 0x634   :  { %v4337_v32 = vadd.f32 %v2542_v19, %v4226_v21 }
 0x636   :  { %v2581_v39 = vadd.f32 %v4337_v32, %v4334_v24 }
 0x638   :  { %2582 = vadd.xlane.f32.xlu0 %v2581_v39 }
 0x672   :  { %v2421_v7 = vpop.f32.mrf.mxu0 }
 0x673   :  { %v2422_v28 = vadd.f32 %v2421_v7, %v4267_v9 }
 0x678   :  { %v2503_v55 = vpop.f32.mrf.mxu2 }
 0x679   :  { %v2462_v54 = vpop.f32.mrf.mxu1  ;;  %v2504_v45 = vadd.f32 %v2503_v55, %v4269_v1 }
 0x67a   :  { %v2463_v44 = vadd.f32 %v2462_v54, %v2422_v28 }
 0x67b   :  { %v2565_v52 = vpop.xlane.xlu0 %2564 }
 0x67c   :  { %v2587_v62 = vmul.f32 %v2565_v52, %v4018_v41  ;;  %v2561_v9 = vadd.f32 %v2463_v44, %v4240_v50 }
 0x67e   :  { %v4345_v53 = vsub.f32 %v4274_v31, %v2587_v62  ;;  %v4348_v21 = vsub.f32 %v4277_v29, %v2587_v62 }
 0x67f   :  { %v2544_v16 = vpop.f32.mrf.mxu3 }
 0x680   :  { %v2545_v18 = vadd.f32 %v2544_v16, %v2504_v45  ;;  %v2611_v37 = vmul.f32 %v4345_v53, %v4345_v53  ;;  %v2612_v6 = vmul.f32 %v4348_v21, %v4348_v21 }
 0x682   :  { %v2562_v13 = vadd.f32 %v2545_v18, %v4243_v35  ;;  %v2627_v23 = vadd.f32 %v2612_v6, %v2611_v37 }
 0x683   :  { %v2568_v1 = vpop.xlane.xlu1 %2567 }
 0x684   :  { %v2588_v31 = vmul.f32 %v2568_v1, %v4018_v41  ;;  %2628 = vadd.xlane.f32.xlu2 %v2627_v23  ;;  %v2584_v60 = vadd.f32 %v2562_v13, %v2561_v9 }
 0x686   :  { %v4358_v29 = vsub.f32 %v4284_v43, %v2588_v31  ;;  %v4361_v36 = vsub.f32 %v4287_v42, %v2588_v31  ;;  %2585 = vadd.xlane.f32.xlu1 %v2584_v60  ;;  %v2763_v31 = vld [vmem:[#allocation21] sm:$0x3] }
 0x688   :  { %v2613_v11 = vmul.f32 %v4358_v29, %v4358_v29  ;;  %v2614_v50 = vmul.f32 %v4361_v36, %v4361_v36 }
 0x68a   :  { %v2630_v35 = vadd.f32 %v2614_v50, %v2613_v11 }
 0x68b   :  { %v2571_v33 = vpop.xlane.xlu2 %2570 }
 0x68c   :  { %v2589_v48 = vmul.f32 %v2571_v33, %v4018_v41  ;;  %2631 = vadd.xlane.f32.xlu0 %v2630_v35  ;;  %v2785_v35 = vld [vmem:[#allocation22] sm:$0x3] }
 0x68e   :  { %v4369_v63 = vsub.f32 %v4294_v38, %v2589_v48  ;;  %v4372_v43 = vsub.f32 %v4297_v56, %v2589_v48 }
 0x690   :  { %v2615_v42 = vmul.f32 %v4369_v63, %v4369_v63  ;;  %v2616_v30 = vmul.f32 %v4372_v43, %v4372_v43 }
 0x692   :  { %v2633_v20 = vadd.f32 %v2616_v30, %v2615_v42  ;;  %v4434_v42 = vperm.slane %v2763_v31, 0  ;;  %v4436_v30 = vperm.slane %v2763_v31, 1 }
 0x693   :  { %v2574_v0 = vpop.xlane.xlu0 %2573 }
 0x694   :  { %v2590_v17 = vmul.f32 %v2574_v0, %v4018_v41  ;;  %2634 = vadd.xlane.f32.xlu1 %v2633_v20 }
 0x696   :  { %v4380_v47 = vsub.f32 %v4304_v14, %v2590_v17  ;;  %v4383_v38 = vsub.f32 %v4307_v40, %v2590_v17  ;;  %v4438_v17 = vperm.slane %v2785_v35, 0 }
 0x698   :  { %v2617_v56 = vmul.f32 %v4380_v47, %v4380_v47  ;;  %v2618_v8 = vmul.f32 %v4383_v38, %v4383_v38 }
 0x69a   :  { %v2636_v15 = vadd.f32 %v2618_v8, %v2617_v56  ;;  %v4440_v56 = vperm.slane %v2785_v35, 1 }
 0x69b   :  { %v2577_v59 = vpop.xlane.xlu1 %2576 }
 0x69c   :  { %v2591_v49 = vmul.f32 %v2577_v59, %v4018_v41  ;;  %2637 = vadd.xlane.f32.xlu2 %v2636_v15 }
 0x69e   :  { %v4391_v27 = vsub.f32 %v4314_v10, %v2591_v49  ;;  %v4394_v14 = vsub.f32 %v4317_v34, %v2591_v49 }
 0x6a0   :  { %v2619_v40 = vmul.f32 %v4391_v27, %v4391_v27  ;;  %v2620_v5 = vmul.f32 %v4394_v14, %v4394_v14 }
 0x6a2   :  { %v2639_v26 = vadd.f32 %v2620_v5, %v2619_v40 }
 0x6a3   :  { %v2580_v3 = vpop.xlane.xlu2 %2579 }
 0x6a4   :  { %v2592_v12 = vmul.f32 %v2580_v3, %v4018_v41  ;;  %2640 = vadd.xlane.f32.xlu0 %v2639_v26 }
 0x6a6   :  { %v4402_v61 = vsub.f32 %v4324_v25, %v2592_v12  ;;  %v4405_v10 = vsub.f32 %v4327_v22, %v2592_v12 }
 0x6a8   :  { %v2621_v34 = vmul.f32 %v4402_v61, %v4402_v61  ;;  %v2622_v4 = vmul.f32 %v4405_v10, %v4405_v10 }
 0x6aa   :  { %v2642_v57 = vadd.f32 %v2622_v4, %v2621_v34 }
 0x6ab   :  { %v2583_v58 = vpop.xlane.xlu0 %2582 }
 0x6ac   :  { %v2593_v2 = vmul.f32 %v2583_v58, %v4018_v41  ;;  %2643 = vadd.xlane.f32.xlu1 %v2642_v57 }
 0x6ae   :  { %v4413_v46 = vsub.f32 %v4334_v24, %v2593_v2  ;;  %v4416_v25 = vsub.f32 %v4337_v32, %v2593_v2 }
 0x6b0   :  { %v2623_v22 = vmul.f32 %v4413_v46, %v4413_v46  ;;  %v2624_v51 = vmul.f32 %v4416_v25, %v4416_v25 }
 0x6b2   :  { %v2645_v19 = vadd.f32 %v2624_v51, %v2623_v22 }
 0x6b4   :  { %2646 = vadd.xlane.f32.xlu2 %v2645_v19 }
 0x6f7   :  { %v2629_v39 = vpop.xlane.xlu2 %2628 }
 0x6f8   :  { %v2651_v7 = vmul.f32 %v2629_v39, %v4018_v41 }
 0x6f9   :  { %v2586_v55 = vpop.xlane.xlu1 %2585 }
 0x6fa   :  { %v2659_v54 = vadd.f32 1e-05, %v2651_v7  ;;  %v2594_v52 = vmul.f32 %v2586_v55, %v4018_v41 }
 0x6fc   :  { %2966 = vrsqrt.f32 %v2659_v54  ;;  %v4424_v24 = vsub.f32 %v2561_v9, %v2594_v52  ;;  %v4426_v32 = vsub.f32 %v2562_v13, %v2594_v52  ;;  %vm2673_vm15 = vweird.f32 %v2659_v54 }
 0x6fe   :  { %v2625_v28 = vmul.f32 %v4424_v24, %v4424_v24  ;;  %v2626_v62 = vmul.f32 %v4426_v32, %v4426_v32 }
 0x6ff   :  { %v2632_v44 = vpop.xlane.xlu0 %2631 }
 0x700   :  { %v2652_v45 = vmul.f32 %v2632_v44, %v4018_v41  ;;  %v2648_v16 = vadd.f32 %v2626_v62, %v2625_v28 }
 0x702   :  { %v2967_v18 = vpop.eup %2966  ;;  %v2660_v37 = vadd.f32 1e-05, %v2652_v45  ;;  %2649 = vadd.xlane.f32.xlu0 %v2648_v16 }
 0x703   :  { %v2668_v6 = vmul.f32 %v2967_v18, %v2659_v54  ;;  %vm2674_vm14 = vweird.f32 %v2967_v18 }
 0x704   :  { %2968 = vrsqrt.f32 %v2660_v37  ;;  %vm2675_vm0 = vmor %vm2673_vm15, %vm2674_vm14  ;;  %vm2683_vm2 = vweird.f32 %v2660_v37 }
 0x705   :  { %v2669_v23 = vmul.f32 %v2967_v18, %v2668_v6 }
 0x707   :  { %v2670_v9 = vmul.f32 0.5, %v2669_v23  ;;  %v2635_v1 = vpop.xlane.xlu1 %2634 }
 0x708   :  { %v2653_v13 = vmul.f32 %v2635_v1, %v4018_v41 }
 0x709   :  { %v2671_v60 = vsub.f32 1.5, %v2670_v9 }
 0x70a   :  { %v2969_v11 = vpop.eup %2968  ;;  %v2661_v50 = vadd.f32 1e-05, %v2653_v13 }
 0x70b   :  { %v2672_v33 = vmul.f32 %v2967_v18, %v2671_v60  ;;  %v2678_v48 = vmul.f32 %v2969_v11, %v2660_v37  ;;  %vm2684_vm1 = vweird.f32 %v2969_v11 }
 0x70c   :  { %2970 = vrsqrt.f32 %v2661_v50  ;;  %vm2685_vm3 = vmor %vm2683_vm2, %vm2684_vm1  ;;  %vm2693_vm5 = vweird.f32 %v2661_v50 }
 0x70d   :  { %v2676_v20 = vsel %vm2675_vm0, %v2967_v18, %v2672_v33  ;;  %v2679_v0 = vmul.f32 %v2969_v11, %v2678_v48 }
 0x70e   :  { %v2747_v8 = vmul.f32 %v2676_v20, %v4345_v53  ;;  %v2748_v15 = vmul.f32 %v2676_v20, %v4348_v21 }
 0x70f   :  { %v2680_v59 = vmul.f32 0.5, %v2679_v0  ;;  %v2638_v49 = vpop.xlane.xlu2 %2637 }
 0x710   :  { %v2769_v40 = vmul.f32 %v4434_v42, %v2747_v8  ;;  %v2770_v5 = vmul.f32 %v4436_v30, %v2748_v15  ;;  %v2654_v26 = vmul.f32 %v2638_v49, %v4018_v41 }
 0x711   :  { %v2681_v3 = vsub.f32 1.5, %v2680_v59 }
 0x712   :  { %v2971_v12 = vpop.eup %2970  ;;  %v2791_v34 = vadd.f32 %v4438_v17, %v2769_v40  ;;  %v2792_v4 = vadd.f32 %v4440_v56, %v2770_v5  ;;  %v2662_v57 = vadd.f32 1e-05, %v2654_v26 }
 0x713   :  { %v2682_v58 = vmul.f32 %v2969_v11, %v2681_v3  ;;  %v2688_v53 = vmul.f32 %v2971_v12, %v2661_v50  ;;  %vm2694_vm4 = vweird.f32 %v2971_v12 }
 0x714   :  { %2807 = vst [vmem:[#allocation24] sm:$0xff] %v2791_v34  ;;  %2972 = vrsqrt.f32 %v2662_v57  ;;  %vm2695_vm6 = vmor %vm2693_vm5, %vm2694_vm4  ;;  %vm2703_vm8 = vweird.f32 %v2662_v57 }
 0x715   :  { %2808 = vst [vmem:[#allocation24 + $0x8] sm:$0xff] %v2792_v4  ;;  %v2686_v21 = vsel %vm2685_vm3, %v2969_v11, %v2682_v58  ;;  %v2689_v2 = vmul.f32 %v2971_v12, %v2688_v53 }
 0x716   :  { %v2749_v22 = vmul.f32 %v2686_v21, %v4358_v29  ;;  %v2750_v51 = vmul.f32 %v2686_v21, %v4361_v36 }
 0x717   :  { %v2690_v19 = vmul.f32 0.5, %v2689_v2  ;;  %v2641_v39 = vpop.xlane.xlu0 %2640 }
 0x718   :  { %v2771_v7 = vmul.f32 %v4434_v42, %v2749_v22  ;;  %v2772_v55 = vmul.f32 %v4436_v30, %v2750_v51  ;;  %v2655_v54 = vmul.f32 %v2641_v39, %v4018_v41 }
 0x719   :  { %v2691_v52 = vsub.f32 1.5, %v2690_v19 }
 0x71a   :  { %v2973_v28 = vpop.eup %2972  ;;  %v2793_v62 = vadd.f32 %v4438_v17, %v2771_v7  ;;  %v2794_v44 = vadd.f32 %v4440_v56, %v2772_v55  ;;  %v2663_v45 = vadd.f32 1e-05, %v2655_v54 }
 0x71b   :  { %v2692_v16 = vmul.f32 %v2971_v12, %v2691_v52  ;;  %v2698_v29 = vmul.f32 %v2973_v28, %v2662_v57  ;;  %vm2704_vm7 = vweird.f32 %v2973_v28 }
 0x71c   :  { %2809 = vst [vmem:[#allocation24 + $0x10] sm:$0xff] %v2793_v62  ;;  %2974 = vrsqrt.f32 %v2663_v45  ;;  %vm2705_vm9 = vmor %vm2703_vm8, %vm2704_vm7  ;;  %vm2713_vm11 = vweird.f32 %v2663_v45 }
 0x71d   :  { %2810 = vst [vmem:[#allocation24 + $0x18] sm:$0xff] %v2794_v44  ;;  %v2696_v36 = vsel %vm2695_vm6, %v2971_v12, %v2692_v16  ;;  %v2699_v18 = vmul.f32 %v2973_v28, %v2698_v29 }
 0x71e   :  { %v2751_v37 = vmul.f32 %v2696_v36, %v4369_v63  ;;  %v2752_v6 = vmul.f32 %v2696_v36, %v4372_v43 }
 0x71f   :  { %v2700_v23 = vmul.f32 0.5, %v2699_v18  ;;  %v2644_v9 = vpop.xlane.xlu1 %2643 }
 0x720   :  { %v2773_v1 = vmul.f32 %v4434_v42, %v2751_v37  ;;  %v2774_v13 = vmul.f32 %v4436_v30, %v2752_v6  ;;  %v2656_v31 = vmul.f32 %v2644_v9, %v4018_v41 }
 0x721   :  { %v2701_v60 = vsub.f32 1.5, %v2700_v23 }
 0x722   :  { %v2975_v11 = vpop.eup %2974  ;;  %v2795_v50 = vadd.f32 %v4438_v17, %v2773_v1  ;;  %v2796_v35 = vadd.f32 %v4440_v56, %v2774_v13  ;;  %v2664_v33 = vadd.f32 1e-05, %v2656_v31 }
 0x723   :  { %v2702_v48 = vmul.f32 %v2973_v28, %v2701_v60  ;;  %v2708_v63 = vmul.f32 %v2975_v11, %v2663_v45  ;;  %vm2714_vm10 = vweird.f32 %v2975_v11 }
 0x724   :  { %2811 = vst [vmem:[#allocation24 + $0x20] sm:$0xff] %v2795_v50  ;;  %2976 = vrsqrt.f32 %v2664_v33  ;;  %vm2715_vm12 = vmor %vm2713_vm11, %vm2714_vm10  ;;  %vm2723_vm14 = vweird.f32 %v2664_v33 }
 0x725   :  { %2812 = vst [vmem:[#allocation24 + $0x28] sm:$0xff] %v2796_v35  ;;  %v2706_v43 = vsel %vm2705_vm9, %v2973_v28, %v2702_v48  ;;  %v2709_v20 = vmul.f32 %v2975_v11, %v2708_v63 }
 0x726   :  { %v2753_v0 = vmul.f32 %v2706_v43, %v4380_v47  ;;  %v2754_v8 = vmul.f32 %v2706_v43, %v4383_v38 }
 0x727   :  { %v2710_v15 = vmul.f32 0.5, %v2709_v20  ;;  %v2647_v59 = vpop.xlane.xlu2 %2646 }
 0x728   :  { %v2775_v49 = vmul.f32 %v4434_v42, %v2753_v0  ;;  %v2776_v40 = vmul.f32 %v4436_v30, %v2754_v8  ;;  %v2657_v5 = vmul.f32 %v2647_v59, %v4018_v41 }
 0x729   :  { %v2711_v26 = vsub.f32 1.5, %v2710_v15 }
 0x72a   :  { %v2977_v3 = vpop.eup %2976  ;;  %v2797_v12 = vadd.f32 %v4438_v17, %v2775_v49  ;;  %v2798_v34 = vadd.f32 %v4440_v56, %v2776_v40  ;;  %v2665_v4 = vadd.f32 1e-05, %v2657_v5 }
 0x72b   :  { %v2712_v57 = vmul.f32 %v2975_v11, %v2711_v26  ;;  %v2718_v47 = vmul.f32 %v2977_v3, %v2664_v33  ;;  %vm2724_vm13 = vweird.f32 %v2977_v3 }
 0x72c   :  { %2813 = vst [vmem:[#allocation24 + $0x30] sm:$0xff] %v2797_v12  ;;  %2978 = vrsqrt.f32 %v2665_v4  ;;  %vm2725_vm15 = vmor %vm2723_vm14, %vm2724_vm13  ;;  %vm2733_vm1 = vweird.f32 %v2665_v4 }
 0x72d   :  { %2814 = vst [vmem:[#allocation24 + $0x38] sm:$0xff] %v2798_v34  ;;  %v2716_v38 = vsel %vm2715_vm12, %v2975_v11, %v2712_v57  ;;  %v2719_v58 = vmul.f32 %v2977_v3, %v2718_v47 }
 0x72e   :  { %v2755_v53 = vmul.f32 %v2716_v38, %v4391_v27  ;;  %v2756_v21 = vmul.f32 %v2716_v38, %v4394_v14 }
 0x72f   :  { %v2720_v2 = vmul.f32 0.5, %v2719_v58 }
 0x730   :  { %v2777_v22 = vmul.f32 %v4434_v42, %v2755_v53  ;;  %v2778_v51 = vmul.f32 %v4436_v30, %v2756_v21 }
 0x731   :  { %v2721_v19 = vsub.f32 1.5, %v2720_v2 }
 0x732   :  { %v2979_v39 = vpop.eup %2978  ;;  %v2799_v7 = vadd.f32 %v4438_v17, %v2777_v22  ;;  %v2800_v55 = vadd.f32 %v4440_v56, %v2778_v51 }
 0x733   :  { %v2722_v54 = vmul.f32 %v2977_v3, %v2721_v19  ;;  %v2728_v52 = vmul.f32 %v2979_v39, %v2665_v4  ;;  %vm2734_vm0 = vweird.f32 %v2979_v39 }
 0x734   :  { %2815 = vst [vmem:[#allocation24 + $0x40] sm:$0xff] %v2799_v7  ;;  %vm2735_vm2 = vmor %vm2733_vm1, %vm2734_vm0 }
 0x735   :  { %2816 = vst [vmem:[#allocation24 + $0x48] sm:$0xff] %v2800_v55  ;;  %v2726_v27 = vsel %vm2725_vm15, %v2977_v3, %v2722_v54  ;;  %v2729_v14 = vmul.f32 %v2979_v39, %v2728_v52 }
 0x736   :  { %v2757_v28 = vmul.f32 %v2726_v27, %v4402_v61  ;;  %v2758_v62 = vmul.f32 %v2726_v27, %v4405_v10 }
 0x737   :  { %v2730_v44 = vmul.f32 0.5, %v2729_v14 }
 0x738   :  { %v2779_v45 = vmul.f32 %v4434_v42, %v2757_v28  ;;  %v2780_v16 = vmul.f32 %v4436_v30, %v2758_v62 }
 0x739   :  { %v2731_v29 = vsub.f32 1.5, %v2730_v44 }
 0x73a   :  { %v2801_v36 = vadd.f32 %v4438_v17, %v2779_v45  ;;  %v2802_v18 = vadd.f32 %v4440_v56, %v2780_v16 }
 0x73b   :  { %v2732_v37 = vmul.f32 %v2979_v39, %v2731_v29 }
 0x73c   :  { %2817 = vst [vmem:[#allocation24 + $0x50] sm:$0xff] %v2801_v36 }
 0x73d   :  { %2818 = vst [vmem:[#allocation24 + $0x58] sm:$0xff] %v2802_v18  ;;  %v2736_v6 = vsel %vm2735_vm2, %v2979_v39, %v2732_v37 }
 0x73e   :  { %v2759_v61 = vmul.f32 %v2736_v6, %v4413_v46  ;;  %v2760_v10 = vmul.f32 %v2736_v6, %v4416_v25 }
 0x740   :  { %v2781_v23 = vmul.f32 %v4434_v42, %v2759_v61  ;;  %v2782_v9 = vmul.f32 %v4436_v30, %v2760_v10 }
 0x742   :  { %v2803_v1 = vadd.f32 %v4438_v17, %v2781_v23  ;;  %v2804_v13 = vadd.f32 %v4440_v56, %v2782_v9 }
 0x744   :  { %2819 = vst [vmem:[#allocation24 + $0x60] sm:$0xff] %v2803_v1 }
 0x745   :  { %2820 = vst [vmem:[#allocation24 + $0x68] sm:$0xff] %v2804_v13 }
 0x775   :  { %v2650_v31 = vpop.xlane.xlu0 %2649 }
 0x776   :  { %v2658_v60 = vmul.f32 %v2650_v31, %v4018_v41 }
 0x778   :  { %v2666_v11 = vadd.f32 1e-05, %v2658_v60 }
 0x77a   :  { %2980 = vrsqrt.f32 %v2666_v11  ;;  %vm2743_vm4 = vweird.f32 %v2666_v11 }
 0x780   :  { %v2981_v50 = vpop.eup %2980 }
 0x781   :  { %v2738_v35 = vmul.f32 %v2981_v50, %v2666_v11  ;;  %vm2744_vm3 = vweird.f32 %v2981_v50 }
 0x782   :  { %vm2745_vm5 = vmor %vm2743_vm4, %vm2744_vm3 }
 0x783   :  { %v2739_v46 = vmul.f32 %v2981_v50, %v2738_v35 }
 0x785   :  { %v2740_v33 = vmul.f32 0.5, %v2739_v46 }
 0x787   :  { %v2741_v25 = vsub.f32 1.5, %v2740_v33 }
 0x789   :  { %v2742_v48 = vmul.f32 %v2981_v50, %v2741_v25 }
 0x78b   :  { %v2746_v63 = vsel %vm2745_vm5, %v2981_v50, %v2742_v48 }
 0x78c   :  { %v2761_v43 = vmul.f32 %v2746_v63, %v4424_v24  ;;  %v2762_v20 = vmul.f32 %v2746_v63, %v4426_v32 }
 0x78e   :  { %v2783_v0 = vmul.f32 %v4434_v42, %v2761_v43  ;;  %v2784_v41 = vmul.f32 %v4436_v30, %v2762_v20 }
 0x790   :  { %v2805_v8 = vadd.f32 %v4438_v17, %v2783_v0  ;;  %v2806_v15 = vadd.f32 %v4440_v56, %v2784_v41 }
 0x792   :  { %2821 = vst [vmem:[#allocation24 + $0x70] sm:$0xff] %v2805_v8 }
 0x793   :  { %2822 = vst [vmem:[#allocation24 + $0x78] sm:$0xff] %v2806_v15 }
 0x794   :  { %2835 = dma.vmem_to_hbm [thread:$0]  %s2828_s17, 2048, %s2830_s2, [#allocation6], %s3330_s1, %s3330_s1, %s3331_s28  }
 0x795   :  { %3324 = dma.done.wait [#allocation6], 2048  }
 0x796   :  { %3325 = vsyncadd [#allocation6], 4294965248 }
 0x797   :  { %2840 = vsyncpa [#allocation5], 1 }
 0x798   :  { %2841 = vsyncpa [#allocation8], 1 }
 0x799   :  { %2842 = vsyncpa [#allocation11], 1 }
 0x79a   :  { %2843 = vsyncpa [#allocation14], 1 }
 0x79b   :  { %2844 = vsyncpa [#allocation17], 1 }
 0x79c   :  { %2845 = vsyncpa [#allocation20], 1 }
 0x79d   :  { %2846 = vsyncpa [#allocation23], 1 }
 0x79e   :  { %2847 = vsyncpa [#allocation6], 1 }

</bundles_post_ra>
